<compile_context>
chip_gen: v6e
topology: v6e:2x2x1
jax: 0.10.0
libtpu: 0.0.40
codegen_flags: <defaults>
</compile_context>

<pallas_src>
import functools
import math

import jax
import jax.numpy as jnp
from jax.experimental import pallas as pl
from jax.experimental.pallas import tpu as pltpu


def _round_up(x, m):
    return (x + m - 1) // m * m


def _detect_vmem_budget():
    """Generation-aware VMEM budget (~3/4 of physical VMEM).

    v5e/v6e (128 MiB) -> 96 MiB, v7x (64 MiB) -> 48 MiB.  Falls back to a
    conservative 48 MiB cap that is safe on every generation.
    """
    try:
        info = pltpu.get_tpu_info()
        cap = int(getattr(info, "vmem_capacity_bytes", 0) or 0)
        if cap > 0:
            return cap * 3 // 4
    except Exception:
        pass
    return 48 * 1024 * 1024


_VMEM_LIMIT = _detect_vmem_budget()


def _gelu(x):
    # tanh-approximate GELU on the f32 accumulator (EUP tanh path).
    # TODO(synk): PyTorch nn.GELU defaults to the exact erf form; the tanh
    # approximation differs by <1e-3 relative.
    c = 0.7978845608028654  # sqrt(2/pi)
    return 0.5 * x * (1.0 + jnp.tanh(c * (x + 0.044715 * x * x * x)))


# ----------------------------------------------------------------------------
# Generic fused linear kernel:  out = act( LN?(x) @ w + b ) (+ residual)
# Grid = (M tiles, N tiles, K tiles); f32 accumulator in VMEM scratch.
# LN (when fused) is computed once per row tile into a bf16 VMEM scratch and
# reused across all N tiles (no per-j recomputation of the VALU/XLU stats).
# ----------------------------------------------------------------------------

def _linear_kernel(*refs, activation, has_residual, has_ln):
    x_ref, w_ref, b_ref = refs[0], refs[1], refs[2]
    idx = 3
    if has_ln:
        g_ref, beta_ref = refs[idx], refs[idx + 1]
        idx += 2
    if has_residual:
        r_ref = refs[idx]
        idx += 1
    o_ref = refs[idx]
    acc_ref = refs[idx + 1]
    xn_ref = refs[idx + 2] if has_ln else None

    j = pl.program_id(1)
    k = pl.program_id(2)

    @pl.when(k == 0)
    def _init():
        # Fold the bias into the accumulator init (applied exactly once).
        acc_ref[...] = jnp.broadcast_to(
            b_ref[...].astype(jnp.float32), acc_ref.shape)

    if has_ln:
        # tile_k == K when has_ln (single k step).  Normalize once per row
        # tile (j == 0) and reuse the cached bf16 activations for all N tiles.
        @pl.when(j == 0)
        def _norm():
            xf = x_ref[...].astype(jnp.float32)
            mu = jnp.mean(xf, axis=-1, keepdims=True)
            xc = xf - mu
            var = jnp.mean(xc * xc, axis=-1, keepdims=True)
            xn = xc * jax.lax.rsqrt(var + 1e-5) * g_ref[...] + beta_ref[...]
            xn_ref[...] = xn.astype(xn_ref.dtype)

        x = xn_ref[...]
    else:
        x = x_ref[...]

    acc_ref[...] += jnp.dot(x, w_ref[...], preferred_element_type=jnp.float32)

    @pl.when(k == pl.num_programs(2) - 1)
    def _finalize():
        y = acc_ref[...]
        if activation == "relu":
            y = jnp.maximum(y, 0.0)
        elif activation == "gelu":
            y = _gelu(y)
        if has_residual:
            y = y + r_ref[...].astype(jnp.float32)
        o_ref[...] = y.astype(o_ref.dtype)


def linear_pallas(x, w, b, *, activation=None, residual=None, ln=None,
                  out_dtype=jnp.bfloat16):
    """y = act(LN?(x) @ w + b) (+ residual).

    x:(M,K)  w:(K,N)  b:(N,).  bf16 MXU matmul, f32 accumulation.
    ln=(gamma, beta) fuses a LayerNorm over K (requires a single K block).
    """
    M, K = x.shape
    Kw, N = w.shape
    assert Kw == K
    has_ln = ln is not None
    has_res = residual is not None

    # ---- N tile: prefer 256-wide tiles to feed the 256-wide MXU (v6e/v7x) ---
    if N % 256 == 0:
        tile_n = 256
    elif N % 128 == 0:
        tile_n = 128
    else:
        tile_n = N
    # ---- K tile: LN statistics need the whole row ----
    tile_k = K if (has_ln or K % 512 != 0) else 512

    # ---- M tile: largest candidate that fits the per-generation VMEM budget -
    def _vmem_bytes(tm):
        byt = 2 * tm * tile_k * 2            # x (double-buffered bf16)
        byt += 2 * tile_k * tile_n * 2       # w
        byt += 2 * tile_n * 4                # bias (f32)
        byt += 2 * tm * tile_n * 2           # out
        byt += tm * tile_n * 4               # f32 accumulator scratch
        if has_ln:
            byt += 4 * tile_k * 4            # gamma / beta (f32, x2 buffers)
            byt += tm * K * 2                # cached normalized activations
        if has_res:
            byt += 2 * tm * tile_n * 2
        return byt

    tile_m = 128
    for cand in (512, 384, 256):
        if _vmem_bytes(cand) <= int(0.8 * _VMEM_LIMIT):
            tile_m = cand
            break
    if M <= tile_m:
        tile_m = _round_up(M, 8)
        Mp = tile_m
    else:
        Mp = _round_up(M, tile_m)

    if Mp != M:
        x = jnp.pad(x, ((0, Mp - M), (0, 0)))
        if has_res:
            residual = jnp.pad(residual, ((0, Mp - M), (0, 0)))

    grid = (Mp // tile_m, N // tile_n, K // tile_k)

    in_specs = [
        pl.BlockSpec((tile_m, tile_k), lambda i, j, k: (i, k)),
        pl.BlockSpec((tile_k, tile_n), lambda i, j, k: (k, j)),
        pl.BlockSpec((1, tile_n), lambda i, j, k: (0, j)),
    ]
    args = [x.astype(jnp.bfloat16), w.astype(jnp.bfloat16),
            b.reshape(1, N).astype(jnp.float32)]
    if has_ln:
        g, be = ln
        in_specs += [pl.BlockSpec((1, tile_k), lambda i, j, k: (0, k)),
                     pl.BlockSpec((1, tile_k), lambda i, j, k: (0, k))]
        args += [g.reshape(1, K).astype(jnp.float32),
                 be.reshape(1, K).astype(jnp.float32)]
    if has_res:
        in_specs.append(pl.BlockSpec((tile_m, tile_n), lambda i, j, k: (i, j)))
        args.append(residual)

    scratch = [pltpu.VMEM((tile_m, tile_n), jnp.float32)]
    if has_ln:
        scratch.append(pltpu.VMEM((tile_m, K), jnp.bfloat16))

    # With LN cached across N tiles, the j axis must stay on one core so that
    # j == 0 is always visited first for each row tile.
    dims = (("parallel", "arbitrary", "arbitrary") if has_ln
            else ("parallel", "parallel", "arbitrary"))

    kernel = functools.partial(_linear_kernel, activation=activation,
                               has_residual=has_res, has_ln=has_ln)
    out = pl.pallas_call(
        kernel,
        grid=grid,
        in_specs=in_specs,
        out_specs=pl.BlockSpec((tile_m, tile_n), lambda i, j, k: (i, j)),
        out_shape=jax.ShapeDtypeStruct((Mp, N), out_dtype),
        scratch_shapes=scratch,
        compiler_params=pltpu.CompilerParams(
            dimension_semantics=dims,
            vmem_limit_bytes=_VMEM_LIMIT),
    )(*args)
    if Mp != M:
        out = out[:M]
    return out


# ----------------------------------------------------------------------------
# Fused attention block:  x + WO(MSA(LN1(x)))  in one kernel, grid = (B,).
# Per-head weight slices come from leading-axis ref indexing (no lane-dim
# slicing of activations), head outputs are folded into the WO accumulation
# (no lane-dim concatenate), residual + output bias seed the accumulator.
# ----------------------------------------------------------------------------

def _attn_block_kernel(x_ref, g_ref, bt_ref, wq_ref, wk_ref, wv_ref,
                       bq_ref, bk_ref, bv_ref, wo_ref, bo_ref, o_ref,
                       *, head, n_real, scale):
    x = x_ref[0]                                   # (Np, hidden) bf16
    xf = x.astype(jnp.float32)

    # Pre-LN, f32 statistics, computed once per batch element.
    mu = jnp.mean(xf, axis=-1, keepdims=True)
    xc = xf - mu
    var = jnp.mean(xc * xc, axis=-1, keepdims=True)
    xn = (xc * jax.lax.rsqrt(var + 1e-5) * g_ref[...] + bt_ref[...]
          ).astype(jnp.bfloat16)

    n_pad = x.shape[0]
    # Mask padded key tokens (token dim was padded once in the wrapper).
    key_mask = jax.lax.broadcasted_iota(jnp.int32, (n_pad, n_pad), 1) < n_real

    # Residual + output-projection bias folded into the accumulator init.
    acc = xf + bo_ref[...].astype(jnp.float32)

    for h in range(head):                          # small, static -> unrolled
        q = jnp.dot(xn, wq_ref[h], preferred_element_type=jnp.float32) + bq_ref[h]
        k = jnp.dot(xn, wk_ref[h], preferred_element_type=jnp.float32) + bk_ref[h]
        v = jnp.dot(xn, wv_ref[h], preferred_element_type=jnp.float32) + bv_ref[h]
        q = (q * scale).astype(jnp.bfloat16)       # fold 1/sqrt(d) into q (N*d)
        k = k.astype(jnp.bfloat16)
        v = v.astype(jnp.bfloat16)
        s = jax.lax.dot_general(q, k, (((1,), (1,)), ((), ())),
                                preferred_element_type=jnp.float32)  # (Np, Np)
        s = jnp.where(key_mask, s, -1e30)
        m = jnp.max(s, axis=-1, keepdims=True)
        p = jnp.exp(s - m)
        l = jnp.sum(p, axis=-1, keepdims=True)
        p = (p * pl.reciprocal(l, approx=True)).astype(jnp.bfloat16)
        oh = jnp.dot(p, v, preferred_element_type=jnp.float32).astype(jnp.bfloat16)
        # WO fused:  concat_h(o_h) @ Wo == sum_h (o_h @ Wo[h])
        acc = acc + jnp.dot(oh, wo_ref[h], preferred_element_type=jnp.float32)

    o_ref[0] = acc.astype(o_ref.dtype)


def attention_block_pallas(x, p, *, head, hidden, n_real):
    """x: (B, Np, hidden) bf16  ->  x + WO(MSA(LN1(x)))  (B, Np, hidden) bf16."""
    B, n_pad, _ = x.shape
    d = hidden // head
    scale = 1.0 / math.sqrt(d)

    in_specs = [
        pl.BlockSpec((1, n_pad, hidden), lambda b: (b, 0, 0)),   # x
        pl.BlockSpec((1, hidden), lambda b: (0, 0)),             # ln1 gamma
        pl.BlockSpec((1, hidden), lambda b: (0, 0)),             # ln1 beta
        pl.BlockSpec((head, hidden, d), lambda b: (0, 0, 0)),    # wq
        pl.BlockSpec((head, hidden, d), lambda b: (0, 0, 0)),    # wk
        pl.BlockSpec((head, hidden, d), lambda b: (0, 0, 0)),    # wv
        pl.BlockSpec((head, 1, d), lambda b: (0, 0, 0)),         # bq
        pl.BlockSpec((head, 1, d), lambda b: (0, 0, 0)),         # bk
        pl.BlockSpec((head, 1, d), lambda b: (0, 0, 0)),         # bv
        pl.BlockSpec((head, d, hidden), lambda b: (0, 0, 0)),    # wo
        pl.BlockSpec((1, hidden), lambda b: (0, 0)),             # bo
    ]
    args = [
        x.astype(jnp.bfloat16),
        p["ln1_g"].reshape(1, hidden).astype(jnp.float32),
        p["ln1_b"].reshape(1, hidden).astype(jnp.float32),
        p["wq"].astype(jnp.bfloat16),
        p["wk"].astype(jnp.bfloat16),
        p["wv"].astype(jnp.bfloat16),
        p["bq"].astype(jnp.float32),
        p["bk"].astype(jnp.float32),
        p["bv"].astype(jnp.float32),
        p["wo"].astype(jnp.bfloat16),
        p["bo"].reshape(1, hidden).astype(jnp.float32),
    ]
    kernel = functools.partial(_attn_block_kernel, head=head,
                               n_real=n_real, scale=scale)
    return pl.pallas_call(
        kernel,
        grid=(B,),
        in_specs=in_specs,
        out_specs=pl.BlockSpec((1, n_pad, hidden), lambda b: (b, 0, 0)),
        out_shape=jax.ShapeDtypeStruct((B, n_pad, hidden), jnp.bfloat16),
        compiler_params=pltpu.CompilerParams(
            dimension_semantics=("parallel",),
            vmem_limit_bytes=_VMEM_LIMIT),
    )(*args)


# ----------------------------------------------------------------------------
# Fused MLP block:  x + W2(GELU(W1(LN2(x))))  in one kernel, grid over row
# tiles; falls back to two tiled matmuls when the weights exceed the budget.
# ----------------------------------------------------------------------------

def _mlp_block_kernel(x_ref, g_ref, bt_ref, w1_ref, b1_ref, w2_ref, b2_ref,
                      o_ref):
    xf = x_ref[...].astype(jnp.float32)
    mu = jnp.mean(xf, axis=-1, keepdims=True)
    xc = xf - mu
    var = jnp.mean(xc * xc, axis=-1, keepdims=True)
    xn = (xc * jax.lax.rsqrt(var + 1e-5) * g_ref[...] + bt_ref[...]
          ).astype(jnp.bfloat16)
    h = jnp.dot(xn, w1_ref[...], preferred_element_type=jnp.float32) + b1_ref[...]
    h = _gelu(h).astype(jnp.bfloat16)
    y = jnp.dot(h, w2_ref[...], preferred_element_type=jnp.float32) + b2_ref[...]
    o_ref[...] = (y + xf).astype(o_ref.dtype)


def mlp_block(x2d, p, *, hidden, mlp_hidden):
    """x2d: (M, hidden) bf16 -> x2d + W2(GELU(W1(LN2(x2d)))) (M, hidden) bf16."""
    M, _ = x2d.shape
    tile_m = next((c for c in (512, 256, 128) if M > c and M % c == 0), M)

    est = (2 * 2 * tile_m * hidden * 2           # x + out, double-buffered bf16
           + 2 * 2 * hidden * mlp_hidden * 2     # w1 + w2, double-buffered bf16
           + 3 * tile_m * mlp_hidden * 4)        # h intermediate + spill slack
    if est > int(0.6 * _VMEM_LIMIT) or M % 8 != 0:
        # Tiled fallback: LN fused into W1, residual fused into W2.
        h = linear_pallas(x2d, p["w1"], p["b1"], activation="gelu",
                          ln=(p["ln2_g"], p["ln2_b"]))
        return linear_pallas(h, p["w2"], p["b2"], residual=x2d)

    args = [
        x2d.astype(jnp.bfloat16),
        p["ln2_g"].reshape(1, hidden).astype(jnp.float32),
        p["ln2_b"].reshape(1, hidden).astype(jnp.float32),
        p["w1"].astype(jnp.bfloat16),
        p["b1"].reshape(1, mlp_hidden).astype(jnp.float32),
        p["w2"].astype(jnp.bfloat16),
        p["b2"].reshape(1, hidden).astype(jnp.float32),
    ]
    return pl.pallas_call(
        _mlp_block_kernel,
        grid=(M // tile_m,),
        in_specs=[
            pl.BlockSpec((tile_m, hidden), lambda i: (i, 0)),
            pl.BlockSpec((1, hidden), lambda i: (0, 0)),
            pl.BlockSpec((1, hidden), lambda i: (0, 0)),
            pl.BlockSpec((hidden, mlp_hidden), lambda i: (0, 0)),
            pl.BlockSpec((1, mlp_hidden), lambda i: (0, 0)),
            pl.BlockSpec((mlp_hidden, hidden), lambda i: (0, 0)),
            pl.BlockSpec((1, hidden), lambda i: (0, 0)),
        ],
        out_specs=pl.BlockSpec((tile_m, hidden), lambda i: (i, 0)),
        out_shape=jax.ShapeDtypeStruct((M, hidden), jnp.bfloat16),
        compiler_params=pltpu.CompilerParams(
            dimension_semantics=("parallel",),
            vmem_limit_bytes=_VMEM_LIMIT),
    )(*args)


# ----------------------------------------------------------------------------
# Model pieces (thin glue around the kernels)
# ----------------------------------------------------------------------------

def conv3x3_relu_nhwc(x, w, b):
    """Stand-in CNN stem: Conv2d 3x3 stride-1 pad-1 + ReLU.  NCHW in, NHWC out.

    TODO(synk): the PyTorch module loads a frozen pretrained CNN feature
    extractor from a checkpoint; no weights exist here, so a deterministic
    3x3 conv+ReLU stand-in with the same layout contract is used.
    TODO(synk): the im2col gather stays in XLA; a streaming 9-tap K-axis
    accumulation (shifted-window index_maps) would remove the 9x HBM copy for
    realistic image sizes, but is unnecessary for this stand-in stem.
    """
    B, C, H, W = x.shape
    Cout = w.shape[0]
    xp = jnp.pad(x, ((0, 0), (0, 0), (1, 1), (1, 1)))
    cols = jnp.stack([xp[:, :, i:i + H, j:j + W]
                      for i in range(3) for j in range(3)], axis=2)  # (B,C,9,H,W)
    cols = cols.transpose(0, 3, 4, 1, 2).reshape(B * H * W, C * 9)
    wmat = w.transpose(1, 2, 3, 0).reshape(C * 9, Cout)
    y = linear_pallas(cols, wmat, b, activation="relu")
    return y.reshape(B, H, W, Cout)      # NHWC: avoids an NCHW round-trip


def to_words_nhwc(feat, patch):
    """(B, H, W, C) NHWC -> (B, patch^2, ps*ps*C); matches PyTorch _to_words."""
    B, H, W, C = feat.shape
    ps = H // patch
    out = feat.reshape(B, patch, ps, patch, ps, C).transpose(0, 1, 3, 2, 4, 5)
    return out.reshape(B, patch * patch, ps * ps * C)


def transformer_encoder_layer(x, p, *, B, n_pad, n_real, hidden, head,
                              mlp_hidden):
    # pre-LN encoder:  x = x + WO(MSA(LN1(x)));  x = x + W2(GELU(W1(LN2(x))))
    x1 = attention_block_pallas(x, p, head=head, hidden=hidden, n_real=n_real)
    x2 = mlp_block(x1.reshape(B * n_pad, hidden), p,
                   hidden=hidden, mlp_hidden=mlp_hidden)
    return x2.reshape(B, n_pad, hidden)


def vit_embedded_forward(x, params, cfg):
    B = x.shape[0]
    hidden, head, patch = cfg["hidden"], cfg["head"], cfg["patch"]
    mlp_hidden = cfg["mlp_hidden"]

    x = x.astype(jnp.bfloat16)
    feat = conv3x3_relu_nhwc(x, params["conv_w"], params["conv_b"])  # self.cnn(x)
    words = to_words_nhwc(feat, patch)                               # _to_words
    _, P2, f = words.shape

    emb = linear_pallas(words.reshape(B * P2, f), params["emb_w"],
                        params["emb_b"]).reshape(B, P2, hidden)

    cls = jnp.broadcast_to(params["cls_token"], (B, 1, hidden)).astype(jnp.bfloat16)
    out = jnp.concatenate([cls, emb], axis=1)                        # cls token
    out = (out + params["pos_emb"]).astype(jnp.bfloat16)             # pos embedding

    # Pad the token dimension ONCE and carry the padded length through the
    # whole encoder; padded key tokens are masked inside the attention kernel.
    n_real = out.shape[1]
    n_pad = _round_up(n_real, 8)
    if n_pad != n_real:
        out = jnp.pad(out, ((0, 0), (0, n_pad - n_real), (0, 0)))

    for layer in params["layers"]:
        out = transformer_encoder_layer(out, layer, B=B, n_pad=n_pad,
                                        n_real=n_real, hidden=hidden,
                                        head=head, mlp_hidden=mlp_hidden)

    cls_out = out[:, 0]                                              # take CLS
    logits = linear_pallas(cls_out, params["fc_w"], params["fc_b"],
                           ln=(params["fc_ln_g"], params["fc_ln_b"]),
                           out_dtype=jnp.float32)                    # LN + Linear
    return logits


# ----------------------------------------------------------------------------
# Deterministic parameter init (bf16 weights, f32 biases / LN params).
# Attention weights are stored head-major so the kernel never lane-slices.
# ----------------------------------------------------------------------------

def init_params(key, cfg):
    hidden = cfg["hidden"]
    mlp_hidden = cfg["mlp_hidden"]
    head = cfg["head"]
    d = hidden // head
    patch = cfg["patch"]
    img = cfg["img_size"]
    feat_c = cfg["feat_c"]
    f = (img // patch) ** 2 * feat_c
    num_tokens = patch ** 2 + 1

    keys = iter(jax.random.split(key, 64))

    def nrm(shape, scale=0.02, dtype=jnp.bfloat16):
        return (scale * jax.random.normal(next(keys), shape, jnp.float32)).astype(dtype)

    def layer_params():
        return {
            "ln1_g": jnp.ones((hidden,), jnp.float32),
            "ln1_b": jnp.zeros((hidden,), jnp.float32),
            "wq": nrm((head, hidden, d)),
            "wk": nrm((head, hidden, d)),
            "wv": nrm((head, hidden, d)),
            "bq": jnp.zeros((head, 1, d), jnp.float32),
            "bk": jnp.zeros((head, 1, d), jnp.float32),
            "bv": jnp.zeros((head, 1, d), jnp.float32),
            "wo": nrm((head, d, hidden)),
            "bo": jnp.zeros((hidden,), jnp.float32),
            "ln2_g": jnp.ones((hidden,), jnp.float32),
            "ln2_b": jnp.zeros((hidden,), jnp.float32),
            "w1": nrm((hidden, mlp_hidden)),
            "b1": jnp.zeros((mlp_hidden,), jnp.float32),
            "w2": nrm((mlp_hidden, hidden)),
            "b2": jnp.zeros((hidden,), jnp.float32),
        }

    return {
        "conv_w": nrm((feat_c, cfg["in_c"], 3, 3), 0.1),
        "conv_b": jnp.zeros((feat_c,), jnp.float32),
        "emb_w": nrm((f, hidden)),
        "emb_b": jnp.zeros((hidden,), jnp.float32),
        "cls_token": nrm((1, 1, hidden), 1.0),               # torch.randn -> std 1
        "pos_emb": nrm((1, num_tokens, hidden), 1.0),        # torch.randn -> std 1
        "layers": [layer_params() for _ in range(cfg["num_layers"])],
        "fc_ln_g": jnp.ones((hidden,), jnp.float32),
        "fc_ln_b": jnp.zeros((hidden,), jnp.float32),
        "fc_w": nrm((hidden, cfg["num_classes"])),
        "fc_b": jnp.zeros((cfg["num_classes"],), jnp.float32),
    }


# ----------------------------------------------------------------------------

if __name__ == "__main__":
    cfg = dict(
        in_c=3, num_classes=10, img_size=16, patch=4,
        num_layers=2, hidden=32, mlp_hidden=64, head=4,
        feat_c=8,          # channels produced by the stand-in CNN stem
    )
    key = jax.random.PRNGKey(0)
    params = init_params(key, cfg)

    x = jax.random.normal(jax.random.PRNGKey(0),
                          (2, cfg["in_c"], cfg["img_size"], cfg["img_size"]),
                          jnp.float32)

    fwd = jax.jit(functools.partial(vit_embedded_forward, cfg=cfg))
    logits = jax.block_until_ready(fwd(x, params))
    assert logits.shape == (2, cfg["num_classes"]), logits.shape
    assert bool(jnp.all(jnp.isfinite(logits)))
    print("KERNEL_OK")
</pallas_src>

<mosaic_0001>
module attributes {stable_mosaic.version = 11 : i64} {
  func.func @_linear_kernel(%arg0: i32, %arg1: i32, %arg2: i32, %arg3: memref<512x27xbf16, #tpu.memory_space<vmem>>, %arg4: memref<27x8xbf16, #tpu.memory_space<vmem>>, %arg5: memref<1x8xf32, #tpu.memory_space<vmem>>, %arg6: memref<512x8xbf16, #tpu.memory_space<vmem>>, %arg7: memref<512x8xf32, #tpu.memory_space<vmem>>) attributes {dimension_semantics = [#tpu.dimension_semantics<parallel>, #tpu.dimension_semantics<parallel>, #tpu.dimension_semantics<arbitrary>], iteration_bounds = array<i64: 1, 1, 1>, scalar_prefetch = 0 : i64, scratch_operands = 1 : i64, tpu.core_type = #tpu.core_type<tc>, window_params = [{transform_indices = @transform_0, window_bounds = array<i64: 512, 27>}, {transform_indices = @transform_1, window_bounds = array<i64: 27, 8>}, {transform_indices = @transform_2, window_bounds = array<i64: 1, 8>}, {transform_indices = @transform_3, window_bounds = array<i64: 512, 8>}]} {
    %c0_i32 = arith.constant 0 : i32
    %0 = arith.cmpi eq, %arg2, %c0_i32 : i32
    %1 = arith.extui %0 : i1 to i32
    %c0_i32_0 = arith.constant 0 : i32
    %2 = arith.cmpi ne, %1, %c0_i32_0 : i32
    scf.if %2 {
      %c0_10 = arith.constant 0 : index
      %c0_11 = arith.constant 0 : index
      %12 = vector.load %arg5[%c0_10, %c0_11] : memref<1x8xf32, #tpu.memory_space<vmem>>, vector<1x8xf32>
      %13 = vector.shape_cast %12 : vector<1x8xf32> to vector<1x8xf32>
      %14 = vector.broadcast %13 : vector<1x8xf32> to vector<512x8xf32>
      %c0_12 = arith.constant 0 : index
      %c0_13 = arith.constant 0 : index
      %15 = vector.load %arg7[%c0_12, %c0_13] : memref<512x8xf32, #tpu.memory_space<vmem>>, vector<512x8xf32>
      tpu.vector_store %arg7[%c0_12, %c0_13], %14 {strides = array<i32>} : memref<512x8xf32, #tpu.memory_space<vmem>>, vector<512x8xf32>,
    } else {
    }
    %c0 = arith.constant 0 : index
    %c0_1 = arith.constant 0 : index
    %3 = vector.load %arg3[%c0, %c0_1] : memref<512x27xbf16, #tpu.memory_space<vmem>>, vector<512x27xbf16>
    %c0_2 = arith.constant 0 : index
    %c0_3 = arith.constant 0 : index
    %4 = vector.load %arg7[%c0_2, %c0_3] : memref<512x8xf32, #tpu.memory_space<vmem>>, vector<512x8xf32>
    %c0_4 = arith.constant 0 : index
    %c0_5 = arith.constant 0 : index
    %5 = vector.load %arg4[%c0_4, %c0_5] : memref<27x8xbf16, #tpu.memory_space<vmem>>, vector<27x8xbf16>
    %cst = arith.constant dense<0.000000e+00> : vector<512x8xf32>
    %6 = tpu.matmul %3, %5, %cst {dimension_numbers = #tpu.dot_dimension_numbers<[1], [0], [0], [1], [0, 0, 1, 1], [], []>} : vector<512x27xbf16>, vector<27x8xbf16>, vector<512x8xf32> -> vector<512x8xf32>
    %7 = arith.addf %4, %6 : vector<512x8xf32>
    %c0_6 = arith.constant 0 : index
    %c0_7 = arith.constant 0 : index
    %8 = vector.load %arg7[%c0_6, %c0_7] : memref<512x8xf32, #tpu.memory_space<vmem>>, vector<512x8xf32>
    tpu.vector_store %arg7[%c0_6, %c0_7], %7 {strides = array<i32>} : memref<512x8xf32, #tpu.memory_space<vmem>>, vector<512x8xf32>,
    %c0_i32_8 = arith.constant 0 : i32
    %9 = arith.cmpi eq, %arg2, %c0_i32_8 : i32
    %10 = arith.extui %9 : i1 to i32
    %c0_i32_9 = arith.constant 0 : i32
    %11 = arith.cmpi ne, %10, %c0_i32_9 : i32
    scf.if %11 {
      %c0_10 = arith.constant 0 : index
      %c0_11 = arith.constant 0 : index
      %12 = vector.load %arg7[%c0_10, %c0_11] : memref<512x8xf32, #tpu.memory_space<vmem>>, vector<512x8xf32>
      %cst_12 = arith.constant 0.000000e+00 : f32
      %13 = vector.broadcast %cst_12 : f32 to vector<512x8xf32>
      %14 = arith.maximumf %12, %13 : vector<512x8xf32>
      %15 = arith.truncf %14 : vector<512x8xf32> to vector<512x8xbf16>
      %c0_13 = arith.constant 0 : index
      %c0_14 = arith.constant 0 : index
      %16 = vector.load %arg6[%c0_13, %c0_14] : memref<512x8xbf16, #tpu.memory_space<vmem>>, vector<512x8xbf16>
      tpu.vector_store %arg6[%c0_13, %c0_14], %15 {strides = array<i32>} : memref<512x8xbf16, #tpu.memory_space<vmem>>, vector<512x8xbf16>,
    } else {
    }
    return
  }
  func.func @transform_0(%arg0: i32, %arg1: i32, %arg2: i32) -> (i32, i32) {
    %c0_i32 = arith.constant 0 : i32
    return %arg0, %arg2 : i32, i32
  }
  func.func @transform_1(%arg0: i32, %arg1: i32, %arg2: i32) -> (i32, i32) {
    %c0_i32 = arith.constant 0 : i32
    return %arg2, %arg1 : i32, i32
  }
  func.func @transform_2(%arg0: i32, %arg1: i32, %arg2: i32) -> (i32, i32) {
    %c0_i32 = arith.constant 0 : i32
    %c0_i32_0 = arith.constant 0 : i32
    return %c0_i32, %arg1 : i32, i32
  }
  func.func @transform_3(%arg0: i32, %arg1: i32, %arg2: i32) -> (i32, i32) {
    %c0_i32 = arith.constant 0 : i32
    return %arg0, %arg1 : i32, i32
  }
}

module attributes {stable_mosaic.version = 11 : i64} {
  func.func @_linear_kernel(%arg0: i32, %arg1: i32, %arg2: i32, %arg3: memref<32x128xbf16, #tpu.memory_space<vmem>>, %arg4: memref<128x32xbf16, #tpu.memory_space<vmem>>, %arg5: memref<1x32xf32, #tpu.memory_space<vmem>>, %arg6: memref<32x32xbf16, #tpu.memory_space<vmem>>, %arg7: memref<32x32xf32, #tpu.memory_space<vmem>>) attributes {dimension_semantics = [#tpu.dimension_semantics<parallel>, #tpu.dimension_semantics<parallel>, #tpu.dimension_semantics<arbitrary>], iteration_bounds = array<i64: 1, 1, 1>, scalar_prefetch = 0 : i64, scratch_operands = 1 : i64, tpu.core_type = #tpu.core_type<tc>, window_params = [{transform_indices = @transform_0, window_bounds = array<i64: 32, 128>}, {transform_indices = @transform_1, window_bounds = array<i64: 128, 32>}, {transform_indices = @transform_2, window_bounds = array<i64: 1, 32>}, {transform_indices = @transform_3, window_bounds = array<i64: 32, 32>}]} {
    %c0_i32 = arith.constant 0 : i32
    %0 = arith.cmpi eq, %arg2, %c0_i32 : i32
    %1 = arith.extui %0 : i1 to i32
    %c0_i32_0 = arith.constant 0 : i32
    %2 = arith.cmpi ne, %1, %c0_i32_0 : i32
    scf.if %2 {
      %c0_10 = arith.constant 0 : index
      %c0_11 = arith.constant 0 : index
      %12 = vector.load %arg5[%c0_10, %c0_11] : memref<1x32xf32, #tpu.memory_space<vmem>>, vector<1x32xf32>
      %13 = vector.shape_cast %12 : vector<1x32xf32> to vector<1x32xf32>
      %14 = vector.broadcast %13 : vector<1x32xf32> to vector<32x32xf32>
      %c0_12 = arith.constant 0 : index
      %c0_13 = arith.constant 0 : index
      %15 = vector.load %arg7[%c0_12, %c0_13] : memref<32x32xf32, #tpu.memory_space<vmem>>, vector<32x32xf32>
      tpu.vector_store %arg7[%c0_12, %c0_13], %14 {strides = array<i32>} : memref<32x32xf32, #tpu.memory_space<vmem>>, vector<32x32xf32>,
    } else {
    }
    %c0 = arith.constant 0 : index
    %c0_1 = arith.constant 0 : index
    %3 = vector.load %arg3[%c0, %c0_1] : memref<32x128xbf16, #tpu.memory_space<vmem>>, vector<32x128xbf16>
    %c0_2 = arith.constant 0 : index
    %c0_3 = arith.constant 0 : index
    %4 = vector.load %arg7[%c0_2, %c0_3] : memref<32x32xf32, #tpu.memory_space<vmem>>, vector<32x32xf32>
    %c0_4 = arith.constant 0 : index
    %c0_5 = arith.constant 0 : index
    %5 = vector.load %arg4[%c0_4, %c0_5] : memref<128x32xbf16, #tpu.memory_space<vmem>>, vector<128x32xbf16>
    %cst = arith.constant dense<0.000000e+00> : vector<32x32xf32>
    %6 = tpu.matmul %3, %5, %cst {dimension_numbers = #tpu.dot_dimension_numbers<[1], [0], [0], [1], [0, 0, 1, 1], [], []>} : vector<32x128xbf16>, vector<128x32xbf16>, vector<32x32xf32> -> vector<32x32xf32>
    %7 = arith.addf %4, %6 : vector<32x32xf32>
    %c0_6 = arith.constant 0 : index
    %c0_7 = arith.constant 0 : index
    %8 = vector.load %arg7[%c0_6, %c0_7] : memref<32x32xf32, #tpu.memory_space<vmem>>, vector<32x32xf32>
    tpu.vector_store %arg7[%c0_6, %c0_7], %7 {strides = array<i32>} : memref<32x32xf32, #tpu.memory_space<vmem>>, vector<32x32xf32>,
    %c0_i32_8 = arith.constant 0 : i32
    %9 = arith.cmpi eq, %arg2, %c0_i32_8 : i32
    %10 = arith.extui %9 : i1 to i32
    %c0_i32_9 = arith.constant 0 : i32
    %11 = arith.cmpi ne, %10, %c0_i32_9 : i32
    scf.if %11 {
      %c0_10 = arith.constant 0 : index
      %c0_11 = arith.constant 0 : index
      %12 = vector.load %arg7[%c0_10, %c0_11] : memref<32x32xf32, #tpu.memory_space<vmem>>, vector<32x32xf32>
      %13 = arith.truncf %12 : vector<32x32xf32> to vector<32x32xbf16>
      %c0_12 = arith.constant 0 : index
      %c0_13 = arith.constant 0 : index
      %14 = vector.load %arg6[%c0_12, %c0_13] : memref<32x32xbf16, #tpu.memory_space<vmem>>, vector<32x32xbf16>
      tpu.vector_store %arg6[%c0_12, %c0_13], %13 {strides = array<i32>} : memref<32x32xbf16, #tpu.memory_space<vmem>>, vector<32x32xbf16>,
    } else {
    }
    return
  }
  func.func @transform_0(%arg0: i32, %arg1: i32, %arg2: i32) -> (i32, i32) {
    %c0_i32 = arith.constant 0 : i32
    return %arg0, %arg2 : i32, i32
  }
  func.func @transform_1(%arg0: i32, %arg1: i32, %arg2: i32) -> (i32, i32) {
    %c0_i32 = arith.constant 0 : i32
    return %arg2, %arg1 : i32, i32
  }
  func.func @transform_2(%arg0: i32, %arg1: i32, %arg2: i32) -> (i32, i32) {
    %c0_i32 = arith.constant 0 : i32
    %c0_i32_0 = arith.constant 0 : i32
    return %c0_i32, %arg1 : i32, i32
  }
  func.func @transform_3(%arg0: i32, %arg1: i32, %arg2: i32) -> (i32, i32) {
    %c0_i32 = arith.constant 0 : i32
    return %arg0, %arg1 : i32, i32
  }
}

module attributes {stable_mosaic.version = 11 : i64} {
  func.func @_attn_block_kernel(%arg0: i32, %arg1: memref<1x24x32xbf16, #tpu.memory_space<vmem>>, %arg2: memref<1x32xf32, #tpu.memory_space<vmem>>, %arg3: memref<1x32xf32, #tpu.memory_space<vmem>>, %arg4: memref<4x32x8xbf16, #tpu.memory_space<vmem>>, %arg5: memref<4x32x8xbf16, #tpu.memory_space<vmem>>, %arg6: memref<4x32x8xbf16, #tpu.memory_space<vmem>>, %arg7: memref<4x1x8xf32, #tpu.memory_space<vmem>>, %arg8: memref<4x1x8xf32, #tpu.memory_space<vmem>>, %arg9: memref<4x1x8xf32, #tpu.memory_space<vmem>>, %arg10: memref<4x8x32xbf16, #tpu.memory_space<vmem>>, %arg11: memref<1x32xf32, #tpu.memory_space<vmem>>, %arg12: memref<1x24x32xbf16, #tpu.memory_space<vmem>>) attributes {dimension_semantics = [#tpu.dimension_semantics<parallel>], iteration_bounds = array<i64: 2>, scalar_prefetch = 0 : i64, scratch_operands = 0 : i64, tpu.core_type = #tpu.core_type<tc>, window_params = [{transform_indices = @transform_0, window_bounds = array<i64: 1, 24, 32>}, {pipeline_mode = #tpu.pipeline_mode<synchronous>, transform_indices = @transform_1, window_bounds = array<i64: 1, 32>}, {pipeline_mode = #tpu.pipeline_mode<synchronous>, transform_indices = @transform_2, window_bounds = array<i64: 1, 32>}, {pipeline_mode = #tpu.pipeline_mode<synchronous>, transform_indices = @transform_3, window_bounds = array<i64: 4, 32, 8>}, {pipeline_mode = #tpu.pipeline_mode<synchronous>, transform_indices = @transform_4, window_bounds = array<i64: 4, 32, 8>}, {pipeline_mode = #tpu.pipeline_mode<synchronous>, transform_indices = @transform_5, window_bounds = array<i64: 4, 32, 8>}, {pipeline_mode = #tpu.pipeline_mode<synchronous>, transform_indices = @transform_6, window_bounds = array<i64: 4, 1, 8>}, {pipeline_mode = #tpu.pipeline_mode<synchronous>, transform_indices = @transform_7, window_bounds = array<i64: 4, 1, 8>}, {pipeline_mode = #tpu.pipeline_mode<synchronous>, transform_indices = @transform_8, window_bounds = array<i64: 4, 1, 8>}, {pipeline_mode = #tpu.pipeline_mode<synchronous>, transform_indices = @transform_9, window_bounds = array<i64: 4, 8, 32>}, {pipeline_mode = #tpu.pipeline_mode<synchronous>, transform_indices = @transform_10, window_bounds = array<i64: 1, 32>}, {transform_indices = @transform_11, window_bounds = array<i64: 1, 24, 32>}]} {
    %c0 = arith.constant 0 : index
    %c0_0 = arith.constant 0 : index
    %c0_1 = arith.constant 0 : index
    %0 = vector.load %arg1[%c0, %c0_0, %c0_1] : memref<1x24x32xbf16, #tpu.memory_space<vmem>>, vector<1x24x32xbf16>
    %1 = vector.shape_cast %0 : vector<1x24x32xbf16> to vector<24x32xbf16>
    %2 = arith.extf %1 : vector<24x32xbf16> to vector<24x32xf32>
    %cst = arith.constant dense<0.000000e+00> : vector<24xf32>
    %3 = vector.multi_reduction <add>, %2, %cst [1] : vector<24x32xf32> to vector<24xf32>
    %4 = vector.shape_cast %3 : vector<24xf32> to vector<24x1xf32>
    %cst_2 = arith.constant 3.200000e+01 : f32
    %5 = vector.broadcast %cst_2 : f32 to vector<24x1xf32>
    %6 = arith.divf %4, %5 : vector<24x1xf32>
    %7 = vector.broadcast %6 : vector<24x1xf32> to vector<24x32xf32>
    %8 = arith.subf %2, %7 : vector<24x32xf32>
    %9 = arith.mulf %8, %8 : vector<24x32xf32>
    %cst_3 = arith.constant dense<0.000000e+00> : vector<24xf32>
    %10 = vector.multi_reduction <add>, %9, %cst_3 [1] : vector<24x32xf32> to vector<24xf32>
    %11 = vector.shape_cast %10 : vector<24xf32> to vector<24x1xf32>
    %cst_4 = arith.constant 3.200000e+01 : f32
    %12 = vector.broadcast %cst_4 : f32 to vector<24x1xf32>
    %13 = arith.divf %11, %12 : vector<24x1xf32>
    %cst_5 = arith.constant 9.99999974E-6 : f32
    %14 = vector.broadcast %cst_5 : f32 to vector<24x1xf32>
    %15 = arith.addf %13, %14 : vector<24x1xf32>
    %16 = math.rsqrt %15 : vector<24x1xf32>
    %17 = vector.broadcast %16 : vector<24x1xf32> to vector<24x32xf32>
    %18 = arith.mulf %8, %17 : vector<24x32xf32>
    %c0_6 = arith.constant 0 : index
    %c0_7 = arith.constant 0 : index
    %19 = vector.load %arg2[%c0_6, %c0_7] : memref<1x32xf32, #tpu.memory_space<vmem>>, vector<1x32xf32>
    %20 = vector.broadcast %19 : vector<1x32xf32> to vector<24x32xf32>
    %21 = arith.mulf %18, %20 : vector<24x32xf32>
    %c0_8 = arith.constant 0 : index
    %c0_9 = arith.constant 0 : index
    %22 = vector.load %arg3[%c0_8, %c0_9] : memref<1x32xf32, #tpu.memory_space<vmem>>, vector<1x32xf32>
    %23 = vector.broadcast %22 : vector<1x32xf32> to vector<24x32xf32>
    %24 = arith.addf %21, %23 : vector<24x32xf32>
    %25 = arith.truncf %24 : vector<24x32xf32> to vector<24x32xbf16>
    %26 = tpu.iota {dimensions = array<i32: 1>} : vector<24x24xi32>
    %c17_i32 = arith.constant 17 : i32
    %27 = vector.broadcast %c17_i32 : i32 to vector<24x24xi32>
    %28 = arith.cmpi slt, %26, %27 : vector<24x24xi32>
    %c0_10 = arith.constant 0 : index
    %c0_11 = arith.constant 0 : index
    %29 = vector.load %arg11[%c0_10, %c0_11] : memref<1x32xf32, #tpu.memory_space<vmem>>, vector<1x32xf32>
    %30 = vector.broadcast %29 : vector<1x32xf32> to vector<24x32xf32>
    %31 = arith.addf %2, %30 : vector<24x32xf32>
    %c0_12 = arith.constant 0 : index
    %c0_13 = arith.constant 0 : index
    %c0_14 = arith.constant 0 : index
    %32 = vector.load %arg4[%c0_12, %c0_13, %c0_14] : memref<4x32x8xbf16, #tpu.memory_space<vmem>>, vector<1x32x8xbf16>
    %33 = vector.shape_cast %32 : vector<1x32x8xbf16> to vector<32x8xbf16>
    %cst_15 = arith.constant dense<0.000000e+00> : vector<24x8xf32>
    %34 = tpu.matmul %25, %33, %cst_15 {dimension_numbers = #tpu.dot_dimension_numbers<[1], [0], [0], [1], [0, 0, 1, 1], [], []>} : vector<24x32xbf16>, vector<32x8xbf16>, vector<24x8xf32> -> vector<24x8xf32>
    %c0_16 = arith.constant 0 : index
    %c0_17 = arith.constant 0 : index
    %c0_18 = arith.constant 0 : index
    %35 = vector.load %arg7[%c0_16, %c0_17, %c0_18] : memref<4x1x8xf32, #tpu.memory_space<vmem>>, vector<1x1x8xf32>
    %36 = vector.shape_cast %35 : vector<1x1x8xf32> to vector<1x8xf32>
    %37 = vector.broadcast %36 : vector<1x8xf32> to vector<24x8xf32>
    %38 = arith.addf %34, %37 : vector<24x8xf32>
    %c0_19 = arith.constant 0 : index
    %c0_20 = arith.constant 0 : index
    %c0_21 = arith.constant 0 : index
    %39 = vector.load %arg5[%c0_19, %c0_20, %c0_21] : memref<4x32x8xbf16, #tpu.memory_space<vmem>>, vector<1x32x8xbf16>
    %40 = vector.shape_cast %39 : vector<1x32x8xbf16> to vector<32x8xbf16>
    %cst_22 = arith.constant dense<0.000000e+00> : vector<24x8xf32>
    %41 = tpu.matmul %25, %40, %cst_22 {dimension_numbers = #tpu.dot_dimension_numbers<[1], [0], [0], [1], [0, 0, 1, 1], [], []>} : vector<24x32xbf16>, vector<32x8xbf16>, vector<24x8xf32> -> vector<24x8xf32>
    %c0_23 = arith.constant 0 : index
    %c0_24 = arith.constant 0 : index
    %c0_25 = arith.constant 0 : index
    %42 = vector.load %arg8[%c0_23, %c0_24, %c0_25] : memref<4x1x8xf32, #tpu.memory_space<vmem>>, vector<1x1x8xf32>
    %43 = vector.shape_cast %42 : vector<1x1x8xf32> to vector<1x8xf32>
    %44 = vector.broadcast %43 : vector<1x8xf32> to vector<24x8xf32>
    %45 = arith.addf %41, %44 : vector<24x8xf32>
    %c0_26 = arith.constant 0 : index
    %c0_27 = arith.constant 0 : index
    %c0_28 = arith.constant 0 : index
    %46 = vector.load %arg6[%c0_26, %c0_27, %c0_28] : memref<4x32x8xbf16, #tpu.memory_space<vmem>>, vector<1x32x8xbf16>
    %47 = vector.shape_cast %46 : vector<1x32x8xbf16> to vector<32x8xbf16>
    %cst_29 = arith.constant dense<0.000000e+00> : vector<24x8xf32>
    %48 = tpu.matmul %25, %47, %cst_29 {dimension_numbers = #tpu.dot_dimension_numbers<[1], [0], [0], [1], [0, 0, 1, 1], [], []>} : vector<24x32xbf16>, vector<32x8xbf16>, vector<24x8xf32> -> vector<24x8xf32>
    %c0_30 = arith.constant 0 : index
    %c0_31 = arith.constant 0 : index
    %c0_32 = arith.constant 0 : index
    %49 = vector.load %arg9[%c0_30, %c0_31, %c0_32] : memref<4x1x8xf32, #tpu.memory_space<vmem>>, vector<1x1x8xf32>
    %50 = vector.shape_cast %49 : vector<1x1x8xf32> to vector<1x8xf32>
    %51 = vector.broadcast %50 : vector<1x8xf32> to vector<24x8xf32>
    %52 = arith.addf %48, %51 : vector<24x8xf32>
    %cst_33 = arith.constant 0.353553385 : f32
    %53 = vector.broadcast %cst_33 : f32 to vector<24x8xf32>
    %54 = arith.mulf %38, %53 : vector<24x8xf32>
    %55 = arith.truncf %54 : vector<24x8xf32> to vector<24x8xbf16>
    %56 = arith.truncf %45 : vector<24x8xf32> to vector<24x8xbf16>
    %57 = arith.truncf %52 : vector<24x8xf32> to vector<24x8xbf16>
    %cst_34 = arith.constant dense<0.000000e+00> : vector<24x24xf32>
    %58 = tpu.matmul %55, %56, %cst_34 {dimension_numbers = #tpu.dot_dimension_numbers<[1], [1], [0], [0], [0, 0, 1, 0], [], []>} : vector<24x8xbf16>, vector<24x8xbf16>, vector<24x24xf32> -> vector<24x24xf32>
    %cst_35 = arith.constant -1.000000e+30 : f32
    %59 = vector.broadcast %cst_35 : f32 to vector<24x24xf32>
    %60 = arith.select %28, %58, %59 : vector<24x24xi1>, vector<24x24xf32>
    %cst_36 = arith.constant dense<0xFF800000> : vector<24xf32>
    %61 = vector.multi_reduction <maximumf>, %60, %cst_36 [1] : vector<24x24xf32> to vector<24xf32>
    %62 = vector.shape_cast %61 : vector<24xf32> to vector<24x1xf32>
    %63 = vector.broadcast %62 : vector<24x1xf32> to vector<24x24xf32>
    %64 = arith.subf %60, %63 : vector<24x24xf32>
    %65 = math.exp %64 : vector<24x24xf32>
    %cst_37 = arith.constant dense<0.000000e+00> : vector<24xf32>
    %66 = vector.multi_reduction <add>, %65, %cst_37 [1] : vector<24x24xf32> to vector<24xf32>
    %67 = vector.shape_cast %66 : vector<24xf32> to vector<24x1xf32>
    %68 = tpu.reciprocal %67 {approx = true} : vector<24x1xf32> -> vector<24x1xf32>
    %69 = vector.broadcast %68 : vector<24x1xf32> to vector<24x24xf32>
    %70 = arith.mulf %65, %69 : vector<24x24xf32>
    %71 = arith.truncf %70 : vector<24x24xf32> to vector<24x24xbf16>
    %cst_38 = arith.constant dense<0.000000e+00> : vector<24x8xf32>
    %72 = tpu.matmul %71, %57, %cst_38 {dimension_numbers = #tpu.dot_dimension_numbers<[1], [0], [0], [1], [0, 0, 1, 1], [], []>} : vector<24x24xbf16>, vector<24x8xbf16>, vector<24x8xf32> -> vector<24x8xf32>
    %73 = arith.truncf %72 : vector<24x8xf32> to vector<24x8xbf16>
    %c0_39 = arith.constant 0 : index
    %c0_40 = arith.constant 0 : index
    %c0_41 = arith.constant 0 : index
    %74 = vector.load %arg10[%c0_39, %c0_40, %c0_41] : memref<4x8x32xbf16, #tpu.memory_space<vmem>>, vector<1x8x32xbf16>
    %75 = vector.shape_cast %74 : vector<1x8x32xbf16> to vector<8x32xbf16>
    %cst_42 = arith.constant dense<0.000000e+00> : vector<24x32xf32>
    %76 = tpu.matmul %73, %75, %cst_42 {dimension_numbers = #tpu.dot_dimension_numbers<[1], [0], [0], [1], [0, 0, 1, 1], [], []>} : vector<24x8xbf16>, vector<8x32xbf16>, vector<24x32xf32> -> vector<24x32xf32>
    %77 = arith.addf %31, %76 : vector<24x32xf32>
    %c1 = arith.constant 1 : index
    %c0_43 = arith.constant 0 : index
    %c0_44 = arith.constant 0 : index
    %78 = vector.load %arg4[%c1, %c0_43, %c0_44] : memref<4x32x8xbf16, #tpu.memory_space<vmem>>, vector<1x32x8xbf16>
    %79 = vector.shape_cast %78 : vector<1x32x8xbf16> to vector<32x8xbf16>
    %cst_45 = arith.constant dense<0.000000e+00> : vector<24x8xf32>
    %80 = tpu.matmul %25, %79, %cst_45 {dimension_numbers = #tpu.dot_dimension_numbers<[1], [0], [0], [1], [0, 0, 1, 1], [], []>} : vector<24x32xbf16>, vector<32x8xbf16>, vector<24x8xf32> -> vector<24x8xf32>
    %c1_46 = arith.constant 1 : index
    %c0_47 = arith.constant 0 : index
    %c0_48 = arith.constant 0 : index
    %81 = vector.load %arg7[%c1_46, %c0_47, %c0_48] : memref<4x1x8xf32, #tpu.memory_space<vmem>>, vector<1x1x8xf32>
    %82 = vector.shape_cast %81 : vector<1x1x8xf32> to vector<1x8xf32>
    %83 = vector.broadcast %82 : vector<1x8xf32> to vector<24x8xf32>
    %84 = arith.addf %80, %83 : vector<24x8xf32>
    %c1_49 = arith.constant 1 : index
    %c0_50 = arith.constant 0 : index
    %c0_51 = arith.constant 0 : index
    %85 = vector.load %arg5[%c1_49, %c0_50, %c0_51] : memref<4x32x8xbf16, #tpu.memory_space<vmem>>, vector<1x32x8xbf16>
    %86 = vector.shape_cast %85 : vector<1x32x8xbf16> to vector<32x8xbf16>
    %cst_52 = arith.constant dense<0.000000e+00> : vector<24x8xf32>
    %87 = tpu.matmul %25, %86, %cst_52 {dimension_numbers = #tpu.dot_dimension_numbers<[1], [0], [0], [1], [0, 0, 1, 1], [], []>} : vector<24x32xbf16>, vector<32x8xbf16>, vector<24x8xf32> -> vector<24x8xf32>
    %c1_53 = arith.constant 1 : index
    %c0_54 = arith.constant 0 : index
    %c0_55 = arith.constant 0 : index
    %88 = vector.load %arg8[%c1_53, %c0_54, %c0_55] : memref<4x1x8xf32, #tpu.memory_space<vmem>>, vector<1x1x8xf32>
    %89 = vector.shape_cast %88 : vector<1x1x8xf32> to vector<1x8xf32>
    %90 = vector.broadcast %89 : vector<1x8xf32> to vector<24x8xf32>
    %91 = arith.addf %87, %90 : vector<24x8xf32>
    %c1_56 = arith.constant 1 : index
    %c0_57 = arith.constant 0 : index
    %c0_58 = arith.constant 0 : index
    %92 = vector.load %arg6[%c1_56, %c0_57, %c0_58] : memref<4x32x8xbf16, #tpu.memory_space<vmem>>, vector<1x32x8xbf16>
    %93 = vector.shape_cast %92 : vector<1x32x8xbf16> to vector<32x8xbf16>
    %cst_59 = arith.constant dense<0.000000e+00> : vector<24x8xf32>
    %94 = tpu.matmul %25, %93, %cst_59 {dimension_numbers = #tpu.dot_dimension_numbers<[1], [0], [0], [1], [0, 0, 1, 1], [], []>} : vector<24x32xbf16>, vector<32x8xbf16>, vector<24x8xf32> -> vector<24x8xf32>
    %c1_60 = arith.constant 1 : index
    %c0_61 = arith.constant 0 : index
    %c0_62 = arith.constant 0 : index
    %95 = vector.load %arg9[%c1_60, %c0_61, %c0_62] : memref<4x1x8xf32, #tpu.memory_space<vmem>>, vector<1x1x8xf32>
    %96 = vector.shape_cast %95 : vector<1x1x8xf32> to vector<1x8xf32>
    %97 = vector.broadcast %96 : vector<1x8xf32> to vector<24x8xf32>
    %98 = arith.addf %94, %97 : vector<24x8xf32>
    %cst_63 = arith.constant 0.353553385 : f32
    %99 = vector.broadcast %cst_63 : f32 to vector<24x8xf32>
    %100 = arith.mulf %84, %99 : vector<24x8xf32>
    %101 = arith.truncf %100 : vector<24x8xf32> to vector<24x8xbf16>
    %102 = arith.truncf %91 : vector<24x8xf32> to vector<24x8xbf16>
    %103 = arith.truncf %98 : vector<24x8xf32> to vector<24x8xbf16>
    %cst_64 = arith.constant dense<0.000000e+00> : vector<24x24xf32>
    %104 = tpu.matmul %101, %102, %cst_64 {dimension_numbers = #tpu.dot_dimension_numbers<[1], [1], [0], [0], [0, 0, 1, 0], [], []>} : vector<24x8xbf16>, vector<24x8xbf16>, vector<24x24xf32> -> vector<24x24xf32>
    %cst_65 = arith.constant -1.000000e+30 : f32
    %105 = vector.broadcast %cst_65 : f32 to vector<24x24xf32>
    %106 = arith.select %28, %104, %105 : vector<24x24xi1>, vector<24x24xf32>
    %cst_66 = arith.constant dense<0xFF800000> : vector<24xf32>
    %107 = vector.multi_reduction <maximumf>, %106, %cst_66 [1] : vector<24x24xf32> to vector<24xf32>
    %108 = vector.shape_cast %107 : vector<24xf32> to vector<24x1xf32>
    %109 = vector.broadcast %108 : vector<24x1xf32> to vector<24x24xf32>
    %110 = arith.subf %106, %109 : vector<24x24xf32>
    %111 = math.exp %110 : vector<24x24xf32>
    %cst_67 = arith.constant dense<0.000000e+00> : vector<24xf32>
    %112 = vector.multi_reduction <add>, %111, %cst_67 [1] : vector<24x24xf32> to vector<24xf32>
    %113 = vector.shape_cast %112 : vector<24xf32> to vector<24x1xf32>
    %114 = tpu.reciprocal %113 {approx = true} : vector<24x1xf32> -> vector<24x1xf32>
    %115 = vector.broadcast %114 : vector<24x1xf32> to vector<24x24xf32>
    %116 = arith.mulf %111, %115 : vector<24x24xf32>
    %117 = arith.truncf %116 : vector<24x24xf32> to vector<24x24xbf16>
    %cst_68 = arith.constant dense<0.000000e+00> : vector<24x8xf32>
    %118 = tpu.matmul %117, %103, %cst_68 {dimension_numbers = #tpu.dot_dimension_numbers<[1], [0], [0], [1], [0, 0, 1, 1], [], []>} : vector<24x24xbf16>, vector<24x8xbf16>, vector<24x8xf32> -> vector<24x8xf32>
    %119 = arith.truncf %118 : vector<24x8xf32> to vector<24x8xbf16>
    %c1_69 = arith.constant 1 : index
    %c0_70 = arith.constant 0 : index
    %c0_71 = arith.constant 0 : index
    %120 = vector.load %arg10[%c1_69, %c0_70, %c0_71] : memref<4x8x32xbf16, #tpu.memory_space<vmem>>, vector<1x8x32xbf16>
    %121 = vector.shape_cast %120 : vector<1x8x32xbf16> to vector<8x32xbf16>
    %cst_72 = arith.constant dense<0.000000e+00> : vector<24x32xf32>
    %122 = tpu.matmul %119, %121, %cst_72 {dimension_numbers = #tpu.dot_dimension_numbers<[1], [0], [0], [1], [0, 0, 1, 1], [], []>} : vector<24x8xbf16>, vector<8x32xbf16>, vector<24x32xf32> -> vector<24x32xf32>
    %123 = arith.addf %77, %122 : vector<24x32xf32>
    %c2 = arith.constant 2 : index
    %c0_73 = arith.constant 0 : index
    %c0_74 = arith.constant 0 : index
    %124 = vector.load %arg4[%c2, %c0_73, %c0_74] : memref<4x32x8xbf16, #tpu.memory_space<vmem>>, vector<1x32x8xbf16>
    %125 = vector.shape_cast %124 : vector<1x32x8xbf16> to vector<32x8xbf16>
    %cst_75 = arith.constant dense<0.000000e+00> : vector<24x8xf32>
    %126 = tpu.matmul %25, %125, %cst_75 {dimension_numbers = #tpu.dot_dimension_numbers<[1], [0], [0], [1], [0, 0, 1, 1], [], []>} : vector<24x32xbf16>, vector<32x8xbf16>, vector<24x8xf32> -> vector<24x8xf32>
    %c2_76 = arith.constant 2 : index
    %c0_77 = arith.constant 0 : index
    %c0_78 = arith.constant 0 : index
    %127 = vector.load %arg7[%c2_76, %c0_77, %c0_78] : memref<4x1x8xf32, #tpu.memory_space<vmem>>, vector<1x1x8xf32>
    %128 = vector.shape_cast %127 : vector<1x1x8xf32> to vector<1x8xf32>
    %129 = vector.broadcast %128 : vector<1x8xf32> to vector<24x8xf32>
    %130 = arith.addf %126, %129 : vector<24x8xf32>
    %c2_79 = arith.constant 2 : index
    %c0_80 = arith.constant 0 : index
    %c0_81 = arith.constant 0 : index
    %131 = vector.load %arg5[%c2_79, %c0_80, %c0_81] : memref<4x32x8xbf16, #tpu.memory_space<vmem>>, vector<1x32x8xbf16>
    %132 = vector.shape_cast %131 : vector<1x32x8xbf16> to vector<32x8xbf16>
    %cst_82 = arith.constant dense<0.000000e+00> : vector<24x8xf32>
    %133 = tpu.matmul %25, %132, %cst_82 {dimension_numbers = #tpu.dot_dimension_numbers<[1], [0], [0], [1], [0, 0, 1, 1], [], []>} : vector<24x32xbf16>, vector<32x8xbf16>, vector<24x8xf32> -> vector<24x8xf32>
    %c2_83 = arith.constant 2 : index
    %c0_84 = arith.constant 0 : index
    %c0_85 = arith.constant 0 : index
    %134 = vector.load %arg8[%c2_83, %c0_84, %c0_85] : memref<4x1x8xf32, #tpu.memory_space<vmem>>, vector<1x1x8xf32>
    %135 = vector.shape_cast %134 : vector<1x1x8xf32> to vector<1x8xf32>
    %136 = vector.broadcast %135 : vector<1x8xf32> to vector<24x8xf32>
    %137 = arith.addf %133, %136 : vector<24x8xf32>
    %c2_86 = arith.constant 2 : index
    %c0_87 = arith.constant 0 : index
    %c0_88 = arith.constant 0 : index
    %138 = vector.load %arg6[%c2_86, %c0_87, %c0_88] : memref<4x32x8xbf16, #tpu.memory_space<vmem>>, vector<1x32x8xbf16>
    %139 = vector.shape_cast %138 : vector<1x32x8xbf16> to vector<32x8xbf16>
    %cst_89 = arith.constant dense<0.000000e+00> : vector<24x8xf32>
    %140 = tpu.matmul %25, %139, %cst_89 {dimension_numbers = #tpu.dot_dimension_numbers<[1], [0], [0], [1], [0, 0, 1, 1], [], []>} : vector<24x32xbf16>, vector<32x8xbf16>, vector<24x8xf32> -> vector<24x8xf32>
    %c2_90 = arith.constant 2 : index
    %c0_91 = arith.constant 0 : index
    %c0_92 = arith.constant 0 : index
    %141 = vector.load %arg9[%c2_90, %c0_91, %c0_92] : memref<4x1x8xf32, #tpu.memory_space<vmem>>, vector<1x1x8xf32>
    %142 = vector.shape_cast %141 : vector<1x1x8xf32> to vector<1x8xf32>
    %143 = vector.broadcast %142 : vector<1x8xf32> to vector<24x8xf32>
    %144 = arith.addf %140, %143 : vector<24x8xf32>
    %cst_93 = arith.constant 0.353553385 : f32
    %145 = vector.broadcast %cst_93 : f32 to vector<24x8xf32>
    %146 = arith.mulf %130, %145 : vector<24x8xf32>
    %147 = arith.truncf %146 : vector<24x8xf32> to vector<24x8xbf16>
    %148 = arith.truncf %137 : vector<24x8xf32> to vector<24x8xbf16>
    %149 = arith.truncf %144 : vector<24x8xf32> to vector<24x8xbf16>
    %cst_94 = arith.constant dense<0.000000e+00> : vector<24x24xf32>
    %150 = tpu.matmul %147, %148, %cst_94 {dimension_numbers = #tpu.dot_dimension_numbers<[1], [1], [0], [0], [0, 0, 1, 0], [], []>} : vector<24x8xbf16>, vector<24x8xbf16>, vector<24x24xf32> -> vector<24x24xf32>
    %cst_95 = arith.constant -1.000000e+30 : f32
    %151 = vector.broadcast %cst_95 : f32 to vector<24x24xf32>
    %152 = arith.select %28, %150, %151 : vector<24x24xi1>, vector<24x24xf32>
    %cst_96 = arith.constant dense<0xFF800000> : vector<24xf32>
    %153 = vector.multi_reduction <maximumf>, %152, %cst_96 [1] : vector<24x24xf32> to vector<24xf32>
    %154 = vector.shape_cast %153 : vector<24xf32> to vector<24x1xf32>
    %155 = vector.broadcast %154 : vector<24x1xf32> to vector<24x24xf32>
    %156 = arith.subf %152, %155 : vector<24x24xf32>
    %157 = math.exp %156 : vector<24x24xf32>
    %cst_97 = arith.constant dense<0.000000e+00> : vector<24xf32>
    %158 = vector.multi_reduction <add>, %157, %cst_97 [1] : vector<24x24xf32> to vector<24xf32>
    %159 = vector.shape_cast %158 : vector<24xf32> to vector<24x1xf32>
    %160 = tpu.reciprocal %159 {approx = true} : vector<24x1xf32> -> vector<24x1xf32>
    %161 = vector.broadcast %160 : vector<24x1xf32> to vector<24x24xf32>
    %162 = arith.mulf %157, %161 : vector<24x24xf32>
    %163 = arith.truncf %162 : vector<24x24xf32> to vector<24x24xbf16>
    %cst_98 = arith.constant dense<0.000000e+00> : vector<24x8xf32>
    %164 = tpu.matmul %163, %149, %cst_98 {dimension_numbers = #tpu.dot_dimension_numbers<[1], [0], [0], [1], [0, 0, 1, 1], [], []>} : vector<24x24xbf16>, vector<24x8xbf16>, vector<24x8xf32> -> vector<24x8xf32>
    %165 = arith.truncf %164 : vector<24x8xf32> to vector<24x8xbf16>
    %c2_99 = arith.constant 2 : index
    %c0_100 = arith.constant 0 : index
    %c0_101 = arith.constant 0 : index
    %166 = vector.load %arg10[%c2_99, %c0_100, %c0_101] : memref<4x8x32xbf16, #tpu.memory_space<vmem>>, vector<1x8x32xbf16>
    %167 = vector.shape_cast %166 : vector<1x8x32xbf16> to vector<8x32xbf16>
    %cst_102 = arith.constant dense<0.000000e+00> : vector<24x32xf32>
    %168 = tpu.matmul %165, %167, %cst_102 {dimension_numbers = #tpu.dot_dimension_numbers<[1], [0], [0], [1], [0, 0, 1, 1], [], []>} : vector<24x8xbf16>, vector<8x32xbf16>, vector<24x32xf32> -> vector<24x32xf32>
    %169 = arith.addf %123, %168 : vector<24x32xf32>
    %c3 = arith.constant 3 : index
    %c0_103 = arith.constant 0 : index
    %c0_104 = arith.constant 0 : index
    %170 = vector.load %arg4[%c3, %c0_103, %c0_104] : memref<4x32x8xbf16, #tpu.memory_space<vmem>>, vector<1x32x8xbf16>
    %171 = vector.shape_cast %170 : vector<1x32x8xbf16> to vector<32x8xbf16>
    %cst_105 = arith.constant dense<0.000000e+00> : vector<24x8xf32>
    %172 = tpu.matmul %25, %171, %cst_105 {dimension_numbers = #tpu.dot_dimension_numbers<[1], [0], [0], [1], [0, 0, 1, 1], [], []>} : vector<24x32xbf16>, vector<32x8xbf16>, vector<24x8xf32> -> vector<24x8xf32>
    %c3_106 = arith.constant 3 : index
    %c0_107 = arith.constant 0 : index
    %c0_108 = arith.constant 0 : index
    %173 = vector.load %arg7[%c3_106, %c0_107, %c0_108] : memref<4x1x8xf32, #tpu.memory_space<vmem>>, vector<1x1x8xf32>
    %174 = vector.shape_cast %173 : vector<1x1x8xf32> to vector<1x8xf32>
    %175 = vector.broadcast %174 : vector<1x8xf32> to vector<24x8xf32>
    %176 = arith.addf %172, %175 : vector<24x8xf32>
    %c3_109 = arith.constant 3 : index
    %c0_110 = arith.constant 0 : index
    %c0_111 = arith.constant 0 : index
    %177 = vector.load %arg5[%c3_109, %c0_110, %c0_111] : memref<4x32x8xbf16, #tpu.memory_space<vmem>>, vector<1x32x8xbf16>
    %178 = vector.shape_cast %177 : vector<1x32x8xbf16> to vector<32x8xbf16>
    %cst_112 = arith.constant dense<0.000000e+00> : vector<24x8xf32>
    %179 = tpu.matmul %25, %178, %cst_112 {dimension_numbers = #tpu.dot_dimension_numbers<[1], [0], [0], [1], [0, 0, 1, 1], [], []>} : vector<24x32xbf16>, vector<32x8xbf16>, vector<24x8xf32> -> vector<24x8xf32>
    %c3_113 = arith.constant 3 : index
    %c0_114 = arith.constant 0 : index
    %c0_115 = arith.constant 0 : index
    %180 = vector.load %arg8[%c3_113, %c0_114, %c0_115] : memref<4x1x8xf32, #tpu.memory_space<vmem>>, vector<1x1x8xf32>
    %181 = vector.shape_cast %180 : vector<1x1x8xf32> to vector<1x8xf32>
    %182 = vector.broadcast %181 : vector<1x8xf32> to vector<24x8xf32>
    %183 = arith.addf %179, %182 : vector<24x8xf32>
    %c3_116 = arith.constant 3 : index
    %c0_117 = arith.constant 0 : index
    %c0_118 = arith.constant 0 : index
    %184 = vector.load %arg6[%c3_116, %c0_117, %c0_118] : memref<4x32x8xbf16, #tpu.memory_space<vmem>>, vector<1x32x8xbf16>
    %185 = vector.shape_cast %184 : vector<1x32x8xbf16> to vector<32x8xbf16>
    %cst_119 = arith.constant dense<0.000000e+00> : vector<24x8xf32>
    %186 = tpu.matmul %25, %185, %cst_119 {dimension_numbers = #tpu.dot_dimension_numbers<[1], [0], [0], [1], [0, 0, 1, 1], [], []>} : vector<24x32xbf16>, vector<32x8xbf16>, vector<24x8xf32> -> vector<24x8xf32>
    %c3_120 = arith.constant 3 : index
    %c0_121 = arith.constant 0 : index
    %c0_122 = arith.constant 0 : index
    %187 = vector.load %arg9[%c3_120, %c0_121, %c0_122] : memref<4x1x8xf32, #tpu.memory_space<vmem>>, vector<1x1x8xf32>
    %188 = vector.shape_cast %187 : vector<1x1x8xf32> to vector<1x8xf32>
    %189 = vector.broadcast %188 : vector<1x8xf32> to vector<24x8xf32>
    %190 = arith.addf %186, %189 : vector<24x8xf32>
    %cst_123 = arith.constant 0.353553385 : f32
    %191 = vector.broadcast %cst_123 : f32 to vector<24x8xf32>
    %192 = arith.mulf %176, %191 : vector<24x8xf32>
    %193 = arith.truncf %192 : vector<24x8xf32> to vector<24x8xbf16>
    %194 = arith.truncf %183 : vector<24x8xf32> to vector<24x8xbf16>
    %195 = arith.truncf %190 : vector<24x8xf32> to vector<24x8xbf16>
    %cst_124 = arith.constant dense<0.000000e+00> : vector<24x24xf32>
    %196 = tpu.matmul %193, %194, %cst_124 {dimension_numbers = #tpu.dot_dimension_numbers<[1], [1], [0], [0], [0, 0, 1, 0], [], []>} : vector<24x8xbf16>, vector<24x8xbf16>, vector<24x24xf32> -> vector<24x24xf32>
    %cst_125 = arith.constant -1.000000e+30 : f32
    %197 = vector.broadcast %cst_125 : f32 to vector<24x24xf32>
    %198 = arith.select %28, %196, %197 : vector<24x24xi1>, vector<24x24xf32>
    %cst_126 = arith.constant dense<0xFF800000> : vector<24xf32>
    %199 = vector.multi_reduction <maximumf>, %198, %cst_126 [1] : vector<24x24xf32> to vector<24xf32>
    %200 = vector.shape_cast %199 : vector<24xf32> to vector<24x1xf32>
    %201 = vector.broadcast %200 : vector<24x1xf32> to vector<24x24xf32>
    %202 = arith.subf %198, %201 : vector<24x24xf32>
    %203 = math.exp %202 : vector<24x24xf32>
    %cst_127 = arith.constant dense<0.000000e+00> : vector<24xf32>
    %204 = vector.multi_reduction <add>, %203, %cst_127 [1] : vector<24x24xf32> to vector<24xf32>
    %205 = vector.shape_cast %204 : vector<24xf32> to vector<24x1xf32>
    %206 = tpu.reciprocal %205 {approx = true} : vector<24x1xf32> -> vector<24x1xf32>
    %207 = vector.broadcast %206 : vector<24x1xf32> to vector<24x24xf32>
    %208 = arith.mulf %203, %207 : vector<24x24xf32>
    %209 = arith.truncf %208 : vector<24x24xf32> to vector<24x24xbf16>
    %cst_128 = arith.constant dense<0.000000e+00> : vector<24x8xf32>
    %210 = tpu.matmul %209, %195, %cst_128 {dimension_numbers = #tpu.dot_dimension_numbers<[1], [0], [0], [1], [0, 0, 1, 1], [], []>} : vector<24x24xbf16>, vector<24x8xbf16>, vector<24x8xf32> -> vector<24x8xf32>
    %211 = arith.truncf %210 : vector<24x8xf32> to vector<24x8xbf16>
    %c3_129 = arith.constant 3 : index
    %c0_130 = arith.constant 0 : index
    %c0_131 = arith.constant 0 : index
    %212 = vector.load %arg10[%c3_129, %c0_130, %c0_131] : memref<4x8x32xbf16, #tpu.memory_space<vmem>>, vector<1x8x32xbf16>
    %213 = vector.shape_cast %212 : vector<1x8x32xbf16> to vector<8x32xbf16>
    %cst_132 = arith.constant dense<0.000000e+00> : vector<24x32xf32>
    %214 = tpu.matmul %211, %213, %cst_132 {dimension_numbers = #tpu.dot_dimension_numbers<[1], [0], [0], [1], [0, 0, 1, 1], [], []>} : vector<24x8xbf16>, vector<8x32xbf16>, vector<24x32xf32> -> vector<24x32xf32>
    %215 = arith.addf %169, %214 : vector<24x32xf32>
    %216 = arith.truncf %215 : vector<24x32xf32> to vector<24x32xbf16>
    %c0_133 = arith.constant 0 : index
    %c0_134 = arith.constant 0 : index
    %c0_135 = arith.constant 0 : index
    %217 = vector.load %arg12[%c0_133, %c0_134, %c0_135] : memref<1x24x32xbf16, #tpu.memory_space<vmem>>, vector<1x24x32xbf16>
    %218 = vector.shape_cast %217 : vector<1x24x32xbf16> to vector<24x32xbf16>
    %219 = vector.shape_cast %216 : vector<24x32xbf16> to vector<1x24x32xbf16>
    tpu.vector_store %arg12[%c0_133, %c0_134, %c0_135], %219 {strides = array<i32>} : memref<1x24x32xbf16, #tpu.memory_space<vmem>>, vector<1x24x32xbf16>,
    return
  }
  func.func @transform_0(%arg0: i32) -> (i32, i32, i32) {
    %c0_i32 = arith.constant 0 : i32
    %c0_i32_0 = arith.constant 0 : i32
    %c0_i32_1 = arith.constant 0 : i32
    return %arg0, %c0_i32, %c0_i32_0 : i32, i32, i32
  }
  func.func @transform_1(%arg0: i32) -> (i32, i32) {
    %c0_i32 = arith.constant 0 : i32
    %c0_i32_0 = arith.constant 0 : i32
    %c0_i32_1 = arith.constant 0 : i32
    return %c0_i32, %c0_i32_0 : i32, i32
  }
  func.func @transform_2(%arg0: i32) -> (i32, i32) {
    %c0_i32 = arith.constant 0 : i32
    %c0_i32_0 = arith.constant 0 : i32
    %c0_i32_1 = arith.constant 0 : i32
    return %c0_i32, %c0_i32_0 : i32, i32
  }
  func.func @transform_3(%arg0: i32) -> (i32, i32, i32) {
    %c0_i32 = arith.constant 0 : i32
    %c0_i32_0 = arith.constant 0 : i32
    %c0_i32_1 = arith.constant 0 : i32
    %c0_i32_2 = arith.constant 0 : i32
    return %c0_i32, %c0_i32_0, %c0_i32_1 : i32, i32, i32
  }
  func.func @transform_4(%arg0: i32) -> (i32, i32, i32) {
    %c0_i32 = arith.constant 0 : i32
    %c0_i32_0 = arith.constant 0 : i32
    %c0_i32_1 = arith.constant 0 : i32
    %c0_i32_2 = arith.constant 0 : i32
    return %c0_i32, %c0_i32_0, %c0_i32_1 : i32, i32, i32
  }
  func.func @transform_5(%arg0: i32) -> (i32, i32, i32) {
    %c0_i32 = arith.constant 0 : i32
    %c0_i32_0 = arith.constant 0 : i32
    %c0_i32_1 = arith.constant 0 : i32
    %c0_i32_2 = arith.constant 0 : i32
    return %c0_i32, %c0_i32_0, %c0_i32_1 : i32, i32, i32
  }
  func.func @transform_6(%arg0: i32) -> (i32, i32, i32) {
    %c0_i32 = arith.constant 0 : i32
    %c0_i32_0 = arith.constant 0 : i32
    %c0_i32_1 = arith.constant 0 : i32
    %c0_i32_2 = arith.constant 0 : i32
    return %c0_i32, %c0_i32_0, %c0_i32_1 : i32, i32, i32
  }
  func.func @transform_7(%arg0: i32) -> (i32, i32, i32) {
    %c0_i32 = arith.constant 0 : i32
    %c0_i32_0 = arith.constant 0 : i32
    %c0_i32_1 = arith.constant 0 : i32
    %c0_i32_2 = arith.constant 0 : i32
    return %c0_i32, %c0_i32_0, %c0_i32_1 : i32, i32, i32
  }
  func.func @transform_8(%arg0: i32) -> (i32, i32, i32) {
    %c0_i32 = arith.constant 0 : i32
    %c0_i32_0 = arith.constant 0 : i32
    %c0_i32_1 = arith.constant 0 : i32
    %c0_i32_2 = arith.constant 0 : i32
    return %c0_i32, %c0_i32_0, %c0_i32_1 : i32, i32, i32
  }
  func.func @transform_9(%arg0: i32) -> (i32, i32, i32) {
    %c0_i32 = arith.constant 0 : i32
    %c0_i32_0 = arith.constant 0 : i32
    %c0_i32_1 = arith.constant 0 : i32
    %c0_i32_2 = arith.constant 0 : i32
    return %c0_i32, %c0_i32_0, %c0_i32_1 : i32, i32, i32
  }
  func.func @transform_10(%arg0: i32) -> (i32, i32) {
    %c0_i32 = arith.constant 0 : i32
    %c0_i32_0 = arith.constant 0 : i32
    %c0_i32_1 = arith.constant 0 : i32
    return %c0_i32, %c0_i32_0 : i32, i32
  }
  func.func @transform_11(%arg0: i32) -> (i32, i32, i32) {
    %c0_i32 = arith.constant 0 : i32
    %c0_i32_0 = arith.constant 0 : i32
    %c0_i32_1 = arith.constant 0 : i32
    return %arg0, %c0_i32, %c0_i32_0 : i32, i32, i32
  }
}

module attributes {stable_mosaic.version = 11 : i64} {
  func.func @_linear_kernel(%arg0: i32, %arg1: i32, %arg2: i32, %arg3: memref<8x32xbf16, #tpu.memory_space<vmem>>, %arg4: memref<32x10xbf16, #tpu.memory_space<vmem>>, %arg5: memref<1x10xf32, #tpu.memory_space<vmem>>, %arg6: memref<1x32xf32, #tpu.memory_space<vmem>>, %arg7: memref<1x32xf32, #tpu.memory_space<vmem>>, %arg8: memref<8x10xf32, #tpu.memory_space<vmem>>, %arg9: memref<8x10xf32, #tpu.memory_space<vmem>>, %arg10: memref<8x32xbf16, #tpu.memory_space<vmem>>) attributes {dimension_semantics = [#tpu.dimension_semantics<parallel>, #tpu.dimension_semantics<arbitrary>, #tpu.dimension_semantics<arbitrary>], iteration_bounds = array<i64: 1, 1, 1>, scalar_prefetch = 0 : i64, scratch_operands = 2 : i64, tpu.core_type = #tpu.core_type<tc>, window_params = [{transform_indices = @transform_0, window_bounds = array<i64: 8, 32>}, {transform_indices = @transform_1, window_bounds = array<i64: 32, 10>}, {transform_indices = @transform_2, window_bounds = array<i64: 1, 10>}, {transform_indices = @transform_3, window_bounds = array<i64: 1, 32>}, {transform_indices = @transform_4, window_bounds = array<i64: 1, 32>}, {transform_indices = @transform_5, window_bounds = array<i64: 8, 10>}]} {
    %c0_i32 = arith.constant 0 : i32
    %0 = arith.cmpi eq, %arg2, %c0_i32 : i32
    %1 = arith.extui %0 : i1 to i32
    %c0_i32_0 = arith.constant 0 : i32
    %2 = arith.cmpi ne, %1, %c0_i32_0 : i32
    scf.if %2 {
      %c0_12 = arith.constant 0 : index
      %c0_13 = arith.constant 0 : index
      %15 = vector.load %arg5[%c0_12, %c0_13] : memref<1x10xf32, #tpu.memory_space<vmem>>, vector<1x10xf32>
      %16 = vector.shape_cast %15 : vector<1x10xf32> to vector<1x10xf32>
      %17 = vector.broadcast %16 : vector<1x10xf32> to vector<8x10xf32>
      %c0_14 = arith.constant 0 : index
      %c0_15 = arith.constant 0 : index
      %18 = vector.load %arg9[%c0_14, %c0_15] : memref<8x10xf32, #tpu.memory_space<vmem>>, vector<8x10xf32>
      tpu.vector_store %arg9[%c0_14, %c0_15], %17 {strides = array<i32>} : memref<8x10xf32, #tpu.memory_space<vmem>>, vector<8x10xf32>,
    } else {
    }
    %c0_i32_1 = arith.constant 0 : i32
    %3 = arith.cmpi eq, %arg1, %c0_i32_1 : i32
    %4 = arith.extui %3 : i1 to i32
    %c0_i32_2 = arith.constant 0 : i32
    %5 = arith.cmpi ne, %4, %c0_i32_2 : i32
    scf.if %5 {
      %c0_12 = arith.constant 0 : index
      %c0_13 = arith.constant 0 : index
      %15 = vector.load %arg3[%c0_12, %c0_13] : memref<8x32xbf16, #tpu.memory_space<vmem>>, vector<8x32xbf16>
      %16 = arith.extf %15 : vector<8x32xbf16> to vector<8x32xf32>
      %cst_14 = arith.constant dense<0.000000e+00> : vector<8xf32>
      %17 = vector.multi_reduction <add>, %16, %cst_14 [1] : vector<8x32xf32> to vector<8xf32>
      %18 = vector.shape_cast %17 : vector<8xf32> to vector<8x1xf32>
      %cst_15 = arith.constant 3.200000e+01 : f32
      %19 = vector.broadcast %cst_15 : f32 to vector<8x1xf32>
      %20 = arith.divf %18, %19 : vector<8x1xf32>
      %21 = vector.broadcast %20 : vector<8x1xf32> to vector<8x32xf32>
      %22 = arith.subf %16, %21 : vector<8x32xf32>
      %23 = arith.mulf %22, %22 : vector<8x32xf32>
      %cst_16 = arith.constant dense<0.000000e+00> : vector<8xf32>
      %24 = vector.multi_reduction <add>, %23, %cst_16 [1] : vector<8x32xf32> to vector<8xf32>
      %25 = vector.shape_cast %24 : vector<8xf32> to vector<8x1xf32>
      %cst_17 = arith.constant 3.200000e+01 : f32
      %26 = vector.broadcast %cst_17 : f32 to vector<8x1xf32>
      %27 = arith.divf %25, %26 : vector<8x1xf32>
      %cst_18 = arith.constant 9.99999974E-6 : f32
      %28 = vector.broadcast %cst_18 : f32 to vector<8x1xf32>
      %29 = arith.addf %27, %28 : vector<8x1xf32>
      %30 = math.rsqrt %29 : vector<8x1xf32>
      %31 = vector.broadcast %30 : vector<8x1xf32> to vector<8x32xf32>
      %32 = arith.mulf %22, %31 : vector<8x32xf32>
      %c0_19 = arith.constant 0 : index
      %c0_20 = arith.constant 0 : index
      %33 = vector.load %arg6[%c0_19, %c0_20] : memref<1x32xf32, #tpu.memory_space<vmem>>, vector<1x32xf32>
      %34 = vector.broadcast %33 : vector<1x32xf32> to vector<8x32xf32>
      %35 = arith.mulf %32, %34 : vector<8x32xf32>
      %c0_21 = arith.constant 0 : index
      %c0_22 = arith.constant 0 : index
      %36 = vector.load %arg7[%c0_21, %c0_22] : memref<1x32xf32, #tpu.memory_space<vmem>>, vector<1x32xf32>
      %37 = vector.broadcast %36 : vector<1x32xf32> to vector<8x32xf32>
      %38 = arith.addf %35, %37 : vector<8x32xf32>
      %39 = arith.truncf %38 : vector<8x32xf32> to vector<8x32xbf16>
      %c0_23 = arith.constant 0 : index
      %c0_24 = arith.constant 0 : index
      %40 = vector.load %arg10[%c0_23, %c0_24] : memref<8x32xbf16, #tpu.memory_space<vmem>>, vector<8x32xbf16>
      tpu.vector_store %arg10[%c0_23, %c0_24], %39 {strides = array<i32>} : memref<8x32xbf16, #tpu.memory_space<vmem>>, vector<8x32xbf16>,
    } else {
    }
    %c0 = arith.constant 0 : index
    %c0_3 = arith.constant 0 : index
    %6 = vector.load %arg10[%c0, %c0_3] : memref<8x32xbf16, #tpu.memory_space<vmem>>, vector<8x32xbf16>
    %c0_4 = arith.constant 0 : index
    %c0_5 = arith.constant 0 : index
    %7 = vector.load %arg9[%c0_4, %c0_5] : memref<8x10xf32, #tpu.memory_space<vmem>>, vector<8x10xf32>
    %c0_6 = arith.constant 0 : index
    %c0_7 = arith.constant 0 : index
    %8 = vector.load %arg4[%c0_6, %c0_7] : memref<32x10xbf16, #tpu.memory_space<vmem>>, vector<32x10xbf16>
    %cst = arith.constant dense<0.000000e+00> : vector<8x10xf32>
    %9 = tpu.matmul %6, %8, %cst {dimension_numbers = #tpu.dot_dimension_numbers<[1], [0], [0], [1], [0, 0, 1, 1], [], []>} : vector<8x32xbf16>, vector<32x10xbf16>, vector<8x10xf32> -> vector<8x10xf32>
    %10 = arith.addf %7, %9 : vector<8x10xf32>
    %c0_8 = arith.constant 0 : index
    %c0_9 = arith.constant 0 : index
    %11 = vector.load %arg9[%c0_8, %c0_9] : memref<8x10xf32, #tpu.memory_space<vmem>>, vector<8x10xf32>
    tpu.vector_store %arg9[%c0_8, %c0_9], %10 {strides = array<i32>} : memref<8x10xf32, #tpu.memory_space<vmem>>, vector<8x10xf32>,
    %c0_i32_10 = arith.constant 0 : i32
    %12 = arith.cmpi eq, %arg2, %c0_i32_10 : i32
    %13 = arith.extui %12 : i1 to i32
    %c0_i32_11 = arith.constant 0 : i32
    %14 = arith.cmpi ne, %13, %c0_i32_11 : i32
    scf.if %14 {
      %c0_12 = arith.constant 0 : index
      %c0_13 = arith.constant 0 : index
      %15 = vector.load %arg9[%c0_12, %c0_13] : memref<8x10xf32, #tpu.memory_space<vmem>>, vector<8x10xf32>
      %c0_14 = arith.constant 0 : index
      %c0_15 = arith.constant 0 : index
      %16 = vector.load %arg8[%c0_14, %c0_15] : memref<8x10xf32, #tpu.memory_space<vmem>>, vector<8x10xf32>
      tpu.vector_store %arg8[%c0_14, %c0_15], %15 {strides = array<i32>} : memref<8x10xf32, #tpu.memory_space<vmem>>, vector<8x10xf32>,
    } else {
    }
    return
  }
  func.func @transform_0(%arg0: i32, %arg1: i32, %arg2: i32) -> (i32, i32) {
    %c0_i32 = arith.constant 0 : i32
    return %arg0, %arg2 : i32, i32
  }
  func.func @transform_1(%arg0: i32, %arg1: i32, %arg2: i32) -> (i32, i32) {
    %c0_i32 = arith.constant 0 : i32
    return %arg2, %arg1 : i32, i32
  }
  func.func @transform_2(%arg0: i32, %arg1: i32, %arg2: i32) -> (i32, i32) {
    %c0_i32 = arith.constant 0 : i32
    %c0_i32_0 = arith.constant 0 : i32
    return %c0_i32, %arg1 : i32, i32
  }
  func.func @transform_3(%arg0: i32, %arg1: i32, %arg2: i32) -> (i32, i32) {
    %c0_i32 = arith.constant 0 : i32
    %c0_i32_0 = arith.constant 0 : i32
    return %c0_i32, %arg2 : i32, i32
  }
  func.func @transform_4(%arg0: i32, %arg1: i32, %arg2: i32) -> (i32, i32) {
    %c0_i32 = arith.constant 0 : i32
    %c0_i32_0 = arith.constant 0 : i32
    return %c0_i32, %arg2 : i32, i32
  }
  func.func @transform_5(%arg0: i32, %arg1: i32, %arg2: i32) -> (i32, i32) {
    %c0_i32 = arith.constant 0 : i32
    return %arg0, %arg1 : i32, i32
  }
}

module attributes {stable_mosaic.version = 11 : i64} {
  func.func @_mlp_block_kernel(%arg0: i32, %arg1: memref<48x32xbf16, #tpu.memory_space<vmem>>, %arg2: memref<1x32xf32, #tpu.memory_space<vmem>>, %arg3: memref<1x32xf32, #tpu.memory_space<vmem>>, %arg4: memref<32x64xbf16, #tpu.memory_space<vmem>>, %arg5: memref<1x64xf32, #tpu.memory_space<vmem>>, %arg6: memref<64x32xbf16, #tpu.memory_space<vmem>>, %arg7: memref<1x32xf32, #tpu.memory_space<vmem>>, %arg8: memref<48x32xbf16, #tpu.memory_space<vmem>>) attributes {dimension_semantics = [#tpu.dimension_semantics<parallel>], iteration_bounds = array<i64: 1>, scalar_prefetch = 0 : i64, scratch_operands = 0 : i64, tpu.core_type = #tpu.core_type<tc>, window_params = [{transform_indices = @transform_0, window_bounds = array<i64: 48, 32>}, {pipeline_mode = #tpu.pipeline_mode<synchronous>, transform_indices = @transform_1, window_bounds = array<i64: 1, 32>}, {pipeline_mode = #tpu.pipeline_mode<synchronous>, transform_indices = @transform_2, window_bounds = array<i64: 1, 32>}, {pipeline_mode = #tpu.pipeline_mode<synchronous>, transform_indices = @transform_3, window_bounds = array<i64: 32, 64>}, {pipeline_mode = #tpu.pipeline_mode<synchronous>, transform_indices = @transform_4, window_bounds = array<i64: 1, 64>}, {pipeline_mode = #tpu.pipeline_mode<synchronous>, transform_indices = @transform_5, window_bounds = array<i64: 64, 32>}, {pipeline_mode = #tpu.pipeline_mode<synchronous>, transform_indices = @transform_6, window_bounds = array<i64: 1, 32>}, {transform_indices = @transform_7, window_bounds = array<i64: 48, 32>}]} {
    %c0 = arith.constant 0 : index
    %c0_0 = arith.constant 0 : index
    %0 = vector.load %arg1[%c0, %c0_0] : memref<48x32xbf16, #tpu.memory_space<vmem>>, vector<48x32xbf16>
    %1 = arith.extf %0 : vector<48x32xbf16> to vector<48x32xf32>
    %cst = arith.constant dense<0.000000e+00> : vector<48xf32>
    %2 = vector.multi_reduction <add>, %1, %cst [1] : vector<48x32xf32> to vector<48xf32>
    %3 = vector.shape_cast %2 : vector<48xf32> to vector<48x1xf32>
    %cst_1 = arith.constant 3.200000e+01 : f32
    %4 = vector.broadcast %cst_1 : f32 to vector<48x1xf32>
    %5 = arith.divf %3, %4 : vector<48x1xf32>
    %6 = vector.broadcast %5 : vector<48x1xf32> to vector<48x32xf32>
    %7 = arith.subf %1, %6 : vector<48x32xf32>
    %8 = arith.mulf %7, %7 : vector<48x32xf32>
    %cst_2 = arith.constant dense<0.000000e+00> : vector<48xf32>
    %9 = vector.multi_reduction <add>, %8, %cst_2 [1] : vector<48x32xf32> to vector<48xf32>
    %10 = vector.shape_cast %9 : vector<48xf32> to vector<48x1xf32>
    %cst_3 = arith.constant 3.200000e+01 : f32
    %11 = vector.broadcast %cst_3 : f32 to vector<48x1xf32>
    %12 = arith.divf %10, %11 : vector<48x1xf32>
    %cst_4 = arith.constant 9.99999974E-6 : f32
    %13 = vector.broadcast %cst_4 : f32 to vector<48x1xf32>
    %14 = arith.addf %12, %13 : vector<48x1xf32>
    %15 = math.rsqrt %14 : vector<48x1xf32>
    %16 = vector.broadcast %15 : vector<48x1xf32> to vector<48x32xf32>
    %17 = arith.mulf %7, %16 : vector<48x32xf32>
    %c0_5 = arith.constant 0 : index
    %c0_6 = arith.constant 0 : index
    %18 = vector.load %arg2[%c0_5, %c0_6] : memref<1x32xf32, #tpu.memory_space<vmem>>, vector<1x32xf32>
    %19 = vector.broadcast %18 : vector<1x32xf32> to vector<48x32xf32>
    %20 = arith.mulf %17, %19 : vector<48x32xf32>
    %c0_7 = arith.constant 0 : index
    %c0_8 = arith.constant 0 : index
    %21 = vector.load %arg3[%c0_7, %c0_8] : memref<1x32xf32, #tpu.memory_space<vmem>>, vector<1x32xf32>
    %22 = vector.broadcast %21 : vector<1x32xf32> to vector<48x32xf32>
    %23 = arith.addf %20, %22 : vector<48x32xf32>
    %24 = arith.truncf %23 : vector<48x32xf32> to vector<48x32xbf16>
    %c0_9 = arith.constant 0 : index
    %c0_10 = arith.constant 0 : index
    %25 = vector.load %arg4[%c0_9, %c0_10] : memref<32x64xbf16, #tpu.memory_space<vmem>>, vector<32x64xbf16>
    %cst_11 = arith.constant dense<0.000000e+00> : vector<48x64xf32>
    %26 = tpu.matmul %24, %25, %cst_11 {dimension_numbers = #tpu.dot_dimension_numbers<[1], [0], [0], [1], [0, 0, 1, 1], [], []>} : vector<48x32xbf16>, vector<32x64xbf16>, vector<48x64xf32> -> vector<48x64xf32>
    %c0_12 = arith.constant 0 : index
    %c0_13 = arith.constant 0 : index
    %27 = vector.load %arg5[%c0_12, %c0_13] : memref<1x64xf32, #tpu.memory_space<vmem>>, vector<1x64xf32>
    %28 = vector.broadcast %27 : vector<1x64xf32> to vector<48x64xf32>
    %29 = arith.addf %26, %28 : vector<48x64xf32>
    %cst_14 = arith.constant 5.000000e-01 : f32
    %30 = vector.broadcast %cst_14 : f32 to vector<48x64xf32>
    %31 = arith.mulf %30, %29 : vector<48x64xf32>
    %cst_15 = arith.constant 4.471500e-02 : f32
    %32 = vector.broadcast %cst_15 : f32 to vector<48x64xf32>
    %33 = arith.mulf %32, %29 : vector<48x64xf32>
    %34 = arith.mulf %33, %29 : vector<48x64xf32>
    %35 = arith.mulf %34, %29 : vector<48x64xf32>
    %36 = arith.addf %29, %35 : vector<48x64xf32>
    %cst_16 = arith.constant 0.797884583 : f32
    %37 = vector.broadcast %cst_16 : f32 to vector<48x64xf32>
    %38 = arith.mulf %37, %36 : vector<48x64xf32>
    %39 = math.tanh %38 : vector<48x64xf32>
    %cst_17 = arith.constant 1.000000e+00 : f32
    %40 = vector.broadcast %cst_17 : f32 to vector<48x64xf32>
    %41 = arith.addf %40, %39 : vector<48x64xf32>
    %42 = arith.mulf %31, %41 : vector<48x64xf32>
    %43 = arith.truncf %42 : vector<48x64xf32> to vector<48x64xbf16>
    %c0_18 = arith.constant 0 : index
    %c0_19 = arith.constant 0 : index
    %44 = vector.load %arg6[%c0_18, %c0_19] : memref<64x32xbf16, #tpu.memory_space<vmem>>, vector<64x32xbf16>
    %cst_20 = arith.constant dense<0.000000e+00> : vector<48x32xf32>
    %45 = tpu.matmul %43, %44, %cst_20 {dimension_numbers = #tpu.dot_dimension_numbers<[1], [0], [0], [1], [0, 0, 1, 1], [], []>} : vector<48x64xbf16>, vector<64x32xbf16>, vector<48x32xf32> -> vector<48x32xf32>
    %c0_21 = arith.constant 0 : index
    %c0_22 = arith.constant 0 : index
    %46 = vector.load %arg7[%c0_21, %c0_22] : memref<1x32xf32, #tpu.memory_space<vmem>>, vector<1x32xf32>
    %47 = vector.broadcast %46 : vector<1x32xf32> to vector<48x32xf32>
    %48 = arith.addf %45, %47 : vector<48x32xf32>
    %49 = arith.addf %48, %1 : vector<48x32xf32>
    %50 = arith.truncf %49 : vector<48x32xf32> to vector<48x32xbf16>
    %c0_23 = arith.constant 0 : index
    %c0_24 = arith.constant 0 : index
    %51 = vector.load %arg8[%c0_23, %c0_24] : memref<48x32xbf16, #tpu.memory_space<vmem>>, vector<48x32xbf16>
    tpu.vector_store %arg8[%c0_23, %c0_24], %50 {strides = array<i32>} : memref<48x32xbf16, #tpu.memory_space<vmem>>, vector<48x32xbf16>,
    return
  }
  func.func @transform_0(%arg0: i32) -> (i32, i32) {
    %c0_i32 = arith.constant 0 : i32
    %c0_i32_0 = arith.constant 0 : i32
    return %arg0, %c0_i32 : i32, i32
  }
  func.func @transform_1(%arg0: i32) -> (i32, i32) {
    %c0_i32 = arith.constant 0 : i32
    %c0_i32_0 = arith.constant 0 : i32
    %c0_i32_1 = arith.constant 0 : i32
    return %c0_i32, %c0_i32_0 : i32, i32
  }
  func.func @transform_2(%arg0: i32) -> (i32, i32) {
    %c0_i32 = arith.constant 0 : i32
    %c0_i32_0 = arith.constant 0 : i32
    %c0_i32_1 = arith.constant 0 : i32
    return %c0_i32, %c0_i32_0 : i32, i32
  }
  func.func @transform_3(%arg0: i32) -> (i32, i32) {
    %c0_i32 = arith.constant 0 : i32
    %c0_i32_0 = arith.constant 0 : i32
    %c0_i32_1 = arith.constant 0 : i32
    return %c0_i32, %c0_i32_0 : i32, i32
  }
  func.func @transform_4(%arg0: i32) -> (i32, i32) {
    %c0_i32 = arith.constant 0 : i32
    %c0_i32_0 = arith.constant 0 : i32
    %c0_i32_1 = arith.constant 0 : i32
    return %c0_i32, %c0_i32_0 : i32, i32
  }
  func.func @transform_5(%arg0: i32) -> (i32, i32) {
    %c0_i32 = arith.constant 0 : i32
    %c0_i32_0 = arith.constant 0 : i32
    %c0_i32_1 = arith.constant 0 : i32
    return %c0_i32, %c0_i32_0 : i32, i32
  }
  func.func @transform_6(%arg0: i32) -> (i32, i32) {
    %c0_i32 = arith.constant 0 : i32
    %c0_i32_0 = arith.constant 0 : i32
    %c0_i32_1 = arith.constant 0 : i32
    return %c0_i32, %c0_i32_0 : i32, i32
  }
  func.func @transform_7(%arg0: i32) -> (i32, i32) {
    %c0_i32 = arith.constant 0 : i32
    %c0_i32_0 = arith.constant 0 : i32
    return %arg0, %c0_i32 : i32, i32
  }
}

</mosaic_0001>

<bundles_post_ra>
// kernel: vit_embedded_forward.8
= control target key start
LH: loop header
LB: loop body
LE: loop exit
PB: predicated region body
PF: predicated region fallthrough
CT: control target
= control target key end

     0   :  { %vm26_vm0 = vcmask 261120   ;;  %vm196_vm1 = vcmask 257024   ;;  %s337_s1 = inlined_call_operand.vmem [shape: bf16[128,32], index: 1, kind: input, shape index: {}]   ;;  %s338_s0 = inlined_call_operand.vmem [shape: bf16[32,128], index: 0, kind: input, shape index: {}]   ;;  %s339_s2 = inlined_call_operand.vmem [shape: f32[1,32], index: 2, kind: input, shape index: {}]   ;;  %s340_s3 = inlined_call_operand.vmem [shape: bf16[32,32], index: 3, kind: output, shape index: {}]  }
   0x1   :  { %v254_v0 = vld [vmem:[%s337_s1 + $0x38] sm:$0xff]   ;;  %v255_v1 = vld [vmem:[%s337_s1 + $0x30] sm:$0xff]   ;;  %v256_v2 = vld [vmem:[%s337_s1 + $0x28] sm:$0xff]  }
   0x2   :  { %234 = vmatprep.subr.bf16.mxu0 %v254_v0  ;;  %v257_v3 = vld [vmem:[%s337_s1 + $0x20] sm:$0xff]   ;;  %v258_v6 = vld [vmem:[%s337_s1 + $0x18] sm:$0xff]   ;;  %v259_v7 = vld [vmem:[%s337_s1 + $0x10] sm:$0xff]  }
   0x3   :  { %235 = vmatpush3.bf16.msra.mxu0 %v254_v0  ;;  %v262_v4 = vld [vmem:[%s338_s0] sm:$0xff]   ;;  %v260_v8 = vld [vmem:[%s337_s1 + $0x8] sm:$0xff]  }
   0x4   :  { %236 = vmatprep.subr.bf16.mxu0 %v255_v1  ;;  %250 = vmatprep.mubr.bf16.mxu0 %v262_v4  ;;  %v205_v5 = vld [vmem:[%s339_s2] ss:$0 sm:$0xff]  ;;  %v263_v10 = vld [vmem:[%s338_s0 + $0x8] sm:$0xff]  }
   0x5   :  { %29 = vst.msk [vmem:[#allocation2 + $0x10] sm:$0xff] %vm26_vm0, %v205_v5  ;;  %27 = vst.msk [vmem:[#allocation2] sm:$0xff] %vm26_vm0, %v205_v5  ;;  %v261_v9 = vld [vmem:[%s337_s1] sm:$0xff]  }
   0x6   :  { %28 = vst.msk [vmem:[#allocation2 + $0x8] sm:$0xff] %vm26_vm0, %v205_v5  ;;  %30 = vst.msk [vmem:[#allocation2 + $0x18] sm:$0xff] %vm26_vm0, %v205_v5 }
   0x7   :  { %237 = vmatpush3.bf16.msra.mxu0 %v255_v1 }
   0x8   :  { %238 = vmatprep.subr.bf16.mxu0 %v256_v2 }
   0xb   :  { %239 = vmatpush3.bf16.msra.mxu0 %v256_v2 }
   0xc   :  { %240 = vmatprep.subr.bf16.mxu0 %v257_v3  ;;  %v37_v11 = vld [vmem:[#allocation2 + $0x10] sm:$0xff]  ;;  %v35_v13 = vld [vmem:[#allocation2] sm:$0xff] }
   0xd   :  { %v38_v16 = vld [vmem:[#allocation2 + $0x18] sm:$0xff]  ;;  %v36_v19 = vld [vmem:[#allocation2 + $0x8] sm:$0xff] }
   0xf   :  { %241 = vmatpush3.bf16.msra.mxu0 %v257_v3 }
  0x10   :  { %242 = vmatprep.subr.bf16.mxu0 %v258_v6 }
  0x13   :  { %243 = vmatpush3.bf16.msra.mxu0 %v258_v6 }
  0x14   :  { %244 = vmatprep.subr.bf16.mxu0 %v259_v7 }
  0x17   :  { %245 = vmatpush3.bf16.msra.mxu0 %v259_v7 }
  0x18   :  { %246 = vmatprep.subr.bf16.mxu0 %v260_v8 }
  0x1b   :  { %247 = vmatpush3.bf16.msra.mxu0 %v260_v8 }
  0x1c   :  { %248 = vmatprep.subr.bf16.mxu0 %v261_v9 }
  0x1f   :  { %249 = vmatpush3.bf16.msra.mxu0 %v261_v9 }
  0x22   :  { %251 = vmatmul.mubr.bf16.vlgmr.msra.gmra.mxu0 %v263_v10 }
  0xe2   :  { %v252_v12 = vpop.f32.mrf.mxu0 }
  0xe3   :  { %v166_v14 = vadd.f32 %v252_v12, %v37_v11 }
  0xe4   :  { %v149_v15 = vpop.f32.mrf.mxu0 }
  0xe5   :  { %171 = vst.msk [vmem:[#allocation2 + $0x10] sm:$0xff] %vm26_vm0, %v166_v14  ;;  %v164_v17 = vadd.f32 %v149_v15, %v35_v13 }
  0xe6   :  { %v253_v18 = vpop.f32.mrf.mxu0 }
  0xe7   :  { %169 = vst.msk [vmem:[#allocation2] sm:$0xff] %vm26_vm0, %v164_v17  ;;  %v167_v20 = vadd.f32 %v253_v18, %v38_v16 }
  0xe8   :  { %v152_v21 = vpop.f32.mrf.mxu0 }
  0xe9   :  { %172 = vst.msk [vmem:[#allocation2 + $0x18] sm:$0xff] %vm26_vm0, %v167_v20  ;;  %v165_v22 = vadd.f32 %v152_v21, %v36_v19 }
  0xeb   :  { %170 = vst.msk [vmem:[#allocation2 + $0x8] sm:$0xff] %vm26_vm0, %v165_v22 }
  0xec   :  { %v178_v23 = vld [vmem:[#allocation2 + $0x10] sm:$0xff] }
  0xed   :  { %v222_v24 = vpack.c.bf16 %v178_v23, %v178_v23 }
  0xee   :  { %v176_v25 = vld [vmem:[#allocation2] sm:$0xff] }
  0xef   :  { %199 = vst.msk [vmem:[%s340_s3 + $0x8] sm:$0xf] %vm196_vm1, %v222_v24  ;;  %v220_v26 = vpack.c.bf16 %v176_v25, %v176_v25 }
  0xf0   :  { %v179_v27 = vld [vmem:[#allocation2 + $0x18] sm:$0xff] }
  0xf1   :  { %197 = vst.msk [vmem:[%s340_s3] sm:$0xf] %vm196_vm1, %v220_v26  ;;  %v223_v28 = vpack.c.bf16 %v179_v27, %v179_v27 }
  0xf2   :  { %v177_v29 = vld [vmem:[#allocation2 + $0x8] sm:$0xff] }
  0xf3   :  { %200 = vst.msk [vmem:[%s340_s3 + $0xc] sm:$0xf] %vm196_vm1, %v223_v28  ;;  %v221_v30 = vpack.c.bf16 %v177_v29, %v177_v29 }
  0xf5   :  { %198 = vst.msk [vmem:[%s340_s3 + $0x4] sm:$0xf] %vm196_vm1, %v221_v30 }

// kernel: vit_embedded_forward.7
= control target key start
LH: loop header
LB: loop body
LE: loop exit
PB: predicated region body
PF: predicated region fallthrough
CT: control target
= control target key end

     0   :  { %vm491_vm0 = vcmask 1044480   ;;  %vm492_vm1 = vcmask 1045504   ;;  %v1708_v1 = vmov 65535   ;;  %vm394_vm2 = vcmask 220160   ;;  %s2328_s1 = inlined_call_operand.vmem [shape: bf16[27,8], index: 1, kind: input, shape index: {}]   ;;  %s2329_s0 = inlined_call_operand.vmem [shape: bf16[512,27], index: 0, kind: input, shape index: {}]   ;;  %s2330_s2 = inlined_call_operand.vmem [shape: f32[1,8], index: 2, kind: input, shape index: {}]   ;;  %s2331_s3 = inlined_call_operand.vmem [shape: bf16[512,8], index: 3, kind: output, shape index: {}]  }
   0x1   :  { %v1674_v0 = vld [vmem:[%s2328_s1 + $0x8] sm:$0x3f]   ;;  %v493_v2 = vsel %vm491_vm0, 4294967295, %v1708_v1  ;;  %v1676_v4 = vld [vmem:[%s2329_s0] sm:$0xff]   ;;  %v1680_v10 = vld [vmem:[%s2329_s0 + $0x10] sm:$0xff]   ;;  %vm26_vm3 = vcmask 64512  }
   0x2   :  { %v494_v3 = vsel %vm492_vm1, %v493_v2, 0  ;;  %v1675_v6 = vld [vmem:[%s2328_s1] sm:$0xff]   ;;  %1605 = vmatprep.mubr.msk.bf16.mxu0 %vm394_vm2, %v1676_v4  ;;  %v1678_v8 = vld [vmem:[%s2329_s0 + $0x8] sm:$0xff]   ;;  %v1681_v11 = vld [vmem:[%s2329_s0 + $0x90] sm:$0xff]   ;;  %vm1303_vm4 = vcmask 60416  }
   0x3   :  { %v496_v5 = vand.u32 %v1674_v0, %v494_v3  ;;  %v1677_v7 = vld [vmem:[%s2329_s0 + $0x80] sm:$0xff]   ;;  %v1679_v9 = vld [vmem:[%s2329_s0 + $0x88] sm:$0xff]   ;;  %v1682_v12 = vld [vmem:[%s2329_s0 + $0x18] sm:$0xff]  }
   0x4   :  { %1637 = vmatprep.mubr.msk.bf16.mxu1 %vm394_vm2, %v1677_v7  ;;  %v1683_v13 = vld [vmem:[%s2329_s0 + $0x98] sm:$0xff]   ;;  %v1684_v14 = vld [vmem:[%s2329_s0 + $0x20] sm:$0xff]   ;;  %v1686_v16 = vld [vmem:[%s2329_s0 + $0x28] sm:$0xff]  }
   0x5   :  { %1601 = vmatprep.subr.bf16.mxu0 %v496_v5  ;;  %1669 = vmatprep.subr.bf16.mxu1 %v496_v5  ;;  %v1685_v15 = vld [vmem:[%s2329_s0 + $0xa0] sm:$0xff]   ;;  %v1687_v17 = vld [vmem:[%s2329_s0 + $0xa8] sm:$0xff]   ;;  %v1688_v18 = vld [vmem:[%s2329_s0 + $0x30] sm:$0xff]  }
   0x6   :  { %1602 = vmatpush3.bf16.msra.mxu0 %v496_v5  ;;  %1671 = vmatpush3.bf16.msra.mxu1 %v496_v5  ;;  %v1689_v19 = vld [vmem:[%s2329_s0 + $0xb0] sm:$0xff]   ;;  %v1794_v20 = vld [vmem:[%s2329_s0 + $0x38] sm:$0xff]   ;;  %v1804_v22 = vld [vmem:[%s2329_s0 + $0x40] sm:$0xff]  }
   0x7   :  { %1603 = vmatprep.subr.bf16.mxu0 %v1675_v6  ;;  %1670 = vmatprep.subr.bf16.mxu1 %v1675_v6  ;;  %v1799_v21 = vld [vmem:[%s2329_s0 + $0xb8] sm:$0xff]   ;;  %v1809_v23 = vld [vmem:[%s2329_s0 + $0xc0] sm:$0xff]   ;;  %v1694_v25 = vld [vmem:[%s2329_s0 + $0x48] sm:$0xff]  }
   0x8   :  { %v1814_v24 = vld [vmem:[%s2330_s2] ss:$0 sm:$0xff]  ;;  %v1695_v26 = vld [vmem:[%s2329_s0 + $0xc8] sm:$0xff]   ;;  %v1696_v27 = vld [vmem:[%s2329_s0 + $0x50] sm:$0xff]  }
   0x9   :  { %29 = vst.msk [vmem:[#allocation2 + $0x10] sm:$0xff] %vm26_vm3, %v1814_v24  ;;  %27 = vst.msk [vmem:[#allocation2] sm:$0xff] %vm26_vm3, %v1814_v24  ;;  %v1697_v28 = vld [vmem:[%s2329_s0 + $0xd0] sm:$0xff]   ;;  %v1698_v29 = vld [vmem:[%s2329_s0 + $0x58] sm:$0xff]  }
   0xa   :  { %1604 = vmatpush3.bf16.msra.mxu0 %v1675_v6  ;;  %1672 = vmatpush3.bf16.msra.mxu1 %v1675_v6  ;;  %28 = vst.msk [vmem:[#allocation2 + $0x8] sm:$0xff] %vm26_vm3, %v1814_v24  ;;  %30 = vst.msk [vmem:[#allocation2 + $0x18] sm:$0xff] %vm26_vm3, %v1814_v24  ;;  %v1699_v30 = vld [vmem:[%s2329_s0 + $0xd8] sm:$0xff]   ;;  %v1700_v31 = vld [vmem:[%s2329_s0 + $0x60] sm:$0xff]  }
   0xb   :  { %31 = vst.msk [vmem:[#allocation2 + $0x20] sm:$0xff] %vm26_vm3, %v1814_v24  ;;  %32 = vst.msk [vmem:[#allocation2 + $0x28] sm:$0xff] %vm26_vm3, %v1814_v24  ;;  %v1701_v32 = vld [vmem:[%s2329_s0 + $0xe0] sm:$0xff]   ;;  %v1702_v33 = vld [vmem:[%s2329_s0 + $0x68] sm:$0xff]  }
   0xc   :  { %33 = vst.msk [vmem:[#allocation2 + $0x30] sm:$0xff] %vm26_vm3, %v1814_v24  ;;  %34 = vst.msk [vmem:[#allocation2 + $0x38] sm:$0xff] %vm26_vm3, %v1814_v24  ;;  %v1703_v34 = vld [vmem:[%s2329_s0 + $0xe8] sm:$0xff]   ;;  %v1704_v35 = vld [vmem:[%s2329_s0 + $0x70] sm:$0xff]  }
   0xd   :  { %1606 = vmatmul.mubr.msk.bf16.vlgmr.msra.gmra.mxu0 %vm394_vm2, %v1678_v8  ;;  %1638 = vmatmul.mubr.msk.bf16.vlgmr.msra.gmra.mxu1 %vm394_vm2, %v1679_v9  ;;  %35 = vst.msk [vmem:[#allocation2 + $0x40] sm:$0xff] %vm26_vm3, %v1814_v24  ;;  %36 = vst.msk [vmem:[#allocation2 + $0x48] sm:$0xff] %vm26_vm3, %v1814_v24  ;;  %v1705_v36 = vld [vmem:[%s2329_s0 + $0xf0] sm:$0xff]   ;;  %v1706_v37 = vld [vmem:[%s2329_s0 + $0x78] sm:$0xff]  }
   0xe   :  { %1609 = vmatprep.mubr.msk.bf16.mxu0 %vm394_vm2, %v1680_v10  ;;  %1641 = vmatprep.mubr.msk.bf16.mxu1 %vm394_vm2, %v1681_v11  ;;  %37 = vst.msk [vmem:[#allocation2 + $0x50] sm:$0xff] %vm26_vm3, %v1814_v24  ;;  %38 = vst.msk [vmem:[#allocation2 + $0x58] sm:$0xff] %vm26_vm3, %v1814_v24  ;;  %v1707_v38 = vld [vmem:[%s2329_s0 + $0xf8] sm:$0xff]  }
   0xf   :  { %39 = vst.msk [vmem:[#allocation2 + $0x60] sm:$0xff] %vm26_vm3, %v1814_v24  ;;  %40 = vst.msk [vmem:[#allocation2 + $0x68] sm:$0xff] %vm26_vm3, %v1814_v24 }
  0x10   :  { %41 = vst.msk [vmem:[#allocation2 + $0x70] sm:$0xff] %vm26_vm3, %v1814_v24  ;;  %42 = vst.msk [vmem:[#allocation2 + $0x78] sm:$0xff] %vm26_vm3, %v1814_v24  ;;  %v157_v39 = vld [vmem:[#allocation2 + $0x10] sm:$0xff]  ;;  %v155_v43 = vld [vmem:[#allocation2] sm:$0xff] }
  0x11   :  { %43 = vst.msk [vmem:[#allocation2 + $0x80] sm:$0xff] %vm26_vm3, %v1814_v24  ;;  %44 = vst.msk [vmem:[#allocation2 + $0x88] sm:$0xff] %vm26_vm3, %v1814_v24  ;;  %v158_v49 = vld [vmem:[#allocation2 + $0x18] sm:$0xff]  ;;  %v156_v55 = vld [vmem:[#allocation2 + $0x8] sm:$0xff] }
  0x12   :  { %45 = vst.msk [vmem:[#allocation2 + $0x90] sm:$0xff] %vm26_vm3, %v1814_v24  ;;  %46 = vst.msk [vmem:[#allocation2 + $0x98] sm:$0xff] %vm26_vm3, %v1814_v24  ;;  %v159_v3 = vld [vmem:[#allocation2 + $0x20] sm:$0xff] }
  0x13   :  { %47 = vst.msk [vmem:[#allocation2 + $0xa0] sm:$0xff] %vm26_vm3, %v1814_v24  ;;  %48 = vst.msk [vmem:[#allocation2 + $0xa8] sm:$0xff] %vm26_vm3, %v1814_v24  ;;  %v161_v61 = vld [vmem:[#allocation2 + $0x30] sm:$0xff] }
  0x14   :  { %49 = vst.msk [vmem:[#allocation2 + $0xb0] sm:$0xff] %vm26_vm3, %v1814_v24  ;;  %50 = vst.msk [vmem:[#allocation2 + $0xb8] sm:$0xff] %vm26_vm3, %v1814_v24 }
  0x15   :  { %1610 = vmatmul.mubr.msk.bf16.gmra.mxu0 %vm394_vm2, %v1682_v12  ;;  %1642 = vmatmul.mubr.msk.bf16.gmra.mxu1 %vm394_vm2, %v1683_v13  ;;  %51 = vst.msk [vmem:[#allocation2 + $0xc0] sm:$0xff] %vm26_vm3, %v1814_v24  ;;  %52 = vst.msk [vmem:[#allocation2 + $0xc8] sm:$0xff] %vm26_vm3, %v1814_v24 }
  0x16   :  { %1613 = vmatprep.mubr.msk.bf16.mxu0 %vm394_vm2, %v1684_v14  ;;  %1645 = vmatprep.mubr.msk.bf16.mxu1 %vm394_vm2, %v1685_v15  ;;  %53 = vst.msk [vmem:[#allocation2 + $0xd0] sm:$0xff] %vm26_vm3, %v1814_v24  ;;  %54 = vst.msk [vmem:[#allocation2 + $0xd8] sm:$0xff] %vm26_vm3, %v1814_v24  ;;  %v162_v15 = vld [vmem:[#allocation2 + $0x38] sm:$0xff] }
  0x17   :  { %55 = vst.msk [vmem:[#allocation2 + $0xe0] sm:$0xff] %vm26_vm3, %v1814_v24  ;;  %56 = vst.msk [vmem:[#allocation2 + $0xe8] sm:$0xff] %vm26_vm3, %v1814_v24 }
  0x18   :  { %57 = vst.msk [vmem:[#allocation2 + $0xf0] sm:$0xff] %vm26_vm3, %v1814_v24  ;;  %58 = vst.msk [vmem:[#allocation2 + $0xf8] sm:$0xff] %vm26_vm3, %v1814_v24 }
  0x19   :  { %59 = vst.msk [vmem:[#allocation2 + $0x100] sm:$0xff] %vm26_vm3, %v1814_v24  ;;  %60 = vst.msk [vmem:[#allocation2 + $0x108] sm:$0xff] %vm26_vm3, %v1814_v24 }
  0x1a   :  { %61 = vst.msk [vmem:[#allocation2 + $0x110] sm:$0xff] %vm26_vm3, %v1814_v24  ;;  %62 = vst.msk [vmem:[#allocation2 + $0x118] sm:$0xff] %vm26_vm3, %v1814_v24 }
  0x1b   :  { %63 = vst.msk [vmem:[#allocation2 + $0x120] sm:$0xff] %vm26_vm3, %v1814_v24  ;;  %64 = vst.msk [vmem:[#allocation2 + $0x128] sm:$0xff] %vm26_vm3, %v1814_v24 }
  0x1c   :  { %65 = vst.msk [vmem:[#allocation2 + $0x130] sm:$0xff] %vm26_vm3, %v1814_v24  ;;  %66 = vst.msk [vmem:[#allocation2 + $0x138] sm:$0xff] %vm26_vm3, %v1814_v24 }
  0x1d   :  { %1614 = vmatmul.mubr.msk.bf16.gmra.mxu0 %vm394_vm2, %v1686_v16  ;;  %1646 = vmatmul.mubr.msk.bf16.gmra.mxu1 %vm394_vm2, %v1687_v17  ;;  %67 = vst.msk [vmem:[#allocation2 + $0x140] sm:$0xff] %vm26_vm3, %v1814_v24  ;;  %68 = vst.msk [vmem:[#allocation2 + $0x148] sm:$0xff] %vm26_vm3, %v1814_v24 }
  0x1e   :  { %1617 = vmatprep.mubr.msk.bf16.mxu0 %vm394_vm2, %v1688_v18  ;;  %1649 = vmatprep.mubr.msk.bf16.mxu1 %vm394_vm2, %v1689_v19  ;;  %69 = vst.msk [vmem:[#allocation2 + $0x150] sm:$0xff] %vm26_vm3, %v1814_v24  ;;  %70 = vst.msk [vmem:[#allocation2 + $0x158] sm:$0xff] %vm26_vm3, %v1814_v24 }
  0x1f   :  { %71 = vst.msk [vmem:[#allocation2 + $0x160] sm:$0xff] %vm26_vm3, %v1814_v24  ;;  %72 = vst.msk [vmem:[#allocation2 + $0x168] sm:$0xff] %vm26_vm3, %v1814_v24 }
  0x20   :  { %73 = vst.msk [vmem:[#allocation2 + $0x170] sm:$0xff] %vm26_vm3, %v1814_v24  ;;  %74 = vst.msk [vmem:[#allocation2 + $0x178] sm:$0xff] %vm26_vm3, %v1814_v24  ;;  %v187_v44 = vld [vmem:[#allocation2 + $0x100] sm:$0xff]  ;;  %v188_v56 = vld [vmem:[#allocation2 + $0x108] sm:$0xff] }
  0x21   :  { %75 = vst.msk [vmem:[#allocation2 + $0x180] sm:$0xff] %vm26_vm3, %v1814_v24  ;;  %76 = vst.msk [vmem:[#allocation2 + $0x188] sm:$0xff] %vm26_vm3, %v1814_v24  ;;  %v189_v40 = vld [vmem:[#allocation2 + $0x110] sm:$0xff]  ;;  %v190_v50 = vld [vmem:[#allocation2 + $0x118] sm:$0xff] }
  0x22   :  { %77 = vst.msk [vmem:[#allocation2 + $0x190] sm:$0xff] %vm26_vm3, %v1814_v24  ;;  %78 = vst.msk [vmem:[#allocation2 + $0x198] sm:$0xff] %vm26_vm3, %v1814_v24  ;;  %v191_v4 = vld [vmem:[#allocation2 + $0x120] sm:$0xff] }
  0x23   :  { %79 = vst.msk [vmem:[#allocation2 + $0x1a0] sm:$0xff] %vm26_vm3, %v1814_v24  ;;  %80 = vst.msk [vmem:[#allocation2 + $0x1a8] sm:$0xff] %vm26_vm3, %v1814_v24  ;;  %v193_v62 = vld [vmem:[#allocation2 + $0x130] sm:$0xff]  ;;  %v194_v16 = vld [vmem:[#allocation2 + $0x138] sm:$0xff] }
  0x24   :  { %81 = vst.msk [vmem:[#allocation2 + $0x1b0] sm:$0xff] %vm26_vm3, %v1814_v24  ;;  %82 = vst.msk [vmem:[#allocation2 + $0x1b8] sm:$0xff] %vm26_vm3, %v1814_v24 }
  0x25   :  { %83 = vst.msk [vmem:[#allocation2 + $0x1c0] sm:$0xff] %vm26_vm3, %v1814_v24  ;;  %84 = vst.msk [vmem:[#allocation2 + $0x1c8] sm:$0xff] %vm26_vm3, %v1814_v24  ;;  %1618 = vmatmul.mubr.msk.bf16.gmra.mxu0 %vm394_vm2, %v1794_v20  ;;  %1650 = vmatmul.mubr.msk.bf16.gmra.mxu1 %vm394_vm2, %v1799_v21 }
  0x26   :  { %85 = vst.msk [vmem:[#allocation2 + $0x1d0] sm:$0xff] %vm26_vm3, %v1814_v24  ;;  %86 = vst.msk [vmem:[#allocation2 + $0x1d8] sm:$0xff] %vm26_vm3, %v1814_v24  ;;  %1621 = vmatprep.mubr.msk.bf16.mxu0 %vm394_vm2, %v1804_v22  ;;  %1653 = vmatprep.mubr.msk.bf16.mxu1 %vm394_vm2, %v1809_v23 }
  0x27   :  { %87 = vst.msk [vmem:[#allocation2 + $0x1e0] sm:$0xff] %vm26_vm3, %v1814_v24  ;;  %88 = vst.msk [vmem:[#allocation2 + $0x1e8] sm:$0xff] %vm26_vm3, %v1814_v24 }
  0x28   :  { %89 = vst.msk [vmem:[#allocation2 + $0x1f0] sm:$0xff] %vm26_vm3, %v1814_v24  ;;  %90 = vst.msk [vmem:[#allocation2 + $0x1f8] sm:$0xff] %vm26_vm3, %v1814_v24 }
  0x2d   :  { %1622 = vmatmul.mubr.msk.bf16.gmra.mxu0 %vm394_vm2, %v1694_v25  ;;  %1654 = vmatmul.mubr.msk.bf16.gmra.mxu1 %vm394_vm2, %v1695_v26  ;;  %v160_v25 = vld [vmem:[#allocation2 + $0x28] sm:$0xff] }
  0x2e   :  { %1625 = vmatprep.mubr.msk.bf16.mxu0 %vm394_vm2, %v1696_v27  ;;  %1657 = vmatprep.mubr.msk.bf16.mxu1 %vm394_vm2, %v1697_v28  ;;  %v192_v26 = vld [vmem:[#allocation2 + $0x128] sm:$0xff] }
  0x35   :  { %1626 = vmatmul.mubr.msk.bf16.gmra.mxu0 %vm394_vm2, %v1698_v29  ;;  %1658 = vmatmul.mubr.msk.bf16.gmra.mxu1 %vm394_vm2, %v1699_v30 }
  0x36   :  { %1629 = vmatprep.mubr.msk.bf16.mxu0 %vm394_vm2, %v1700_v31  ;;  %1661 = vmatprep.mubr.msk.bf16.mxu1 %vm394_vm2, %v1701_v32 }
  0x3d   :  { %1630 = vmatmul.mubr.msk.bf16.gmra.mxu0 %vm394_vm2, %v1702_v33  ;;  %1662 = vmatmul.mubr.msk.bf16.gmra.mxu1 %vm394_vm2, %v1703_v34 }
  0x3e   :  { %1633 = vmatprep.mubr.msk.bf16.mxu0 %vm394_vm2, %v1704_v35  ;;  %1665 = vmatprep.mubr.msk.bf16.mxu1 %vm394_vm2, %v1705_v36 }
  0x45   :  { %1634 = vmatmul.mubr.msk.bf16.gmra.mxu0 %vm394_vm2, %v1706_v37  ;;  %1666 = vmatmul.mubr.msk.bf16.gmra.mxu1 %vm394_vm2, %v1707_v38  ;;  %v165_v37 = vld [vmem:[#allocation2 + $0x50] sm:$0xff] }
  0x46   :  { %v197_v38 = vld [vmem:[#allocation2 + $0x150] sm:$0xff] }
  0xcd   :  { %v1607_v41 = vpop.f32.mrf.mxu0  ;;  %v1639_v42 = vpop.f32.mrf.mxu1 }
  0xce   :  { %v789_v45 = vadd.f32 %v1607_v41, %v157_v39  ;;  %v821_v46 = vadd.f32 %v1639_v42, %v189_v40 }
  0xcf   :  { %v532_v47 = vpop.f32.mrf.mxu0  ;;  %v660_v48 = vpop.f32.mrf.mxu1 }
  0xd0   :  { %854 = vst.msk [vmem:[#allocation2 + $0x10] sm:$0xff] %vm26_vm3, %v789_v45  ;;  %886 = vst.msk [vmem:[#allocation2 + $0x110] sm:$0xff] %vm26_vm3, %v821_v46  ;;  %v787_v51 = vadd.f32 %v532_v47, %v155_v43  ;;  %v819_v52 = vadd.f32 %v660_v48, %v187_v44 }
  0xd1   :  { %v1608_v53 = vpop.f32.mrf.mxu0  ;;  %v1640_v54 = vpop.f32.mrf.mxu1 }
  0xd2   :  { %852 = vst.msk [vmem:[#allocation2] sm:$0xff] %vm26_vm3, %v787_v51  ;;  %884 = vst.msk [vmem:[#allocation2 + $0x100] sm:$0xff] %vm26_vm3, %v819_v52  ;;  %v790_v57 = vadd.f32 %v1608_v53, %v158_v49  ;;  %v822_v58 = vadd.f32 %v1640_v54, %v190_v50  ;;  %v163_v49 = vld [vmem:[#allocation2 + $0x40] sm:$0xff] }
  0xd3   :  { %v535_v59 = vpop.f32.mrf.mxu0  ;;  %v663_v60 = vpop.f32.mrf.mxu1  ;;  %v195_v50 = vld [vmem:[#allocation2 + $0x140] sm:$0xff] }
  0xd4   :  { %855 = vst.msk [vmem:[#allocation2 + $0x18] sm:$0xff] %vm26_vm3, %v790_v57  ;;  %887 = vst.msk [vmem:[#allocation2 + $0x118] sm:$0xff] %vm26_vm3, %v822_v58  ;;  %v788_v63 = vadd.f32 %v535_v59, %v156_v55  ;;  %v820_v0 = vadd.f32 %v663_v60, %v188_v56 }
  0xd5   :  { %v1611_v1 = vpop.f32.mrf.mxu0  ;;  %v1643_v2 = vpop.f32.mrf.mxu1 }
  0xd6   :  { %853 = vst.msk [vmem:[#allocation2 + $0x8] sm:$0xff] %vm26_vm3, %v788_v63  ;;  %885 = vst.msk [vmem:[#allocation2 + $0x108] sm:$0xff] %vm26_vm3, %v820_v0  ;;  %v793_v5 = vadd.f32 %v1611_v1, %v161_v61  ;;  %v825_v6 = vadd.f32 %v1643_v2, %v193_v62  ;;  %v166_v61 = vld [vmem:[#allocation2 + $0x58] sm:$0xff]  ;;  %v164_v63 = vld [vmem:[#allocation2 + $0x48] sm:$0xff] }
  0xd7   :  { %v921_v7 = vld [vmem:[#allocation2 + $0x10] sm:$0xff]  ;;  %v548_v9 = vpop.f32.mrf.mxu0  ;;  %v676_v10 = vpop.f32.mrf.mxu1  ;;  %v198_v62 = vld [vmem:[#allocation2 + $0x158] sm:$0xff] }
  0xd8   :  { %v953_v8 = vld [vmem:[#allocation2 + $0x110] sm:$0xff]  ;;  %v985_v11 = vmax.f32 %v921_v7, 0.0  ;;  %858 = vst.msk [vmem:[#allocation2 + $0x30] sm:$0xff] %vm26_vm3, %v793_v5  ;;  %890 = vst.msk [vmem:[#allocation2 + $0x130] sm:$0xff] %vm26_vm3, %v825_v6  ;;  %v791_v13 = vadd.f32 %v548_v9, %v159_v3  ;;  %v823_v14 = vadd.f32 %v676_v10, %v191_v4  ;;  %v196_v6 = vld [vmem:[#allocation2 + $0x148] sm:$0xff] }
  0xd9   :  { %v1017_v12 = vmax.f32 %v953_v8, 0.0  ;;  %v919_v17 = vld [vmem:[#allocation2] sm:$0xff]  ;;  %v1612_v19 = vpop.f32.mrf.mxu0  ;;  %v1644_v20 = vpop.f32.mrf.mxu1 }
  0xda   :  { %v951_v18 = vld [vmem:[#allocation2 + $0x100] sm:$0xff]  ;;  %v1505_v21 = vpack.c.bf16 %v985_v11, %v985_v11  ;;  %v983_v23 = vmax.f32 %v919_v17, 0.0  ;;  %856 = vst.msk [vmem:[#allocation2 + $0x20] sm:$0xff] %vm26_vm3, %v791_v13  ;;  %888 = vst.msk [vmem:[#allocation2 + $0x120] sm:$0xff] %vm26_vm3, %v823_v14  ;;  %v794_v29 = vadd.f32 %v1612_v19, %v162_v15  ;;  %v826_v30 = vadd.f32 %v1644_v20, %v194_v16  ;;  %v169_v15 = vld [vmem:[#allocation2 + $0x70] sm:$0xff] }
  0xdb   :  { %v1537_v22 = vpack.c.bf16 %v1017_v12, %v1017_v12  ;;  %v1015_v24 = vmax.f32 %v951_v18, 0.0  ;;  %v922_v27 = vld [vmem:[#allocation2 + $0x18] sm:$0xff]  ;;  %v551_v31 = vpop.f32.mrf.mxu0  ;;  %v679_v32 = vpop.f32.mrf.mxu1  ;;  %v201_v16 = vld [vmem:[#allocation2 + $0x170] sm:$0xff] }
  0xdc   :  { %v954_v28 = vld [vmem:[#allocation2 + $0x118] sm:$0xff]  ;;  %1306 = vst.msk [vmem:[%s2331_s3 + $0x8] sm:$0xf] %vm1303_vm4, %v1505_v21  ;;  %v1503_v33 = vpack.c.bf16 %v983_v23, %v983_v23  ;;  %v986_v35 = vmax.f32 %v922_v27, 0.0  ;;  %v792_v41 = vadd.f32 %v551_v31, %v160_v25  ;;  %v824_v42 = vadd.f32 %v679_v32, %v192_v26  ;;  %v167_v27 = vld [vmem:[#allocation2 + $0x60] sm:$0xff] }
  0xdd   :  { %1338 = vst.msk [vmem:[%s2331_s3 + $0x88] sm:$0xf] %vm1303_vm4, %v1537_v22  ;;  %v1535_v34 = vpack.c.bf16 %v1015_v24, %v1015_v24  ;;  %v1018_v36 = vmax.f32 %v954_v28, 0.0  ;;  %v920_v39 = vld [vmem:[#allocation2 + $0x8] sm:$0xff]  ;;  %v1615_v43 = vpop.f32.mrf.mxu0  ;;  %v1647_v44 = vpop.f32.mrf.mxu1  ;;  %v199_v28 = vld [vmem:[#allocation2 + $0x160] sm:$0xff] }
  0xde   :  { %v952_v40 = vld [vmem:[#allocation2 + $0x108] sm:$0xff]  ;;  %859 = vst.msk [vmem:[#allocation2 + $0x38] sm:$0xff] %vm26_vm3, %v794_v29  ;;  %891 = vst.msk [vmem:[#allocation2 + $0x138] sm:$0xff] %vm26_vm3, %v826_v30  ;;  %v1506_v45 = vpack.c.bf16 %v986_v35, %v986_v35  ;;  %v984_v47 = vmax.f32 %v920_v39, 0.0  ;;  %v797_v53 = vadd.f32 %v1615_v43, %v165_v37  ;;  %v829_v54 = vadd.f32 %v1647_v44, %v197_v38  ;;  %v170_v39 = vld [vmem:[#allocation2 + $0x78] sm:$0xff] }
  0xdf   :  { %1304 = vst.msk [vmem:[%s2331_s3] sm:$0xf] %vm1303_vm4, %v1503_v33  ;;  %1336 = vst.msk [vmem:[%s2331_s3 + $0x80] sm:$0xf] %vm1303_vm4, %v1535_v34  ;;  %v1538_v46 = vpack.c.bf16 %v1018_v36, %v1018_v36  ;;  %v1016_v48 = vmax.f32 %v952_v40, 0.0  ;;  %v925_v51 = vld [vmem:[#allocation2 + $0x30] sm:$0xff]  ;;  %v564_v55 = vpop.f32.mrf.mxu0  ;;  %v692_v56 = vpop.f32.mrf.mxu1 }
  0xe0   :  { %v957_v52 = vld [vmem:[#allocation2 + $0x130] sm:$0xff]  ;;  %857 = vst.msk [vmem:[#allocation2 + $0x28] sm:$0xff] %vm26_vm3, %v792_v41  ;;  %889 = vst.msk [vmem:[#allocation2 + $0x128] sm:$0xff] %vm26_vm3, %v824_v42  ;;  %v1504_v57 = vpack.c.bf16 %v984_v47, %v984_v47  ;;  %v989_v59 = vmax.f32 %v925_v51, 0.0  ;;  %v795_v2 = vadd.f32 %v564_v55, %v163_v49  ;;  %v827_v3 = vadd.f32 %v692_v56, %v195_v50  ;;  %v202_v40 = vld [vmem:[#allocation2 + $0x178] sm:$0xff] }
  0xe1   :  { %1307 = vst.msk [vmem:[%s2331_s3 + $0xc] sm:$0xf] %vm1303_vm4, %v1506_v45  ;;  %1339 = vst.msk [vmem:[%s2331_s3 + $0x8c] sm:$0xf] %vm1303_vm4, %v1538_v46  ;;  %v1536_v58 = vpack.c.bf16 %v1016_v48, %v1016_v48  ;;  %v1021_v60 = vmax.f32 %v957_v52, 0.0  ;;  %v923_v0 = vld [vmem:[#allocation2 + $0x20] sm:$0xff]  ;;  %v1616_v4 = vpop.f32.mrf.mxu0  ;;  %v1648_v5 = vpop.f32.mrf.mxu1 }
  0xe2   :  { %v955_v1 = vld [vmem:[#allocation2 + $0x120] sm:$0xff]  ;;  %862 = vst.msk [vmem:[#allocation2 + $0x50] sm:$0xff] %vm26_vm3, %v797_v53  ;;  %894 = vst.msk [vmem:[#allocation2 + $0x150] sm:$0xff] %vm26_vm3, %v829_v54  ;;  %v1509_v7 = vpack.c.bf16 %v989_v59, %v989_v59  ;;  %v987_v9 = vmax.f32 %v923_v0, 0.0  ;;  %v798_v11 = vadd.f32 %v1616_v4, %v166_v61  ;;  %v830_v12 = vadd.f32 %v1648_v5, %v198_v62  ;;  %v168_v51 = vld [vmem:[#allocation2 + $0x68] sm:$0xff] }
  0xe3   :  { %1305 = vst.msk [vmem:[%s2331_s3 + $0x4] sm:$0xf] %vm1303_vm4, %v1504_v57  ;;  %1337 = vst.msk [vmem:[%s2331_s3 + $0x84] sm:$0xf] %vm1303_vm4, %v1536_v58  ;;  %v1541_v8 = vpack.c.bf16 %v1021_v60, %v1021_v60  ;;  %v1019_v10 = vmax.f32 %v955_v1, 0.0  ;;  %v567_v13 = vpop.f32.mrf.mxu0  ;;  %v695_v14 = vpop.f32.mrf.mxu1  ;;  %v200_v52 = vld [vmem:[#allocation2 + $0x168] sm:$0xff] }
  0xe4   :  { %860 = vst.msk [vmem:[#allocation2 + $0x40] sm:$0xff] %vm26_vm3, %v795_v2  ;;  %892 = vst.msk [vmem:[#allocation2 + $0x140] sm:$0xff] %vm26_vm3, %v827_v3  ;;  %v1507_v17 = vpack.c.bf16 %v987_v9, %v987_v9  ;;  %v796_v21 = vadd.f32 %v567_v13, %v164_v63  ;;  %v828_v22 = vadd.f32 %v695_v14, %v196_v6  ;;  %v173_v63 = vld [vmem:[#allocation2 + $0x90] sm:$0xff] }
  0xe5   :  { %1310 = vst.msk [vmem:[%s2331_s3 + $0x18] sm:$0xf] %vm1303_vm4, %v1509_v7  ;;  %1342 = vst.msk [vmem:[%s2331_s3 + $0x98] sm:$0xf] %vm1303_vm4, %v1541_v8  ;;  %v1539_v18 = vpack.c.bf16 %v1019_v10, %v1019_v10  ;;  %v926_v19 = vld [vmem:[#allocation2 + $0x38] sm:$0xff]  ;;  %v1619_v25 = vpop.f32.mrf.mxu0  ;;  %v1651_v26 = vpop.f32.mrf.mxu1  ;;  %v205_v0 = vld [vmem:[#allocation2 + $0x190] sm:$0xff] }
  0xe6   :  { %v958_v20 = vld [vmem:[#allocation2 + $0x138] sm:$0xff]  ;;  %v990_v23 = vmax.f32 %v926_v19, 0.0  ;;  %863 = vst.msk [vmem:[#allocation2 + $0x58] sm:$0xff] %vm26_vm3, %v798_v11  ;;  %895 = vst.msk [vmem:[#allocation2 + $0x158] sm:$0xff] %vm26_vm3, %v830_v12  ;;  %v801_v31 = vadd.f32 %v1619_v25, %v169_v15  ;;  %v833_v32 = vadd.f32 %v1651_v26, %v201_v16 }
  0xe7   :  { %v1022_v24 = vmax.f32 %v958_v20, 0.0  ;;  %1308 = vst.msk [vmem:[%s2331_s3 + $0x10] sm:$0xf] %vm1303_vm4, %v1507_v17  ;;  %1340 = vst.msk [vmem:[%s2331_s3 + $0x90] sm:$0xf] %vm1303_vm4, %v1539_v18  ;;  %v924_v29 = vld [vmem:[#allocation2 + $0x28] sm:$0xff]  ;;  %v580_v37 = vpop.f32.mrf.mxu0  ;;  %v708_v38 = vpop.f32.mrf.mxu1 }
  0xe8   :  { %v956_v30 = vld [vmem:[#allocation2 + $0x128] sm:$0xff]  ;;  %861 = vst.msk [vmem:[#allocation2 + $0x48] sm:$0xff] %vm26_vm3, %v796_v21  ;;  %893 = vst.msk [vmem:[#allocation2 + $0x148] sm:$0xff] %vm26_vm3, %v828_v22  ;;  %v1510_v33 = vpack.c.bf16 %v990_v23, %v990_v23  ;;  %v988_v35 = vmax.f32 %v924_v29, 0.0  ;;  %v799_v43 = vadd.f32 %v580_v37, %v167_v27  ;;  %v831_v44 = vadd.f32 %v708_v38, %v199_v28  ;;  %v171_v17 = vld [vmem:[#allocation2 + $0x80] sm:$0xff] }
  0xe9   :  { %v1542_v34 = vpack.c.bf16 %v1022_v24, %v1022_v24  ;;  %v1020_v36 = vmax.f32 %v956_v30, 0.0  ;;  %v929_v41 = vld [vmem:[#allocation2 + $0x50] sm:$0xff]  ;;  %866 = vst.msk [vmem:[#allocation2 + $0x70] sm:$0xff] %vm26_vm3, %v801_v31  ;;  %898 = vst.msk [vmem:[#allocation2 + $0x170] sm:$0xff] %vm26_vm3, %v833_v32  ;;  %v1620_v49 = vpop.f32.mrf.mxu0  ;;  %v1652_v50 = vpop.f32.mrf.mxu1  ;;  %v203_v18 = vld [vmem:[#allocation2 + $0x180] sm:$0xff] }
  0xea   :  { %v961_v42 = vld [vmem:[#allocation2 + $0x150] sm:$0xff]  ;;  %1311 = vst.msk [vmem:[%s2331_s3 + $0x1c] sm:$0xf] %vm1303_vm4, %v1510_v33  ;;  %v1508_v45 = vpack.c.bf16 %v988_v35, %v988_v35  ;;  %v993_v47 = vmax.f32 %v929_v41, 0.0  ;;  %v802_v55 = vadd.f32 %v1620_v49, %v170_v39  ;;  %v834_v56 = vadd.f32 %v1652_v50, %v202_v40  ;;  %v174_v29 = vld [vmem:[#allocation2 + $0x98] sm:$0xff]  ;;  %v172_v41 = vld [vmem:[#allocation2 + $0x88] sm:$0xff] }
  0xeb   :  { %1343 = vst.msk [vmem:[%s2331_s3 + $0x9c] sm:$0xf] %vm1303_vm4, %v1542_v34  ;;  %v1540_v46 = vpack.c.bf16 %v1020_v36, %v1020_v36  ;;  %v1025_v48 = vmax.f32 %v961_v42, 0.0  ;;  %v927_v53 = vld [vmem:[#allocation2 + $0x40] sm:$0xff]  ;;  %v583_v61 = vpop.f32.mrf.mxu0  ;;  %v711_v62 = vpop.f32.mrf.mxu1  ;;  %v206_v30 = vld [vmem:[#allocation2 + $0x198] sm:$0xff]  ;;  %v204_v42 = vld [vmem:[#allocation2 + $0x188] sm:$0xff] }
  0xec   :  { %v959_v54 = vld [vmem:[#allocation2 + $0x140] sm:$0xff]  ;;  %864 = vst.msk [vmem:[#allocation2 + $0x60] sm:$0xff] %vm26_vm3, %v799_v43  ;;  %896 = vst.msk [vmem:[#allocation2 + $0x160] sm:$0xff] %vm26_vm3, %v831_v44  ;;  %v1513_v57 = vpack.c.bf16 %v993_v47, %v993_v47  ;;  %v991_v59 = vmax.f32 %v927_v53, 0.0  ;;  %v800_v3 = vadd.f32 %v583_v61, %v168_v51  ;;  %v832_v4 = vadd.f32 %v711_v62, %v200_v52  ;;  %v177_v53 = vld [vmem:[#allocation2 + $0xb0] sm:$0xff] }
  0xed   :  { %1309 = vst.msk [vmem:[%s2331_s3 + $0x14] sm:$0xf] %vm1303_vm4, %v1508_v45  ;;  %1341 = vst.msk [vmem:[%s2331_s3 + $0x94] sm:$0xf] %vm1303_vm4, %v1540_v46  ;;  %v1545_v58 = vpack.c.bf16 %v1025_v48, %v1025_v48  ;;  %v1023_v60 = vmax.f32 %v959_v54, 0.0  ;;  %v930_v1 = vld [vmem:[#allocation2 + $0x58] sm:$0xff]  ;;  %v1623_v11 = vpop.f32.mrf.mxu0  ;;  %v1655_v12 = vpop.f32.mrf.mxu1 }
  0xee   :  { %v962_v2 = vld [vmem:[#allocation2 + $0x158] sm:$0xff]  ;;  %867 = vst.msk [vmem:[#allocation2 + $0x78] sm:$0xff] %vm26_vm3, %v802_v55  ;;  %899 = vst.msk [vmem:[#allocation2 + $0x178] sm:$0xff] %vm26_vm3, %v834_v56  ;;  %v1511_v5 = vpack.c.bf16 %v991_v59, %v991_v59  ;;  %v994_v7 = vmax.f32 %v930_v1, 0.0  ;;  %v805_v15 = vadd.f32 %v1623_v11, %v173_v63  ;;  %v837_v16 = vadd.f32 %v1655_v12, %v205_v0  ;;  %v209_v54 = vld [vmem:[#allocation2 + $0x1b0] sm:$0xff] }
  0xef   :  { %1314 = vst.msk [vmem:[%s2331_s3 + $0x28] sm:$0xf] %vm1303_vm4, %v1513_v57  ;;  %1346 = vst.msk [vmem:[%s2331_s3 + $0xa8] sm:$0xf] %vm1303_vm4, %v1545_v58  ;;  %v1543_v6 = vpack.c.bf16 %v1023_v60, %v1023_v60  ;;  %v1026_v8 = vmax.f32 %v962_v2, 0.0  ;;  %v928_v9 = vld [vmem:[#allocation2 + $0x48] sm:$0xff]  ;;  %v596_v23 = vpop.f32.mrf.mxu0  ;;  %v724_v24 = vpop.f32.mrf.mxu1 }
  0xf0   :  { %v960_v10 = vld [vmem:[#allocation2 + $0x148] sm:$0xff]  ;;  %v992_v13 = vmax.f32 %v928_v9, 0.0  ;;  %865 = vst.msk [vmem:[#allocation2 + $0x68] sm:$0xff] %vm26_vm3, %v800_v3  ;;  %897 = vst.msk [vmem:[#allocation2 + $0x168] sm:$0xff] %vm26_vm3, %v832_v4  ;;  %v1514_v19 = vpack.c.bf16 %v994_v7, %v994_v7  ;;  %v933_v21 = vld [vmem:[#allocation2 + $0x70] sm:$0xff]  ;;  %v803_v33 = vadd.f32 %v596_v23, %v171_v17  ;;  %v835_v34 = vadd.f32 %v724_v24, %v203_v18 }
  0xf1   :  { %v1024_v14 = vmax.f32 %v960_v10, 0.0  ;;  %1312 = vst.msk [vmem:[%s2331_s3 + $0x20] sm:$0xf] %vm1303_vm4, %v1511_v5  ;;  %1344 = vst.msk [vmem:[%s2331_s3 + $0xa0] sm:$0xf] %vm1303_vm4, %v1543_v6  ;;  %v1546_v20 = vpack.c.bf16 %v1026_v8, %v1026_v8  ;;  %v965_v22 = vld [vmem:[#allocation2 + $0x170] sm:$0xff]  ;;  %v1624_v35 = vpop.f32.mrf.mxu0  ;;  %v1656_v36 = vpop.f32.mrf.mxu1 }
  0xf2   :  { %v1512_v25 = vpack.c.bf16 %v992_v13, %v992_v13  ;;  %v997_v27 = vmax.f32 %v933_v21, 0.0  ;;  %v1029_v28 = vmax.f32 %v965_v22, 0.0  ;;  %870 = vst.msk [vmem:[#allocation2 + $0x90] sm:$0xff] %vm26_vm3, %v805_v15  ;;  %902 = vst.msk [vmem:[#allocation2 + $0x190] sm:$0xff] %vm26_vm3, %v837_v16  ;;  %v806_v45 = vadd.f32 %v1624_v35, %v174_v29  ;;  %v175_v1 = vld [vmem:[#allocation2 + $0xa0] sm:$0xff]  ;;  %v178_v3 = vld [vmem:[#allocation2 + $0xb8] sm:$0xff] }
  0xf3   :  { %v1544_v26 = vpack.c.bf16 %v1024_v14, %v1024_v14  ;;  %1315 = vst.msk [vmem:[%s2331_s3 + $0x2c] sm:$0xf] %vm1303_vm4, %v1514_v19  ;;  %1347 = vst.msk [vmem:[%s2331_s3 + $0xac] sm:$0xf] %vm1303_vm4, %v1546_v20  ;;  %v931_v31 = vld [vmem:[#allocation2 + $0x60] sm:$0xff]  ;;  %v838_v46 = vadd.f32 %v1656_v36, %v206_v30  ;;  %v599_v47 = vpop.f32.mrf.mxu0  ;;  %v727_v48 = vpop.f32.mrf.mxu1  ;;  %v210_v10 = vld [vmem:[#allocation2 + $0x1b8] sm:$0xff] }
  0xf4   :  { %v963_v32 = vld [vmem:[#allocation2 + $0x160] sm:$0xff]  ;;  %1313 = vst.msk [vmem:[%s2331_s3 + $0x24] sm:$0xf] %vm1303_vm4, %v1512_v25  ;;  %v1517_v37 = vpack.c.bf16 %v997_v27, %v997_v27  ;;  %v1549_v38 = vpack.c.bf16 %v1029_v28, %v1029_v28  ;;  %v995_v39 = vmax.f32 %v931_v31, 0.0  ;;  %v804_v57 = vadd.f32 %v599_v47, %v172_v41  ;;  %v176_v19 = vld [vmem:[#allocation2 + $0xa8] sm:$0xff]  ;;  %v181_v31 = vld [vmem:[#allocation2 + $0xd0] sm:$0xff] }
  0xf5   :  { %1345 = vst.msk [vmem:[%s2331_s3 + $0xa4] sm:$0xf] %vm1303_vm4, %v1544_v26  ;;  %v1027_v40 = vmax.f32 %v963_v32, 0.0  ;;  %v934_v43 = vld [vmem:[#allocation2 + $0x78] sm:$0xff]  ;;  %v836_v58 = vadd.f32 %v727_v48, %v204_v42  ;;  %v1627_v59 = vpop.f32.mrf.mxu0  ;;  %v1659_v60 = vpop.f32.mrf.mxu1  ;;  %v207_v2 = vld [vmem:[#allocation2 + $0x1a0] sm:$0xff]  ;;  %v208_v20 = vld [vmem:[#allocation2 + $0x1a8] sm:$0xff] }
  0xf6   :  { %v966_v44 = vld [vmem:[#allocation2 + $0x178] sm:$0xff]  ;;  %868 = vst.msk [vmem:[#allocation2 + $0x80] sm:$0xff] %vm26_vm3, %v803_v33  ;;  %900 = vst.msk [vmem:[#allocation2 + $0x180] sm:$0xff] %vm26_vm3, %v835_v34  ;;  %v1515_v49 = vpack.c.bf16 %v995_v39, %v995_v39  ;;  %v998_v51 = vmax.f32 %v934_v43, 0.0  ;;  %v809_v6 = vadd.f32 %v1627_v59, %v177_v53  ;;  %v841_v7 = vadd.f32 %v1659_v60, %v209_v54  ;;  %v213_v32 = vld [vmem:[#allocation2 + $0x1d0] sm:$0xff] }
  0xf7   :  { %1318 = vst.msk [vmem:[%s2331_s3 + $0x38] sm:$0xf] %vm1303_vm4, %v1517_v37  ;;  %1350 = vst.msk [vmem:[%s2331_s3 + $0xb8] sm:$0xf] %vm1303_vm4, %v1549_v38  ;;  %v1547_v50 = vpack.c.bf16 %v1027_v40, %v1027_v40  ;;  %v1030_v52 = vmax.f32 %v966_v44, 0.0  ;;  %v932_v55 = vld [vmem:[#allocation2 + $0x68] sm:$0xff]  ;;  %v612_v8 = vpop.f32.mrf.mxu0  ;;  %v740_v9 = vpop.f32.mrf.mxu1 }
  0xf8   :  { %v964_v56 = vld [vmem:[#allocation2 + $0x168] sm:$0xff]  ;;  %871 = vst.msk [vmem:[#allocation2 + $0x98] sm:$0xff] %vm26_vm3, %v806_v45  ;;  %903 = vst.msk [vmem:[#allocation2 + $0x198] sm:$0xff] %vm26_vm3, %v838_v46  ;;  %v1518_v61 = vpack.c.bf16 %v998_v51, %v998_v51  ;;  %v996_v63 = vmax.f32 %v932_v55, 0.0  ;;  %v807_v15 = vadd.f32 %v612_v8, %v175_v1  ;;  %v839_v16 = vadd.f32 %v740_v9, %v207_v2  ;;  %v179_v43 = vld [vmem:[#allocation2 + $0xc0] sm:$0xff] }
  0xf9   :  { %1316 = vst.msk [vmem:[%s2331_s3 + $0x30] sm:$0xf] %vm1303_vm4, %v1515_v49  ;;  %1348 = vst.msk [vmem:[%s2331_s3 + $0xb0] sm:$0xf] %vm1303_vm4, %v1547_v50  ;;  %v1550_v62 = vpack.c.bf16 %v1030_v52, %v1030_v52  ;;  %v1028_v0 = vmax.f32 %v964_v56, 0.0  ;;  %v937_v4 = vld [vmem:[#allocation2 + $0x90] sm:$0xff]  ;;  %v1628_v17 = vpop.f32.mrf.mxu0  ;;  %v1660_v18 = vpop.f32.mrf.mxu1 }
  0xfa   :  { %v969_v5 = vld [vmem:[#allocation2 + $0x190] sm:$0xff]  ;;  %869 = vst.msk [vmem:[#allocation2 + $0x88] sm:$0xff] %vm26_vm3, %v804_v57  ;;  %901 = vst.msk [vmem:[#allocation2 + $0x188] sm:$0xff] %vm26_vm3, %v836_v58  ;;  %v1516_v11 = vpack.c.bf16 %v996_v63, %v996_v63  ;;  %v1001_v13 = vmax.f32 %v937_v4, 0.0  ;;  %v810_v25 = vadd.f32 %v1628_v17, %v178_v3  ;;  %v842_v26 = vadd.f32 %v1660_v18, %v210_v10  ;;  %v211_v44 = vld [vmem:[#allocation2 + $0x1c0] sm:$0xff] }
  0xfb   :  { %1319 = vst.msk [vmem:[%s2331_s3 + $0x3c] sm:$0xf] %vm1303_vm4, %v1518_v61  ;;  %1351 = vst.msk [vmem:[%s2331_s3 + $0xbc] sm:$0xf] %vm1303_vm4, %v1550_v62  ;;  %v1548_v12 = vpack.c.bf16 %v1028_v0, %v1028_v0  ;;  %v1033_v14 = vmax.f32 %v969_v5, 0.0  ;;  %v615_v29 = vpop.f32.mrf.mxu0  ;;  %v743_v30 = vpop.f32.mrf.mxu1  ;;  %v182_v55 = vld [vmem:[#allocation2 + $0xd8] sm:$0xff] }
  0xfc   :  { %874 = vst.msk [vmem:[#allocation2 + $0xb0] sm:$0xff] %vm26_vm3, %v809_v6  ;;  %906 = vst.msk [vmem:[#allocation2 + $0x1b0] sm:$0xff] %vm26_vm3, %v841_v7  ;;  %v1521_v21 = vpack.c.bf16 %v1001_v13, %v1001_v13  ;;  %v808_v35 = vadd.f32 %v615_v29, %v176_v19  ;;  %v840_v36 = vadd.f32 %v743_v30, %v208_v20  ;;  %v214_v56 = vld [vmem:[#allocation2 + $0x1d8] sm:$0xff]  ;;  %v180_v3 = vld [vmem:[#allocation2 + $0xc8] sm:$0xff] }
  0xfd   :  { %1317 = vst.msk [vmem:[%s2331_s3 + $0x34] sm:$0xf] %vm1303_vm4, %v1516_v11  ;;  %1349 = vst.msk [vmem:[%s2331_s3 + $0xb4] sm:$0xf] %vm1303_vm4, %v1548_v12  ;;  %v1553_v22 = vpack.c.bf16 %v1033_v14, %v1033_v14  ;;  %v935_v23 = vld [vmem:[#allocation2 + $0x80] sm:$0xff]  ;;  %v1631_v41 = vpop.f32.mrf.mxu0  ;;  %v1663_v42 = vpop.f32.mrf.mxu1  ;;  %v212_v4 = vld [vmem:[#allocation2 + $0x1c8] sm:$0xff] }
  0xfe   :  { %v967_v24 = vld [vmem:[#allocation2 + $0x180] sm:$0xff]  ;;  %v999_v27 = vmax.f32 %v935_v23, 0.0  ;;  %872 = vst.msk [vmem:[#allocation2 + $0xa0] sm:$0xff] %vm26_vm3, %v807_v15  ;;  %904 = vst.msk [vmem:[#allocation2 + $0x1a0] sm:$0xff] %vm26_vm3, %v839_v16  ;;  %v813_v47 = vadd.f32 %v1631_v41, %v181_v31  ;;  %v845_v48 = vadd.f32 %v1663_v42, %v213_v32 }
  0xff   :  { %v1031_v28 = vmax.f32 %v967_v24, 0.0  ;;  %1322 = vst.msk [vmem:[%s2331_s3 + $0x48] sm:$0xf] %vm1303_vm4, %v1521_v21  ;;  %1354 = vst.msk [vmem:[%s2331_s3 + $0xc8] sm:$0xf] %vm1303_vm4, %v1553_v22  ;;  %v938_v33 = vld [vmem:[#allocation2 + $0x98] sm:$0xff]  ;;  %v628_v53 = vpop.f32.mrf.mxu0  ;;  %v756_v54 = vpop.f32.mrf.mxu1 }
 0x100   :  { %v970_v34 = vld [vmem:[#allocation2 + $0x198] sm:$0xff]  ;;  %875 = vst.msk [vmem:[#allocation2 + $0xb8] sm:$0xff] %vm26_vm3, %v810_v25  ;;  %907 = vst.msk [vmem:[#allocation2 + $0x1b8] sm:$0xff] %vm26_vm3, %v842_v26  ;;  %v1519_v37 = vpack.c.bf16 %v999_v27, %v999_v27  ;;  %v1002_v39 = vmax.f32 %v938_v33, 0.0  ;;  %v811_v59 = vadd.f32 %v628_v53, %v179_v43  ;;  %v843_v60 = vadd.f32 %v756_v54, %v211_v44  ;;  %v185_v21 = vld [vmem:[#allocation2 + $0xf0] sm:$0xff] }
 0x101   :  { %v1551_v38 = vpack.c.bf16 %v1031_v28, %v1031_v28  ;;  %v1034_v40 = vmax.f32 %v970_v34, 0.0  ;;  %v936_v45 = vld [vmem:[#allocation2 + $0x88] sm:$0xff]  ;;  %873 = vst.msk [vmem:[#allocation2 + $0xa8] sm:$0xff] %vm26_vm3, %v808_v35  ;;  %905 = vst.msk [vmem:[#allocation2 + $0x1a8] sm:$0xff] %vm26_vm3, %v840_v36  ;;  %v1632_v1 = vpop.f32.mrf.mxu0  ;;  %v1664_v2 = vpop.f32.mrf.mxu1  ;;  %v217_v22 = vld [vmem:[#allocation2 + $0x1f0] sm:$0xff] }
 0x102   :  { %v968_v46 = vld [vmem:[#allocation2 + $0x188] sm:$0xff]  ;;  %1320 = vst.msk [vmem:[%s2331_s3 + $0x40] sm:$0xf] %vm1303_vm4, %v1519_v37  ;;  %v1522_v49 = vpack.c.bf16 %v1002_v39, %v1002_v39  ;;  %v1000_v51 = vmax.f32 %v936_v45, 0.0  ;;  %v814_v7 = vadd.f32 %v1632_v1, %v182_v55  ;;  %v846_v8 = vadd.f32 %v1664_v2, %v214_v56  ;;  %v183_v33 = vld [vmem:[#allocation2 + $0xe0] sm:$0xff]  ;;  %v186_v45 = vld [vmem:[#allocation2 + $0xf8] sm:$0xff] }
 0x103   :  { %1352 = vst.msk [vmem:[%s2331_s3 + $0xc0] sm:$0xf] %vm1303_vm4, %v1551_v38  ;;  %v1554_v50 = vpack.c.bf16 %v1034_v40, %v1034_v40  ;;  %v1032_v52 = vmax.f32 %v968_v46, 0.0  ;;  %v941_v57 = vld [vmem:[#allocation2 + $0xb0] sm:$0xff]  ;;  %v631_v15 = vpop.f32.mrf.mxu0  ;;  %v759_v16 = vpop.f32.mrf.mxu1  ;;  %v215_v34 = vld [vmem:[#allocation2 + $0x1e0] sm:$0xff]  ;;  %v218_v46 = vld [vmem:[#allocation2 + $0x1f8] sm:$0xff] }
 0x104   :  { %v973_v58 = vld [vmem:[#allocation2 + $0x1b0] sm:$0xff]  ;;  %878 = vst.msk [vmem:[#allocation2 + $0xd0] sm:$0xff] %vm26_vm3, %v813_v47  ;;  %910 = vst.msk [vmem:[#allocation2 + $0x1d0] sm:$0xff] %vm26_vm3, %v845_v48  ;;  %v1520_v61 = vpack.c.bf16 %v1000_v51, %v1000_v51  ;;  %v1005_v63 = vmax.f32 %v941_v57, 0.0  ;;  %v812_v19 = vadd.f32 %v631_v15, %v180_v3  ;;  %v844_v20 = vadd.f32 %v759_v16, %v212_v4  ;;  %v184_v57 = vld [vmem:[#allocation2 + $0xe8] sm:$0xff] }
 0x105   :  { %1323 = vst.msk [vmem:[%s2331_s3 + $0x4c] sm:$0xf] %vm1303_vm4, %v1522_v49  ;;  %1355 = vst.msk [vmem:[%s2331_s3 + $0xcc] sm:$0xf] %vm1303_vm4, %v1554_v50  ;;  %v1552_v62 = vpack.c.bf16 %v1032_v52, %v1032_v52  ;;  %v1037_v0 = vmax.f32 %v973_v58, 0.0  ;;  %v939_v5 = vld [vmem:[#allocation2 + $0xa0] sm:$0xff]  ;;  %v1635_v27 = vpop.f32.mrf.mxu0  ;;  %v1667_v28 = vpop.f32.mrf.mxu1 }
 0x106   :  { %v971_v6 = vld [vmem:[#allocation2 + $0x1a0] sm:$0xff]  ;;  %876 = vst.msk [vmem:[#allocation2 + $0xc0] sm:$0xff] %vm26_vm3, %v811_v59  ;;  %908 = vst.msk [vmem:[#allocation2 + $0x1c0] sm:$0xff] %vm26_vm3, %v843_v60  ;;  %v1525_v9 = vpack.c.bf16 %v1005_v63, %v1005_v63  ;;  %v1003_v11 = vmax.f32 %v939_v5, 0.0  ;;  %v817_v37 = vadd.f32 %v1635_v27, %v185_v21  ;;  %v849_v38 = vadd.f32 %v1667_v28, %v217_v22  ;;  %v216_v58 = vld [vmem:[#allocation2 + $0x1e8] sm:$0xff] }
 0x107   :  { %1321 = vst.msk [vmem:[%s2331_s3 + $0x44] sm:$0xf] %vm1303_vm4, %v1520_v61  ;;  %1353 = vst.msk [vmem:[%s2331_s3 + $0xc4] sm:$0xf] %vm1303_vm4, %v1552_v62  ;;  %v1557_v10 = vpack.c.bf16 %v1037_v0, %v1037_v0  ;;  %v1035_v12 = vmax.f32 %v971_v6, 0.0  ;;  %v942_v13 = vld [vmem:[#allocation2 + $0xb8] sm:$0xff]  ;;  %v644_v39 = vpop.f32.mrf.mxu0  ;;  %v772_v40 = vpop.f32.mrf.mxu1 }
 0x108   :  { %v974_v14 = vld [vmem:[#allocation2 + $0x1b8] sm:$0xff]  ;;  %v1006_v17 = vmax.f32 %v942_v13, 0.0  ;;  %879 = vst.msk [vmem:[#allocation2 + $0xd8] sm:$0xff] %vm26_vm3, %v814_v7  ;;  %911 = vst.msk [vmem:[#allocation2 + $0x1d8] sm:$0xff] %vm26_vm3, %v846_v8  ;;  %v1523_v23 = vpack.c.bf16 %v1003_v11, %v1003_v11  ;;  %v940_v25 = vld [vmem:[#allocation2 + $0xa8] sm:$0xff]  ;;  %v815_v49 = vadd.f32 %v644_v39, %v183_v33  ;;  %v847_v50 = vadd.f32 %v772_v40, %v215_v34 }
 0x109   :  { %v1038_v18 = vmax.f32 %v974_v14, 0.0  ;;  %1326 = vst.msk [vmem:[%s2331_s3 + $0x58] sm:$0xf] %vm1303_vm4, %v1525_v9  ;;  %1358 = vst.msk [vmem:[%s2331_s3 + $0xd8] sm:$0xf] %vm1303_vm4, %v1557_v10  ;;  %v1555_v24 = vpack.c.bf16 %v1035_v12, %v1035_v12  ;;  %v972_v26 = vld [vmem:[#allocation2 + $0x1a8] sm:$0xff]  ;;  %v1636_v51 = vpop.f32.mrf.mxu0  ;;  %v1668_v52 = vpop.f32.mrf.mxu1 }
 0x10a   :  { %v1526_v29 = vpack.c.bf16 %v1006_v17, %v1006_v17  ;;  %v1004_v31 = vmax.f32 %v940_v25, 0.0  ;;  %v1036_v32 = vmax.f32 %v972_v26, 0.0  ;;  %877 = vst.msk [vmem:[#allocation2 + $0xc8] sm:$0xff] %vm26_vm3, %v812_v19  ;;  %909 = vst.msk [vmem:[#allocation2 + $0x1c8] sm:$0xff] %vm26_vm3, %v844_v20  ;;  %v818_v61 = vadd.f32 %v1636_v51, %v186_v45 }
 0x10b   :  { %v1558_v30 = vpack.c.bf16 %v1038_v18, %v1038_v18  ;;  %1324 = vst.msk [vmem:[%s2331_s3 + $0x50] sm:$0xf] %vm1303_vm4, %v1523_v23  ;;  %1356 = vst.msk [vmem:[%s2331_s3 + $0xd0] sm:$0xf] %vm1303_vm4, %v1555_v24  ;;  %v945_v35 = vld [vmem:[#allocation2 + $0xd0] sm:$0xff]  ;;  %v850_v62 = vadd.f32 %v1668_v52, %v218_v46  ;;  %v647_v63 = vpop.f32.mrf.mxu0  ;;  %v775_v0 = vpop.f32.mrf.mxu1 }
 0x10c   :  { %v977_v36 = vld [vmem:[#allocation2 + $0x1d0] sm:$0xff]  ;;  %1327 = vst.msk [vmem:[%s2331_s3 + $0x5c] sm:$0xf] %vm1303_vm4, %v1526_v29  ;;  %v1524_v41 = vpack.c.bf16 %v1004_v31, %v1004_v31  ;;  %v1556_v42 = vpack.c.bf16 %v1036_v32, %v1036_v32  ;;  %v1009_v43 = vmax.f32 %v945_v35, 0.0  ;;  %v816_v7 = vadd.f32 %v647_v63, %v184_v57 }
 0x10d   :  { %1359 = vst.msk [vmem:[%s2331_s3 + $0xdc] sm:$0xf] %vm1303_vm4, %v1558_v30  ;;  %v1041_v44 = vmax.f32 %v977_v36, 0.0  ;;  %v943_v47 = vld [vmem:[#allocation2 + $0xc0] sm:$0xff]  ;;  %v848_v8 = vadd.f32 %v775_v0, %v216_v58 }
 0x10e   :  { %v975_v48 = vld [vmem:[#allocation2 + $0x1c0] sm:$0xff]  ;;  %882 = vst.msk [vmem:[#allocation2 + $0xf0] sm:$0xff] %vm26_vm3, %v817_v37  ;;  %914 = vst.msk [vmem:[#allocation2 + $0x1f0] sm:$0xff] %vm26_vm3, %v849_v38  ;;  %v1529_v53 = vpack.c.bf16 %v1009_v43, %v1009_v43  ;;  %v1007_v55 = vmax.f32 %v943_v47, 0.0 }
 0x10f   :  { %1325 = vst.msk [vmem:[%s2331_s3 + $0x54] sm:$0xf] %vm1303_vm4, %v1524_v41  ;;  %1357 = vst.msk [vmem:[%s2331_s3 + $0xd4] sm:$0xf] %vm1303_vm4, %v1556_v42  ;;  %v1561_v54 = vpack.c.bf16 %v1041_v44, %v1041_v44  ;;  %v1039_v56 = vmax.f32 %v975_v48, 0.0  ;;  %v946_v59 = vld [vmem:[#allocation2 + $0xd8] sm:$0xff] }
 0x110   :  { %v978_v60 = vld [vmem:[#allocation2 + $0x1d8] sm:$0xff]  ;;  %880 = vst.msk [vmem:[#allocation2 + $0xe0] sm:$0xff] %vm26_vm3, %v815_v49  ;;  %912 = vst.msk [vmem:[#allocation2 + $0x1e0] sm:$0xff] %vm26_vm3, %v847_v50  ;;  %v1527_v1 = vpack.c.bf16 %v1007_v55, %v1007_v55  ;;  %v1010_v3 = vmax.f32 %v946_v59, 0.0 }
 0x111   :  { %1330 = vst.msk [vmem:[%s2331_s3 + $0x68] sm:$0xf] %vm1303_vm4, %v1529_v53  ;;  %1362 = vst.msk [vmem:[%s2331_s3 + $0xe8] sm:$0xf] %vm1303_vm4, %v1561_v54  ;;  %v1559_v2 = vpack.c.bf16 %v1039_v56, %v1039_v56  ;;  %v1042_v4 = vmax.f32 %v978_v60, 0.0  ;;  %v944_v5 = vld [vmem:[#allocation2 + $0xc8] sm:$0xff] }
 0x112   :  { %v976_v6 = vld [vmem:[#allocation2 + $0x1c8] sm:$0xff]  ;;  %883 = vst.msk [vmem:[#allocation2 + $0xf8] sm:$0xff] %vm26_vm3, %v818_v61  ;;  %915 = vst.msk [vmem:[#allocation2 + $0x1f8] sm:$0xff] %vm26_vm3, %v850_v62  ;;  %v1530_v9 = vpack.c.bf16 %v1010_v3, %v1010_v3  ;;  %v1008_v11 = vmax.f32 %v944_v5, 0.0 }
 0x113   :  { %1328 = vst.msk [vmem:[%s2331_s3 + $0x60] sm:$0xf] %vm1303_vm4, %v1527_v1  ;;  %1360 = vst.msk [vmem:[%s2331_s3 + $0xe0] sm:$0xf] %vm1303_vm4, %v1559_v2  ;;  %v1562_v10 = vpack.c.bf16 %v1042_v4, %v1042_v4  ;;  %v1040_v12 = vmax.f32 %v976_v6, 0.0 }
 0x114   :  { %881 = vst.msk [vmem:[#allocation2 + $0xe8] sm:$0xff] %vm26_vm3, %v816_v7  ;;  %913 = vst.msk [vmem:[#allocation2 + $0x1e8] sm:$0xff] %vm26_vm3, %v848_v8  ;;  %v1528_v13 = vpack.c.bf16 %v1008_v11, %v1008_v11 }
 0x115   :  { %1331 = vst.msk [vmem:[%s2331_s3 + $0x6c] sm:$0xf] %vm1303_vm4, %v1530_v9  ;;  %1363 = vst.msk [vmem:[%s2331_s3 + $0xec] sm:$0xf] %vm1303_vm4, %v1562_v10  ;;  %v1560_v14 = vpack.c.bf16 %v1040_v12, %v1040_v12  ;;  %v949_v15 = vld [vmem:[#allocation2 + $0xf0] sm:$0xff] }
 0x116   :  { %v981_v16 = vld [vmem:[#allocation2 + $0x1f0] sm:$0xff]  ;;  %v1013_v17 = vmax.f32 %v949_v15, 0.0  ;;  %1329 = vst.msk [vmem:[%s2331_s3 + $0x64] sm:$0xf] %vm1303_vm4, %v1528_v13 }
 0x117   :  { %v1045_v18 = vmax.f32 %v981_v16, 0.0  ;;  %1361 = vst.msk [vmem:[%s2331_s3 + $0xe4] sm:$0xf] %vm1303_vm4, %v1560_v14  ;;  %v947_v19 = vld [vmem:[#allocation2 + $0xe0] sm:$0xff] }
 0x118   :  { %v979_v20 = vld [vmem:[#allocation2 + $0x1e0] sm:$0xff]  ;;  %v1533_v21 = vpack.c.bf16 %v1013_v17, %v1013_v17  ;;  %v1011_v23 = vmax.f32 %v947_v19, 0.0 }
 0x119   :  { %v1565_v22 = vpack.c.bf16 %v1045_v18, %v1045_v18  ;;  %v1043_v24 = vmax.f32 %v979_v20, 0.0  ;;  %v950_v25 = vld [vmem:[#allocation2 + $0xf8] sm:$0xff] }
 0x11a   :  { %v982_v26 = vld [vmem:[#allocation2 + $0x1f8] sm:$0xff]  ;;  %1334 = vst.msk [vmem:[%s2331_s3 + $0x78] sm:$0xf] %vm1303_vm4, %v1533_v21  ;;  %v1531_v27 = vpack.c.bf16 %v1011_v23, %v1011_v23  ;;  %v1014_v29 = vmax.f32 %v950_v25, 0.0 }
 0x11b   :  { %1366 = vst.msk [vmem:[%s2331_s3 + $0xf8] sm:$0xf] %vm1303_vm4, %v1565_v22  ;;  %v1563_v28 = vpack.c.bf16 %v1043_v24, %v1043_v24  ;;  %v1046_v30 = vmax.f32 %v982_v26, 0.0  ;;  %v948_v31 = vld [vmem:[#allocation2 + $0xe8] sm:$0xff] }
 0x11c   :  { %v980_v32 = vld [vmem:[#allocation2 + $0x1e8] sm:$0xff]  ;;  %1332 = vst.msk [vmem:[%s2331_s3 + $0x70] sm:$0xf] %vm1303_vm4, %v1531_v27  ;;  %v1534_v33 = vpack.c.bf16 %v1014_v29, %v1014_v29  ;;  %v1012_v35 = vmax.f32 %v948_v31, 0.0 }
 0x11d   :  { %1364 = vst.msk [vmem:[%s2331_s3 + $0xf0] sm:$0xf] %vm1303_vm4, %v1563_v28  ;;  %v1566_v34 = vpack.c.bf16 %v1046_v30, %v1046_v30  ;;  %v1044_v36 = vmax.f32 %v980_v32, 0.0 }
 0x11e   :  { %1335 = vst.msk [vmem:[%s2331_s3 + $0x7c] sm:$0xf] %vm1303_vm4, %v1534_v33  ;;  %v1532_v37 = vpack.c.bf16 %v1012_v35, %v1012_v35 }
 0x11f   :  { %1367 = vst.msk [vmem:[%s2331_s3 + $0xfc] sm:$0xf] %vm1303_vm4, %v1566_v34  ;;  %v1564_v38 = vpack.c.bf16 %v1044_v36, %v1044_v36 }
 0x120   :  { %1333 = vst.msk [vmem:[%s2331_s3 + $0x74] sm:$0xf] %vm1303_vm4, %v1532_v37 }
 0x121   :  { %1365 = vst.msk [vmem:[%s2331_s3 + $0xf4] sm:$0xf] %vm1303_vm4, %v1564_v38 }

// kernel: vit_embedded_forward.13
= control target key start
LH: loop header
LB: loop body
LE: loop exit
PB: predicated region body
PF: predicated region fallthrough
CT: control target
= control target key end

     0   :  { %vm40_vm0 = vcmask 261120   ;;  %v171_v9 = vmov 0.0   ;;  %vm172_vm1 = vmmov 0   ;;  %vm32_vm2 = vcmask 80896   ;;  %s230_s0 = inlined_call_operand.vmem [shape: bf16[8,32], index: 0, kind: input, shape index: {}]   ;;  %s231_s1 = inlined_call_operand.vmem [shape: bf16[32,10], index: 1, kind: input, shape index: {}]   ;;  %s232_s2 = inlined_call_operand.vmem [shape: f32[1,10], index: 2, kind: input, shape index: {}]   ;;  %s233_s3 = inlined_call_operand.vmem [shape: f32[1,32], index: 3, kind: input, shape index: {}]   ;;  %s234_s4 = inlined_call_operand.vmem [shape: f32[1,32], index: 4, kind: input, shape index: {}]   ;;  %s235_s5 = inlined_call_operand.vmem [shape: f32[8,10], index: 5, kind: output, shape index: {}]  }
   0x1   :  { %v38_v0 = vld [vmem:[%s230_s0] sm:$0xf]  ;;  %v167_v8 = vld [vmem:[%s231_s1 + $0x8] sm:$0xff]   ;;  %157 = vmatprep.subr.bf16.mxu0 %v171_v9  ;;  %161 = vmatprep.mubr.msk.bf16.mxu0 %vm172_vm1, %v171_v9  ;;  %vm72_vm3 = vcmask 257024  }
   0x2   :  { %v39_v1 = vunpack.c.l.bf16 %v38_v0  ;;  %158 = vmatpush3.bf16.msra.mxu0 %v167_v8  ;;  %v168_v10 = vld [vmem:[%s231_s1] sm:$0xff]  }
   0x3   :  { %159 = vmatprep.subr.bf16.mxu0 %v171_v9  ;;  %v148_v11 = vld [vmem:[%s232_s2] ss:$0 sm:$0xff] }
   0x4   :  { %v41_v2 = vsel %vm40_vm0, %v39_v1, 0.0  ;;  %33 = vst.msk [vmem:[#allocation2] sm:$0xff] %vm32_vm2, %v148_v11  ;;  %v149_v16 = vld [vmem:[%s233_s3] ss:$0 sm:$0xff] }
   0x5   :  { %42 = vadd.xlane.f32.xlu0 %v41_v2  ;;  %v150_v18 = vld [vmem:[%s234_s4] ss:$0 sm:$0xff] }
   0x6   :  { %160 = vmatpush3.bf16.msra.mxu0 %v168_v10 }
   0xb   :  { %v75_v23 = vld [vmem:[#allocation2] sm:$0xff] }
  0x8e   :  { %v43_v3 = vpop.xlane.xlu0 %42 }
  0x8f   :  { %v45_v4 = vmul.f32 0.03125, %v43_v3 }
  0x91   :  { %v46_v5 = vsub.f32 %v39_v1, %v45_v4 }
  0x93   :  { %v47_v6 = vmul.f32 %v46_v5, %v46_v5 }
  0x95   :  { %v48_v7 = vsel %vm40_vm0, %v47_v6, 0.0 }
  0x96   :  { %49 = vadd.xlane.f32.xlu0 %v48_v7 }
 0x11f   :  { %v50_v12 = vpop.xlane.xlu0 %49 }
 0x120   :  { %v51_v13 = vmul.f32 0.03125, %v50_v12 }
 0x122   :  { %v52_v14 = vadd.f32 1e-05, %v51_v13 }
 0x124   :  { %169 = vrsqrt.f32 %v52_v14 }
 0x131   :  { %v170_v15 = vpop.eup %169 }
 0x132   :  { %v54_v17 = vmul.f32 %v170_v15, %v46_v5 }
 0x134   :  { %v62_v19 = vmul.f32 %v149_v16, %v54_v17 }
 0x136   :  { %v70_v20 = vadd.f32 %v150_v18, %v62_v19 }
 0x138   :  { %v71_v21 = vpack.c.bf16 %v70_v20, %v70_v20 }
 0x13a   :  { %73 = vst.msk [vmem:[#allocation3] sm:$0xf] %vm72_vm3, %v71_v21 }
 0x141   :  { %v74_v22 = vld [vmem:[#allocation3] sm:$0xf] }
 0x142   :  { %162 = vmatmul.mubr.msk.bf16.vlgmr.msra.gmra.mxu0 %vm40_vm0, %v74_v22 }
 0x202   :  { %v130_v24 = vpop.f32.mrf.mxu0 }
 0x203   :  { %v136_v25 = vadd.f32 %v130_v24, %v75_v23 }
 0x204   :  { %v163_v26 = vpop.f32.mrf.mxu0 }
 0x205   :  { %138 = vst.msk [vmem:[#allocation2] sm:$0xff] %vm32_vm2, %v136_v25 }
 0x206   :  { %v133_v27 = vpop.f32.mrf.mxu0 }
 0x208   :  { %v164_v28 = vpop.f32.mrf.mxu0 }
 0x20c   :  { %v142_v29 = vld [vmem:[#allocation2] sm:$0xff] }
 0x20d   :  { %143 = vst.msk [vmem:[%s235_s5] sm:$0xff] %vm32_vm2, %v142_v29 }

// kernel: vit_embedded_forward.10
= control target key start
LH: loop header
LB: loop body
LE: loop exit
PB: predicated region body
PF: predicated region fallthrough
CT: control target
= control target key end

     0   :  { %vm39_vm0 = vcmask 261120   ;;  %v563_v45 = vmov 0.0   ;;  %vm564_vm1 = vmmov 0   ;;  %vm333_vm2 = vcmask 523264   ;;  %s764_s0 = inlined_call_operand.vmem [shape: bf16[48,32], index: 0, kind: input, shape index: {}]   ;;  %s765_s3 = inlined_call_operand.vmem [shape: bf16[32,64], index: 3, kind: input, shape index: {}]   ;;  %s766_s1 = inlined_call_operand.vmem [shape: f32[1,32], index: 1, kind: input, shape index: {}]   ;;  %s767_s2 = inlined_call_operand.vmem [shape: f32[1,32], index: 2, kind: input, shape index: {}]   ;;  %s768_s5 = inlined_call_operand.vmem [shape: bf16[64,32], index: 5, kind: input, shape index: {}]   ;;  %s769_s4 = inlined_call_operand.vmem [shape: f32[1,64], index: 4, kind: input, shape index: {}]   ;;  %s770_s6 = inlined_call_operand.vmem [shape: f32[1,32], index: 6, kind: input, shape index: {}]   ;;  %s771_s7 = inlined_call_operand.vmem [shape: bf16[48,32], index: 7, kind: output, shape index: {}]  }
   0x1   :  { %v470_v0 = vld [vmem:[%s764_s0] sm:$0xff]   ;;  %v481_v1 = vld [vmem:[%s764_s0 + $0x8] sm:$0xff]   ;;  %v482_v6 = vld [vmem:[%s764_s0 + $0x10] sm:$0xff]   ;;  %495 = vmatprep.subr.bf16.mxu0 %v563_v45  ;;  %499 = vmatprep.mubr.msk.bf16.mxu0 %vm564_vm1, %v563_v45  ;;  %vm430_vm3 = vcmask 257024  }
   0x2   :  { %v611_v2 = vunpack.c.l.bf16 %v470_v0  ;;  %v613_v3 = vunpack.c.l.bf16 %v481_v1  ;;  %v615_v4 = vunpack.c.h.bf16 %v470_v0  ;;  %v617_v5 = vunpack.c.h.bf16 %v481_v1  ;;  %v533_v46 = vld [vmem:[%s765_s3 + $0x8] sm:$0xff]   ;;  %511 = vmatprep.subr.bf16.mxu1 %v563_v45  ;;  %519 = vmatprep.mubr.msk.bf16.mxu1 %vm564_vm1, %v563_v45  ;;  %v534_v47 = vld [vmem:[%s765_s3] sm:$0xff]  }
   0x3   :  { %v630_v11 = vunpack.c.l.bf16 %v482_v6  ;;  %v632_v12 = vunpack.c.h.bf16 %v482_v6  ;;  %496 = vmatpush3.bf16.msra.mxu0 %v533_v46 }
   0x4   :  { %v40_v7 = vsel %vm39_vm0, %v611_v2, 0.0  ;;  %v46_v8 = vsel %vm39_vm0, %v613_v3, 0.0  ;;  %v43_v9 = vsel %vm39_vm0, %v615_v4, 0.0  ;;  %v49_v10 = vsel %vm39_vm0, %v617_v5, 0.0  ;;  %497 = vmatprep.subr.bf16.mxu0 %v563_v45 }
   0x5   :  { %41 = vadd.xlane.f32.xlu0 %v40_v7  ;;  %47 = vadd.xlane.f32.xlu1 %v46_v8  ;;  %v52_v13 = vsel %vm39_vm0, %v630_v11, 0.0  ;;  %v55_v14 = vsel %vm39_vm0, %v632_v12, 0.0  ;;  %v441_v8 = vld [vmem:[%s766_s1] ss:$0 sm:$0xff] }
   0x7   :  { %498 = vmatpush3.bf16.msra.mxu0 %v534_v47 }
   0x9   :  { %44 = vadd.xlane.f32.xlu0 %v43_v9  ;;  %50 = vadd.xlane.f32.xlu1 %v49_v10 }
   0xd   :  { %53 = vadd.xlane.f32.xlu0 %v52_v13  ;;  %56 = vadd.xlane.f32.xlu1 %v55_v14 }
  0x8e   :  { %v42_v15 = vpop.xlane.xlu0 %41  ;;  %v48_v16 = vpop.xlane.xlu1 %47 }
  0x8f   :  { %v59_v17 = vmul.f32 0.03125, %v42_v15  ;;  %v61_v18 = vmul.f32 0.03125, %v48_v16  ;;  %v442_v15 = vld [vmem:[%s767_s2] ss:$0 sm:$0xff] }
  0x91   :  { %v639_v19 = vsub.f32 %v611_v2, %v59_v17  ;;  %v642_v20 = vsub.f32 %v613_v3, %v61_v18 }
  0x92   :  { %v45_v21 = vpop.xlane.xlu0 %44  ;;  %v51_v22 = vpop.xlane.xlu1 %50 }
  0x93   :  { %v60_v23 = vmul.f32 0.03125, %v45_v21  ;;  %v62_v24 = vmul.f32 0.03125, %v51_v22  ;;  %v71_v25 = vmul.f32 %v639_v19, %v639_v19  ;;  %v73_v26 = vmul.f32 %v642_v20, %v642_v20 }
  0x95   :  { %v649_v27 = vsub.f32 %v615_v4, %v60_v23  ;;  %v652_v28 = vsub.f32 %v617_v5, %v62_v24  ;;  %v77_v29 = vsel %vm39_vm0, %v71_v25, 0.0  ;;  %v83_v32 = vsel %vm39_vm0, %v73_v26, 0.0 }
  0x96   :  { %78 = vadd.xlane.f32.xlu0 %v77_v29  ;;  %v54_v30 = vpop.xlane.xlu0 %53  ;;  %v57_v31 = vpop.xlane.xlu1 %56 }
  0x97   :  { %v63_v33 = vmul.f32 0.03125, %v54_v30  ;;  %v64_v34 = vmul.f32 0.03125, %v57_v31  ;;  %v72_v35 = vmul.f32 %v649_v27, %v649_v27  ;;  %v74_v36 = vmul.f32 %v652_v28, %v652_v28 }
  0x99   :  { %v661_v37 = vsub.f32 %v630_v11, %v63_v33  ;;  %v664_v38 = vsub.f32 %v632_v12, %v64_v34  ;;  %v80_v39 = vsel %vm39_vm0, %v72_v35, 0.0  ;;  %v86_v40 = vsel %vm39_vm0, %v74_v36, 0.0 }
  0x9a   :  { %84 = vadd.xlane.f32.xlu0 %v83_v32  ;;  %81 = vadd.xlane.f32.xlu1 %v80_v39  ;;  %v537_v39 = vld [vmem:[%s768_s5 + $0x8] sm:$0xff]  }
  0x9b   :  { %v75_v41 = vmul.f32 %v661_v37, %v661_v37  ;;  %v76_v42 = vmul.f32 %v664_v38, %v664_v38 }
  0x9d   :  { %v89_v43 = vsel %vm39_vm0, %v75_v41, 0.0  ;;  %v92_v44 = vsel %vm39_vm0, %v76_v42, 0.0  ;;  %v443_v41 = vld [vmem:[%s769_s4] ss:$0 sm:$0xff] }
  0x9e   :  { %87 = vadd.xlane.f32.xlu1 %v86_v40  ;;  %90 = vadd.xlane.f32.xlu0 %v89_v43  ;;  %v538_v40 = vld [vmem:[%s768_s5] sm:$0xff]  }
  0xa2   :  { %93 = vadd.xlane.f32.xlu1 %v92_v44 }
 0x11f   :  { %v79_v48 = vpop.xlane.xlu0 %78 }
 0x120   :  { %v95_v49 = vmul.f32 0.03125, %v79_v48 }
 0x122   :  { %v101_v50 = vadd.f32 1e-05, %v95_v49 }
 0x123   :  { %v82_v51 = vpop.xlane.xlu1 %81  ;;  %v85_v52 = vpop.xlane.xlu0 %84 }
 0x124   :  { %539 = vrsqrt.f32 %v101_v50  ;;  %v96_v53 = vmul.f32 0.03125, %v82_v51  ;;  %v97_v54 = vmul.f32 0.03125, %v85_v52 }
 0x126   :  { %v102_v55 = vadd.f32 1e-05, %v96_v53  ;;  %v103_v56 = vadd.f32 1e-05, %v97_v54 }
 0x127   :  { %v88_v57 = vpop.xlane.xlu1 %87  ;;  %v91_v58 = vpop.xlane.xlu0 %90 }
 0x128   :  { %541 = vrsqrt.f32 %v102_v55  ;;  %v98_v59 = vmul.f32 0.03125, %v88_v57  ;;  %v99_v61 = vmul.f32 0.03125, %v91_v58 }
 0x129   :  { %543 = vrsqrt.f32 %v103_v56 }
 0x12a   :  { %v104_v60 = vadd.f32 1e-05, %v98_v59  ;;  %v105_v0 = vadd.f32 1e-05, %v99_v61 }
 0x12b   :  { %v94_v62 = vpop.xlane.xlu1 %93 }
 0x12c   :  { %545 = vrsqrt.f32 %v104_v60  ;;  %v100_v63 = vmul.f32 0.03125, %v94_v62 }
 0x12e   :  { %v106_v1 = vadd.f32 1e-05, %v100_v63 }
 0x130   :  { %547 = vrsqrt.f32 %v106_v1 }
 0x131   :  { %v540_v6 = vpop.eup %539  ;;  %549 = vrsqrt.f32 %v105_v0 }
 0x132   :  { %v113_v7 = vmul.f32 %v540_v6, %v639_v19 }
 0x134   :  { %v126_v13 = vmul.f32 %v441_v8, %v113_v7 }
 0x135   :  { %v542_v9 = vpop.eup %541 }
 0x136   :  { %v114_v10 = vmul.f32 %v542_v9, %v649_v27  ;;  %v544_v14 = vpop.eup %543  ;;  %v139_v18 = vadd.f32 %v442_v15, %v126_v13 }
 0x137   :  { %v115_v22 = vmul.f32 %v544_v14, %v642_v20 }
 0x138   :  { %v127_v16 = vmul.f32 %v441_v8, %v114_v10 }
 0x139   :  { %v546_v17 = vpop.eup %545  ;;  %v128_v26 = vmul.f32 %v441_v8, %v115_v22 }
 0x13a   :  { %v140_v21 = vadd.f32 %v442_v15, %v127_v16  ;;  %v116_v19 = vmul.f32 %v546_v17, %v652_v28 }
 0x13b   :  { %v141_v31 = vadd.f32 %v442_v15, %v128_v26 }
 0x13c   :  { %v145_v23 = vpack.c.bf16 %v140_v21, %v139_v18  ;;  %v129_v24 = vmul.f32 %v441_v8, %v116_v19 }
 0x13d   :  { %v548_v25 = vpop.eup %547 }
 0x13e   :  { %500 = vmatmul.mubr.msk.bf16.vlgmr.msra.gmra.mxu0 %vm39_vm0, %v145_v23  ;;  %v550_v27 = vpop.eup %549  ;;  %v142_v29 = vadd.f32 %v442_v15, %v129_v24  ;;  %v118_v30 = vmul.f32 %v548_v25, %v664_v38  ;;  %v535_v38 = vld [vmem:[%s768_s5 + $0x18] sm:$0xff]  }
 0x13f   :  { %503 = vmatprep.mubr.msk.bf16.mxu0 %vm564_vm1, %v563_v45  ;;  %v117_v32 = vmul.f32 %v550_v27, %v661_v37  ;;  %512 = vmatpush3.bf16.msra.mxu1 %v535_v38  ;;  %v536_v37 = vld [vmem:[%s768_s5 + $0x10] sm:$0xff]  }
 0x140   :  { %v146_v33 = vpack.c.bf16 %v142_v29, %v141_v31  ;;  %v131_v20 = vmul.f32 %v441_v8, %v118_v30  ;;  %513 = vmatprep.subr.bf16.mxu1 %v563_v45 }
 0x141   :  { %v130_v28 = vmul.f32 %v441_v8, %v117_v32 }
 0x142   :  { %v144_v34 = vadd.f32 %v442_v15, %v131_v20 }
 0x143   :  { %v143_v35 = vadd.f32 %v442_v15, %v130_v28  ;;  %514 = vmatpush3.bf16.msra.mxu1 %v536_v37 }
 0x144   :  { %515 = vmatprep.subr.bf16.mxu1 %v563_v45 }
 0x145   :  { %v147_v36 = vpack.c.bf16 %v144_v34, %v143_v35 }
 0x146   :  { %504 = vmatmul.mubr.msk.bf16.gmra.mxu0 %vm39_vm0, %v146_v33 }
 0x147   :  { %507 = vmatprep.mubr.msk.bf16.mxu0 %vm564_vm1, %v563_v45  ;;  %516 = vmatpush3.bf16.msra.mxu1 %v537_v39 }
 0x148   :  { %517 = vmatprep.subr.bf16.mxu1 %v563_v45 }
 0x14b   :  { %518 = vmatpush3.bf16.msra.mxu1 %v538_v40 }
 0x14e   :  { %508 = vmatmul.mubr.msk.bf16.gmra.mxu0 %vm39_vm0, %v147_v36 }
 0x1fe   :  { %v214_v42 = vpop.f32.mrf.mxu0 }
 0x1ff   :  { %v215_v43 = vadd.f32 %v443_v41, %v214_v42 }
 0x200   :  { %v501_v44 = vpop.f32.mrf.mxu0 }
 0x201   :  { %v243_v46 = vmul.f32 0.044715, %v215_v43  ;;  %v237_v36 = vmul.f32 0.5, %v215_v43 }
 0x202   :  { %v217_v47 = vpop.f32.mrf.mxu0 }
 0x203   :  { %v249_v48 = vmul.f32 %v243_v46, %v215_v43  ;;  %v218_v49 = vadd.f32 %v443_v41, %v217_v47 }
 0x204   :  { %v502_v50 = vpop.f32.mrf.mxu0 }
 0x205   :  { %v255_v51 = vmul.f32 %v249_v48, %v215_v43  ;;  %v244_v52 = vmul.f32 0.044715, %v218_v49  ;;  %v238_v38 = vmul.f32 0.5, %v218_v49 }
 0x206   :  { %v222_v53 = vpop.f32.mrf.mxu0 }
 0x207   :  { %v261_v54 = vadd.f32 %v255_v51, %v215_v43  ;;  %v250_v55 = vmul.f32 %v244_v52, %v218_v49  ;;  %v223_v56 = vadd.f32 %v443_v41, %v222_v53 }
 0x208   :  { %v505_v57 = vpop.f32.mrf.mxu0 }
 0x209   :  { %v267_v58 = vmul.f32 0.7978846, %v261_v54  ;;  %v256_v59 = vmul.f32 %v250_v55, %v218_v49  ;;  %v245_v60 = vmul.f32 0.044715, %v223_v56  ;;  %v239_v47 = vmul.f32 0.5, %v223_v56 }
 0x20a   :  { %v225_v61 = vpop.f32.mrf.mxu0 }
 0x20b   :  { %551 = vtanh.f32 %v267_v58  ;;  %v262_v62 = vadd.f32 %v256_v59, %v218_v49  ;;  %v251_v63 = vmul.f32 %v245_v60, %v223_v56  ;;  %v226_v0 = vadd.f32 %v443_v41, %v225_v61 }
 0x20c   :  { %v506_v1 = vpop.f32.mrf.mxu0 }
 0x20d   :  { %v268_v6 = vmul.f32 0.7978846, %v262_v62  ;;  %v257_v7 = vmul.f32 %v251_v63, %v223_v56  ;;  %v246_v8 = vmul.f32 0.044715, %v226_v0  ;;  %v240_v48 = vmul.f32 0.5, %v226_v0 }
 0x20e   :  { %v230_v9 = vpop.f32.mrf.mxu0 }
 0x20f   :  { %553 = vtanh.f32 %v268_v6  ;;  %v263_v10 = vadd.f32 %v257_v7, %v223_v56  ;;  %v252_v13 = vmul.f32 %v246_v8, %v226_v0  ;;  %v231_v14 = vadd.f32 %v443_v41, %v230_v9  ;;  %v449_v56 = vld [vmem:[%s770_s6] ss:$0 sm:$0xff] }
 0x210   :  { %v509_v15 = vpop.f32.mrf.mxu0 }
 0x211   :  { %v269_v16 = vmul.f32 0.7978846, %v263_v10  ;;  %v258_v17 = vmul.f32 %v252_v13, %v226_v0  ;;  %v247_v18 = vmul.f32 0.044715, %v231_v14  ;;  %v241_v55 = vmul.f32 0.5, %v231_v14 }
 0x212   :  { %v233_v21 = vpop.f32.mrf.mxu0 }
 0x213   :  { %555 = vtanh.f32 %v269_v16  ;;  %v264_v22 = vadd.f32 %v258_v17, %v226_v0  ;;  %v253_v19 = vmul.f32 %v247_v18, %v231_v14  ;;  %v234_v23 = vadd.f32 %v443_v41, %v233_v21 }
 0x214   :  { %v510_v24 = vpop.f32.mrf.mxu0 }
 0x215   :  { %v270_v25 = vmul.f32 0.7978846, %v264_v22  ;;  %v259_v26 = vmul.f32 %v253_v19, %v231_v14  ;;  %v248_v27 = vmul.f32 0.044715, %v234_v23  ;;  %v242_v57 = vmul.f32 0.5, %v234_v23 }
 0x217   :  { %557 = vtanh.f32 %v270_v25  ;;  %v265_v29 = vadd.f32 %v259_v26, %v231_v14  ;;  %v254_v30 = vmul.f32 %v248_v27, %v234_v23 }
 0x218   :  { %v552_v31 = vpop.eup %551 }
 0x219   :  { %v271_v32 = vmul.f32 0.7978846, %v265_v29  ;;  %v260_v33 = vmul.f32 %v254_v30, %v234_v23  ;;  %v279_v28 = vadd.f32 1.0, %v552_v31 }
 0x21b   :  { %559 = vtanh.f32 %v271_v32  ;;  %v266_v20 = vadd.f32 %v260_v33, %v234_v23  ;;  %v285_v39 = vmul.f32 %v279_v28, %v237_v36 }
 0x21c   :  { %v554_v34 = vpop.eup %553 }
 0x21d   :  { %v272_v35 = vmul.f32 0.7978846, %v266_v20  ;;  %v280_v37 = vadd.f32 1.0, %v554_v34 }
 0x21f   :  { %561 = vtanh.f32 %v272_v35  ;;  %v286_v40 = vmul.f32 %v280_v37, %v238_v38 }
 0x220   :  { %v556_v41 = vpop.eup %555 }
 0x221   :  { %v291_v42 = vpack.c.bf16 %v286_v40, %v285_v39  ;;  %v281_v44 = vadd.f32 1.0, %v556_v41 }
 0x223   :  { %520 = vmatmul.mubr.msk.bf16.vlgmr.msra.gmra.mxu1 %vm333_vm2, %v291_v42  ;;  %v287_v51 = vmul.f32 %v281_v44, %v239_v47 }
 0x224   :  { %v558_v46 = vpop.eup %557  ;;  %523 = vmatprep.mubr.msk.bf16.mxu1 %vm564_vm1, %v563_v45 }
 0x225   :  { %v282_v50 = vadd.f32 1.0, %v558_v46 }
 0x227   :  { %v288_v43 = vmul.f32 %v282_v50, %v240_v48 }
 0x228   :  { %v560_v49 = vpop.eup %559 }
 0x229   :  { %v292_v52 = vpack.c.bf16 %v288_v43, %v287_v51  ;;  %v283_v53 = vadd.f32 1.0, %v560_v49 }
 0x22b   :  { %524 = vmatmul.mubr.msk.bf16.gmra.mxu1 %vm333_vm2, %v292_v52  ;;  %v289_v59 = vmul.f32 %v283_v53, %v241_v55 }
 0x22c   :  { %v562_v54 = vpop.eup %561  ;;  %527 = vmatprep.mubr.msk.bf16.mxu1 %vm564_vm1, %v563_v45 }
 0x22d   :  { %v284_v58 = vadd.f32 1.0, %v562_v54 }
 0x22f   :  { %v290_v60 = vmul.f32 %v284_v58, %v242_v57 }
 0x231   :  { %v293_v61 = vpack.c.bf16 %v290_v60, %v289_v59 }
 0x233   :  { %528 = vmatmul.mubr.msk.bf16.gmra.mxu1 %vm333_vm2, %v293_v61 }
 0x2e3   :  { %v377_v62 = vpop.f32.mrf.mxu1 }
 0x2e4   :  { %v378_v63 = vadd.f32 %v449_v56, %v377_v62 }
 0x2e5   :  { %v521_v0 = vpop.f32.mrf.mxu1 }
 0x2e6   :  { %v400_v1 = vadd.f32 %v611_v2, %v378_v63 }
 0x2e7   :  { %v380_v6 = vpop.f32.mrf.mxu1 }
 0x2e8   :  { %v463_v45 = vpack.c.bf16 %v400_v1, %v400_v1  ;;  %v381_v7 = vadd.f32 %v449_v56, %v380_v6 }
 0x2e9   :  { %v522_v8 = vpop.f32.mrf.mxu1 }
 0x2ea   :  { %431 = vst.msk [vmem:[%s771_s7] sm:$0xf] %vm430_vm3, %v463_v45  ;;  %v401_v9 = vadd.f32 %v615_v4, %v381_v7 }
 0x2eb   :  { %v385_v10 = vpop.f32.mrf.mxu1 }
 0x2ec   :  { %v464_v13 = vpack.c.bf16 %v401_v9, %v401_v9  ;;  %v386_v14 = vadd.f32 %v449_v56, %v385_v10 }
 0x2ed   :  { %v525_v15 = vpop.f32.mrf.mxu1 }
 0x2ee   :  { %432 = vst.msk [vmem:[%s771_s7 + $0x4] sm:$0xf] %vm430_vm3, %v464_v13  ;;  %v402_v2 = vadd.f32 %v613_v3, %v386_v14 }
 0x2ef   :  { %v388_v16 = vpop.f32.mrf.mxu1 }
 0x2f0   :  { %v465_v17 = vpack.c.bf16 %v402_v2, %v402_v2  ;;  %v389_v18 = vadd.f32 %v449_v56, %v388_v16 }
 0x2f1   :  { %v526_v21 = vpop.f32.mrf.mxu1 }
 0x2f2   :  { %433 = vst.msk [vmem:[%s771_s7 + $0x8] sm:$0xf] %vm430_vm3, %v465_v17  ;;  %v403_v4 = vadd.f32 %v617_v5, %v389_v18 }
 0x2f3   :  { %v393_v22 = vpop.f32.mrf.mxu1 }
 0x2f4   :  { %v466_v19 = vpack.c.bf16 %v403_v4, %v403_v4  ;;  %v394_v23 = vadd.f32 %v449_v56, %v393_v22 }
 0x2f5   :  { %v529_v24 = vpop.f32.mrf.mxu1 }
 0x2f6   :  { %434 = vst.msk [vmem:[%s771_s7 + $0xc] sm:$0xf] %vm430_vm3, %v466_v19  ;;  %v404_v3 = vadd.f32 %v630_v11, %v394_v23 }
 0x2f7   :  { %v396_v25 = vpop.f32.mrf.mxu1 }
 0x2f8   :  { %v467_v26 = vpack.c.bf16 %v404_v3, %v404_v3  ;;  %v397_v27 = vadd.f32 %v449_v56, %v396_v25 }
 0x2f9   :  { %v530_v29 = vpop.f32.mrf.mxu1 }
 0x2fa   :  { %435 = vst.msk [vmem:[%s771_s7 + $0x10] sm:$0xf] %vm430_vm3, %v467_v26  ;;  %v405_v5 = vadd.f32 %v632_v12, %v397_v27 }
 0x2fc   :  { %v468_v30 = vpack.c.bf16 %v405_v5, %v405_v5 }
 0x2fe   :  { %436 = vst.msk [vmem:[%s771_s7 + $0x14] sm:$0xf] %vm430_vm3, %v468_v30 }

// kernel: vit_embedded_forward.9
= control target key start
LH: loop header
LB: loop body
LE: loop exit
PB: predicated region body
PF: predicated region fallthrough
CT: control target
= control target key end

     0   :  { %s2933_s17 = smov 0   ;;  %s3329_s0 = inlined_call_operand.vmem [shape: bf16[2,24,32], index: 0, kind: input, shape index: {}]   ;;  %s3330_s1 = inlined_call_operand.vmem [shape: f32[1,32], index: 1, kind: input, shape index: {}]   ;;  %s3331_s2 = inlined_call_operand.vmem [shape: f32[1,32], index: 2, kind: input, shape index: {}]   ;;  %s3332_s3 = inlined_call_operand.vmem [shape: bf16[4,32,8], index: 3, kind: input, shape index: {}]   ;;  %s3333_s4 = inlined_call_operand.vmem [shape: bf16[4,32,8], index: 4, kind: input, shape index: {}]   ;;  %s3334_s5 = inlined_call_operand.vmem [shape: bf16[4,32,8], index: 5, kind: input, shape index: {}]   ;;  %s3335_s6 = inlined_call_operand.vmem [shape: f32[4,1,8], index: 6, kind: input, shape index: {}]   ;;  %s3336_s7 = inlined_call_operand.vmem [shape: f32[4,1,8], index: 7, kind: input, shape index: {}]   ;;  %s3337_s8 = inlined_call_operand.vmem [shape: f32[4,1,8], index: 8, kind: input, shape index: {}]   ;;  %s3338_s9 = inlined_call_operand.vmem [shape: bf16[4,8,32], index: 9, kind: input, shape index: {}]   ;;  %s3339_s10 = inlined_call_operand.vmem [shape: f32[1,32], index: 10, kind: input, shape index: {}]   ;;  %s3340_s11 = inlined_call_operand.vmem [shape: bf16[2,24,32], index: 11, kind: output, shape index: {}]  }
   0x1 LB: > { %s2332_s18 = sadd.s32 4294967295, %s2871_s17   ;;  %p2336_p0 = scmp.ge.s32.totalorder %s2871_s17, 1  ;;  %s2871_s17 = sphi %s2933_s17, %s21_s17  }
   0x2   : > { %p337_p1 = scmp.lt.s32.totalorder %s2871_s17, 3 }
   0x4   : > { %p338_p2 = pnand %p2336_p0, %p337_p1 }
   0x5   : > { %p377_p3 = scmp.lt.s32.totalorder (!%p338_p2), %s2332_s18, 1 }
   0x6   : > { %341 = sbr.rel (%p338_p2) target bundleno = 4286 (0x10be), region = 64 }
   0xb   : > { %s3342_s18 = smov (!%p377_p3, %s2332_s18), 1  ;;  %vm394_vm0 = vcmask 261120   ;;  %v2787_v23 = vld [vmem:[%s3332_s3 + $0x8] sm:$0xff]   ;;  %v2789_v25 = vld [vmem:[%s3332_s3] sm:$0xff]   ;;  %vm698_vm1 = vcmask 64512   ;;  %vm804_vm2 = vcmask 1043456  }
   0xc   : > { %s2778_s19 = smul.u32 12, %s3342_s18  ;;  %v2788_v24 = vld [vmem:[%s3333_s4 + $0x8] sm:$0xff]   ;;  %2578 = vmatprep.subr.bf16.mxu0 %v2787_v23  ;;  %v2790_v26 = vld [vmem:[%s3333_s4] sm:$0xff]   ;;  %vm762_vm4 = vcmask 195584   ;;  %vm2273_vm5 = vcmask 257024  }
   0xd   : > { %2586 = vmatprep.subr.bf16.mxu1 %v2788_v24  ;;  %2579 = vmatpush3.bf16.msra.mxu0 %v2787_v23  ;;  %v2791_v27 = vld [vmem:[%s3334_s5 + $0x8] sm:$0xff]   ;;  %v2339_v39 = vld [vmem:[%s3330_s1] ss:$0 sm:$0xff] }
   0xe   : > { %s381_s22 = scalar_lea.vmem %s3329_s0, %s2778_s19  ;;  %2587 = vmatpush3.bf16.msra.mxu1 %v2788_v24  ;;  %2580 = vmatprep.subr.bf16.mxu0 %v2789_v25  ;;  %v2340_v45 = vld [vmem:[%s3331_s2] ss:$0 sm:$0xff]  ;;  %s386_s12 = scalar_lea.vmem %s3340_s11, %s2778_s19 }
   0xf   : > { %v2483_v0 = vld [vmem:[%s381_s22] sm:$0xff]   ;;  %v390_v1 = vld [vmem:[%s381_s22 + $0x8] sm:$0xf]  ;;  %2588 = vmatprep.subr.bf16.mxu1 %v2790_v26 }
  0x10   : > { %v2949_v2 = vunpack.c.l.bf16 %v2483_v0  ;;  %v2951_v3 = vunpack.c.l.bf16 %v390_v1  ;;  %v2953_v4 = vunpack.c.h.bf16 %v2483_v0  ;;  %v2792_v53 = vld [vmem:[%s3334_s5] sm:$0xff]  }
  0x11   : > { %2581 = vmatpush3.bf16.msra.mxu0 %v2789_v25  ;;  %v2347_v54 = vld [vmem:[%s3336_s7] ss:$0 sm:$0xff] }
  0x12   : > { %v395_v5 = vsel %vm394_vm0, %v2949_v2, 0.0  ;;  %v401_v6 = vsel %vm394_vm0, %v2951_v3, 0.0  ;;  %v398_v7 = vsel %vm394_vm0, %v2953_v4, 0.0  ;;  %2589 = vmatpush3.bf16.msra.mxu1 %v2790_v26  ;;  %2594 = vmatprep.subr.bf16.mxu0 %v2791_v27  ;;  %v2342_v61 = vld [vmem:[%s3335_s6] ss:$0 sm:$0xff] }
  0x13   : > { %396 = vadd.xlane.f32.xlu0 %v395_v5  ;;  %402 = vadd.xlane.f32.xlu1 %v401_v6 }
  0x17   : > { %399 = vadd.xlane.f32.xlu0 %v398_v7  ;;  %v2352_v7 = vld [vmem:[%s3337_s8] ss:$0 sm:$0xff] }
  0x9c   : > { %v397_v8 = vpop.xlane.xlu0 %396  ;;  %v403_v9 = vpop.xlane.xlu1 %402 }
  0x9d   : > { %v405_v10 = vmul.f32 0.03125, %v397_v8  ;;  %v407_v11 = vmul.f32 0.03125, %v403_v9 }
  0x9f   : > { %v408_v12 = vsub.f32 %v2949_v2, %v405_v10  ;;  %v410_v13 = vsub.f32 %v2951_v3, %v407_v11 }
  0xa0   : > { %v400_v14 = vpop.xlane.xlu0 %399 }
  0xa1   : > { %v406_v15 = vmul.f32 0.03125, %v400_v14  ;;  %v411_v16 = vmul.f32 %v408_v12, %v408_v12  ;;  %v413_v17 = vmul.f32 %v410_v13, %v410_v13 }
  0xa3   : > { %v409_v18 = vsub.f32 %v2953_v4, %v406_v15  ;;  %v414_v19 = vsel %vm394_vm0, %v411_v16, 0.0  ;;  %v420_v20 = vsel %vm394_vm0, %v413_v17, 0.0 }
  0xa4   : > { %415 = vadd.xlane.f32.xlu1 %v414_v19 }
  0xa5   : > { %v412_v21 = vmul.f32 %v409_v18, %v409_v18 }
  0xa7   : > { %v417_v22 = vsel %vm394_vm0, %v412_v21, 0.0 }
  0xa8   : > { %421 = vadd.xlane.f32.xlu1 %v420_v20  ;;  %418 = vadd.xlane.f32.xlu0 %v417_v22  ;;  %v2793_v20 = vld [vmem:[%s3332_s3 + $0x18] sm:$0xff]  }
 0x12d   : > { %v416_v28 = vpop.xlane.xlu1 %415 }
 0x12e   : > { %v423_v29 = vmul.f32 0.03125, %v416_v28 }
 0x130   : > { %v426_v30 = vadd.f32 1e-05, %v423_v29 }
 0x131   : > { %v422_v31 = vpop.xlane.xlu1 %421  ;;  %v419_v32 = vpop.xlane.xlu0 %418 }
 0x132   : > { %2811 = vrsqrt.f32 %v426_v30  ;;  %v425_v33 = vmul.f32 0.03125, %v422_v31  ;;  %v424_v34 = vmul.f32 0.03125, %v419_v32  ;;  %v2794_v30 = vld [vmem:[%s3332_s3 + $0x10] sm:$0xff]   ;;  %v2795_v31 = vld [vmem:[%s3334_s5 + $0x18] sm:$0xff]  }
 0x133   : > { %v2796_v32 = vld [vmem:[%s3334_s5 + $0x10] sm:$0xff]  }
 0x134   : > { %v428_v35 = vadd.f32 1e-05, %v425_v33  ;;  %v427_v36 = vadd.f32 1e-05, %v424_v34  ;;  %v457_v33 = vlaneseq }
 0x136   : > { %2813 = vrsqrt.f32 %v428_v35  ;;  %v3044_v34 = vand.u32 127, %v457_v33 }
 0x137   : > { %2815 = vrsqrt.f32 %v427_v36 }
 0x138   : > { %vm459_vm3 = vcmp.lt.s32.totalorder %v3044_v34, 17 }
 0x13f   : > { %v2812_v37 = vpop.eup %2811 }
 0x140   : > { %v432_v38 = vmul.f32 %v2812_v37, %v408_v12 }
 0x142   : > { %v442_v43 = vmul.f32 %v2339_v39, %v432_v38 }
 0x143   : > { %v2814_v40 = vpop.eup %2813 }
 0x144   : > { %v2816_v41 = vpop.eup %2815  ;;  %v434_v42 = vmul.f32 %v2814_v40, %v410_v13  ;;  %v452_v49 = vadd.f32 %v2340_v45, %v442_v43 }
 0x145   : > { %v433_v44 = vmul.f32 %v2816_v41, %v409_v18 }
 0x146   : > { %v444_v46 = vmul.f32 %v2339_v39, %v434_v42  ;;  %v2368_v42 = vld [vmem:[%s3335_s6 + $0x1] ss:$0 sm:$0xff] }
 0x147   : > { %v443_v47 = vmul.f32 %v2339_v39, %v433_v44 }
 0x148   : > { %v454_v48 = vadd.f32 %v2340_v45, %v444_v46 }
 0x149   : > { %v453_v50 = vadd.f32 %v2340_v45, %v443_v47 }
 0x14a   : > { %v2988_v51 = vpack.c.bf16 %v454_v48, %v454_v48 }
 0x14b   : > { %v2990_v52 = vpack.c.bf16 %v453_v50, %v452_v49 }
 0x14d   : > { %2582 = vmatprep.mubr.msk.bf16.mxu0 %vm394_vm0, %v2990_v52  ;;  %2590 = vmatprep.mubr.msk.bf16.mxu1 %vm394_vm0, %v2990_v52 }
 0x14e   : > { %2583 = vmatmul.mubr.msk.bf16.vlgmr.msra.gmra.mxu0 %vm394_vm0, %v2988_v51  ;;  %2591 = vmatmul.mubr.msk.bf16.vlgmr.msra.gmra.mxu1 %vm394_vm0, %v2988_v51 }
 0x14f   : > { %2595 = vmatpush3.bf16.msra.mxu0 %v2791_v27  ;;  %2598 = vmatprep.mubr.msk.bf16.mxu0 %vm394_vm0, %v2990_v52 }
 0x150   : > { %2596 = vmatprep.subr.bf16.mxu0 %v2792_v53 }
 0x153   : > { %2597 = vmatpush3.bf16.msra.mxu0 %v2792_v53 }
 0x156   : > { %2599 = vmatmul.mubr.msk.bf16.vlgmr.msra.gmra.mxu0 %vm394_vm0, %v2988_v51 }
 0x20e   : > { %v2584_v55 = vpop.f32.mrf.mxu0  ;;  %v2592_v56 = vpop.f32.mrf.mxu1 }
 0x20f   : > { %v613_v57 = vadd.f32 %v2592_v56, %v2347_v54  ;;  %v542_v17 = vadd.f32 %v2584_v55, %v2342_v61 }
 0x210   : > { %v533_v58 = vpop.f32.mrf.mxu0  ;;  %v604_v59 = vpop.f32.mrf.mxu1 }
 0x211   : > { %v695_v60 = vpack.c.bf16 %v613_v57, %v613_v57  ;;  %v534_v1 = vadd.f32 %v2342_v61, %v533_v58  ;;  %v605_v8 = vadd.f32 %v2347_v54, %v604_v59  ;;  %v691_v25 = vmul.f32 0.35355338, %v542_v17 }
 0x212   : > { %v2585_v62 = vpop.f32.mrf.mxu0  ;;  %v2593_v63 = vpop.f32.mrf.mxu1 }
 0x213   : > { %v709_v0 = vsel %vm698_vm1, %v695_v60, 0  ;;  %2762 = vmatprep.subr.msk.bf16.mxu1 %vm698_vm1, %v695_v60  ;;  %v689_v12 = vmul.f32 0.35355338, %v534_v1  ;;  %v693_v29 = vpack.c.bf16 %v691_v25, %v691_v25 }
 0x214   : > { %v536_v5 = vpop.f32.mrf.mxu0  ;;  %v607_v6 = vpop.f32.mrf.mxu1  ;;  %2603 = vmatpush3.bf16.xpose.msra.mxu1 %v709_v0 }
 0x215   : > { %v537_v9 = vadd.f32 %v2342_v61, %v536_v5  ;;  %v608_v10 = vadd.f32 %v2347_v54, %v607_v6  ;;  %v2388_v54 = vld [vmem:[%s3337_s8 + $0x1] ss:$0 sm:$0xff] }
 0x216   : > { %v2600_v11 = vpop.f32.mrf.mxu0 }
 0x217   : > { %v690_v13 = vmul.f32 0.35355338, %v537_v9  ;;  %v694_v14 = vpack.c.bf16 %v608_v10, %v605_v8  ;;  %v684_v15 = vadd.f32 %v2600_v11, %v2352_v7 }
 0x218   : > { %v675_v16 = vpop.f32.mrf.mxu0 }
 0x219   : > { %v692_v18 = vpack.c.bf16 %v690_v13, %v689_v12  ;;  %v697_v19 = vpack.c.bf16 %v684_v15, %v684_v15  ;;  %2763 = vmatprep.subr.msk.bf16.mxu1 %vm698_vm1, %v694_v14  ;;  %v706_v23 = vsel %vm698_vm1, %v694_v14, 0  ;;  %v676_v26 = vadd.f32 %v2352_v7, %v675_v16 }
 0x21a   : > { %v2601_v21 = vpop.f32.mrf.mxu0 }
 0x21b   : > { %v806_v22 = vsel %vm804_vm2, %v697_v19, 0  ;;  %2606 = vmatprep.mubr.msk.bf16.mxu1 %vm698_vm1, %v692_v18  ;;  %2764 = vmatprep.subr.msk.bf16.mxu0 %vm804_vm2, %v697_v19 }
 0x21c   : > { %v678_v24 = vpop.f32.mrf.mxu0  ;;  %2605 = vmatpush3.bf16.xpose.msra.mxu1 %v706_v23  ;;  %2611 = vmatpush3.bf16.msra.mxu0 %v806_v22 }
 0x21d   : > { %v679_v27 = vadd.f32 %v2352_v7, %v678_v24  ;;  %2624 = vmatprep.subr.bf16.mxu1 %v2793_v20 }
 0x21f   : > { %v696_v28 = vpack.c.bf16 %v679_v27, %v676_v26 }
 0x221   : > { %2612 = vmatprep.subr.bf16.mxu0 %v696_v28 }
 0x222   : > { %2613 = vmatpush3.bf16.msra.mxu0 %v696_v28 }
 0x223   : > { %2607 = vmatmul.mubr.msk.bf16.vlgmr.msra.gmra.mxu1 %vm698_vm1, %v693_v29 }
 0x224   : > { %2625 = vmatpush3.bf16.msra.mxu1 %v2793_v20  ;;  %2628 = vmatprep.mubr.msk.bf16.mxu1 %vm394_vm0, %v2990_v52 }
 0x225   : > { %2626 = vmatprep.subr.bf16.mxu1 %v2794_v30 }
 0x228   : > { %2627 = vmatpush3.bf16.msra.mxu1 %v2794_v30 }
 0x229   : > { %2640 = vmatprep.subr.bf16.mxu1 %v2795_v31 }
 0x22b   : > { %2629 = vmatmul.mubr.msk.bf16.vlgmr.msra.gmra.mxu1 %vm394_vm0, %v2988_v51 }
 0x22c   : > { %2641 = vmatpush3.bf16.msra.mxu1 %v2795_v31  ;;  %2644 = vmatprep.mubr.msk.bf16.mxu1 %vm394_vm0, %v2990_v52 }
 0x22d   : > { %2642 = vmatprep.subr.bf16.mxu1 %v2796_v32 }
 0x230   : > { %2643 = vmatpush3.bf16.msra.mxu1 %v2796_v32 }
 0x233   : > { %2645 = vmatmul.mubr.msk.bf16.vlgmr.msra.gmra.mxu1 %vm394_vm0, %v2988_v51 }
 0x2e3   : > { %v2608_v35 = vpop.f32.mrf.mxu1 }
 0x2e4   : > { %v761_v40 = vsel %vm459_vm3, %v2608_v35, -1e+30  ;;  %v858_v35 = vld [vmem:[%s3338_s9] sm:$0xf] }
 0x2e5   : > { %v745_v36 = vpop.f32.mrf.mxu1  ;;  %v769_v45 = vsel %vm762_vm4, %v761_v40, -inf  ;;  %2765 = vmatprep.subr.msk.bf16.mxu0 %vm804_vm2, %v858_v35 }
 0x2e6   : > { %v759_v37 = vsel %vm459_vm3, %v745_v36, -1e+30  ;;  %v866_v36 = vsel %vm804_vm2, %v858_v35, 0 }
 0x2e7   : > { %v2609_v38 = vpop.f32.mrf.mxu1  ;;  %v763_v39 = vsel %vm762_vm4, %v759_v37, -inf }
 0x2e8   : > { %764 = vmax.xlane.f32.xlu0 %v763_v39 }
 0x2e9   : > { %v748_v41 = vpop.f32.mrf.mxu1 }
 0x2ea   : > { %v760_v43 = vsel %vm459_vm3, %v748_v41, -1e+30 }
 0x2eb   : > { %v2630_v44 = vpop.f32.mrf.mxu1  ;;  %v766_v46 = vsel %vm762_vm4, %v760_v43, -inf }
 0x2ec   : > { %v3059_v47 = vadd.f32 %v2630_v44, %v2368_v42  ;;  %770 = vmax.xlane.f32.xlu0 %v769_v45  ;;  %767 = vmax.xlane.f32.xlu1 %v766_v46  ;;  %v2798_v44 = vld [vmem:[%s3333_s4 + $0x10] sm:$0xff]  }
 0x2ed   : > { %v978_v48 = vpop.f32.mrf.mxu1 }
 0x2ee   : > { %v979_v50 = vadd.f32 %v2368_v42, %v978_v48 }
 0x2ef   : > { %v2631_v49 = vpop.f32.mrf.mxu1 }
 0x2f0   : > { %v3064_v57 = vmul.f32 0.35355338, %v979_v50  ;;  %v2378_v50 = vld [vmem:[%s3336_s7 + $0x1] ss:$0 sm:$0xff] }
 0x2f1   : > { %v981_v53 = vpop.f32.mrf.mxu1 }
 0x2f2   : > { %v982_v55 = vadd.f32 %v2368_v42, %v981_v53 }
 0x2f3   : > { %v2646_v56 = vpop.f32.mrf.mxu1 }
 0x2f4   : > { %v3066_v58 = vmul.f32 0.35355338, %v982_v55  ;;  %v1133_v59 = vadd.f32 %v2646_v56, %v2388_v54 }
 0x2f5   : > { %v1124_v60 = vpop.f32.mrf.mxu1 }
 0x2f6   : > { %v1141_v61 = vpack.c.bf16 %v3066_v58, %v3064_v57  ;;  %v1146_v62 = vpack.c.bf16 %v1133_v59, %v1133_v59  ;;  %v1125_v5 = vadd.f32 %v2388_v54, %v1124_v60 }
 0x2f7   : > { %v2647_v63 = vpop.f32.mrf.mxu1 }
 0x2f8   : > { %v1252_v0 = vsel %vm804_vm2, %v1146_v62, 0  ;;  %2768 = vmatprep.subr.msk.bf16.mxu1 %vm804_vm2, %v1146_v62  ;;  %v2799_v63 = vld [vmem:[%s3332_s3 + $0x28] sm:$0xff]  }
 0x2f9   : > { %v1127_v1 = vpop.f32.mrf.mxu1  ;;  %2657 = vmatpush3.bf16.msra.mxu1 %v1252_v0 }
 0x2fa   : > { %v1128_v6 = vadd.f32 %v2388_v54, %v1127_v1  ;;  %v1140_v1 = vmul.f32 0.35355338, %v3059_v47  ;;  %v2802_v47 = vld [vmem:[%s3334_s5 + $0x20] sm:$0xff]  }
 0x2fc   : > { %v1145_v7 = vpack.c.bf16 %v1128_v6, %v1125_v5  ;;  %v1142_v5 = vpack.c.bf16 %v1140_v1, %v1140_v1  ;;  %v2800_v6 = vld [vmem:[%s3332_s3 + $0x20] sm:$0xff]  }
 0x2fe   : > { %2658 = vmatprep.subr.bf16.mxu1 %v1145_v7 }
 0x2ff   : > { %2659 = vmatpush3.bf16.msra.mxu1 %v1145_v7  ;;  %v2801_v7 = vld [vmem:[%s3334_s5 + $0x28] sm:$0xff]  }
 0x371   : > { %v765_v8 = vpop.xlane.xlu0 %764 }
 0x372   : > { %v772_v9 = vsub.f32 %v759_v37, %v765_v8  ;;  %v2797_v37 = vld [vmem:[%s3333_s4 + $0x18] sm:$0xff]  }
 0x374   : > { %v775_v10 = vmul.f32 1.442695, %v772_v9 }
 0x375   : > { %v771_v11 = vpop.xlane.xlu0 %770  ;;  %v768_v12 = vpop.xlane.xlu1 %767 }
 0x376   : > { %2817 = vpow2.f32 %v775_v10  ;;  %v774_v13 = vsub.f32 %v761_v40, %v771_v11  ;;  %v773_v14 = vsub.f32 %v760_v43, %v768_v12 }
 0x378   : > { %v779_v15 = vmul.f32 1.442695, %v774_v13  ;;  %v777_v16 = vmul.f32 1.442695, %v773_v14 }
 0x37a   : > { %2819 = vpow2.f32 %v779_v15  ;;  %v2405_v15 = vld [vmem:[%s3335_s6 + $0x2] ss:$0 sm:$0xff] }
 0x37b   : > { %2821 = vpow2.f32 %v777_v16 }
 0x383   : > { %v2818_v17 = vpop.eup %2817 }
 0x384   : > { %v781_v18 = vsel %vm762_vm4, %v2818_v17, 0.0 }
 0x385   : > { %782 = vadd.xlane.f32.xlu1 %v781_v18 }
 0x387   : > { %v2820_v19 = vpop.eup %2819 }
 0x388   : > { %v2822_v20 = vpop.eup %2821  ;;  %v787_v21 = vsel %vm762_vm4, %v2820_v19, 0.0 }
 0x389   : > { %788 = vadd.xlane.f32.xlu1 %v787_v21  ;;  %v784_v22 = vsel %vm762_vm4, %v2822_v20, 0.0 }
 0x38a   : > { %785 = vadd.xlane.f32.xlu0 %v784_v22 }
 0x40e   : > { %v783_v23 = vpop.xlane.xlu1 %782 }
 0x40f   : > { %2823 = vrcp.f32 %v783_v23 }
 0x412   : > { %v789_v24 = vpop.xlane.xlu1 %788 }
 0x413   : > { %v786_v25 = vpop.xlane.xlu0 %785  ;;  %2825 = vrcp.f32 %v789_v24 }
 0x414   : > { %2827 = vrcp.f32 %v786_v25  ;;  %v2425_v25 = vld [vmem:[%s3337_s8 + $0x2] ss:$0 sm:$0xff] }
 0x41c   : > { %v2824_v26 = vpop.eup %2823 }
 0x41d   : > { %v793_v30 = vmul.f32 %v2824_v26, %v2818_v17 }
 0x420   : > { %v2826_v27 = vpop.eup %2825 }
 0x421   : > { %v2828_v28 = vpop.eup %2827  ;;  %v795_v29 = vmul.f32 %v2826_v27, %v2820_v19 }
 0x422   : > { %v794_v31 = vmul.f32 %v2828_v28, %v2822_v20 }
 0x423   : > { %v797_v32 = vpack.c.bf16 %v795_v29, %v795_v29 }
 0x424   : > { %v796_v33 = vpack.c.bf16 %v794_v31, %v793_v30 }
 0x426   : > { %2614 = vmatprep.mubr.msk.bf16.mxu0 %vm762_vm4, %v796_v33 }
 0x427   : > { %2615 = vmatmul.mubr.msk.bf16.vlgmr.msra.gmra.mxu0 %vm762_vm4, %v797_v32 }
 0x428   : > { %2619 = vmatpush3.bf16.msra.mxu0 %v866_v36 }
 0x429   : > { %2632 = vmatprep.subr.bf16.mxu0 %v2797_v37 }
 0x4e7   : > { %v2616_v38 = vpop.f32.mrf.mxu0 }
 0x4e8   : > { %v857_v43 = vpack.c.bf16 %v2616_v38, %v2616_v38 }
 0x4e9   : > { %v842_v39 = vpop.f32.mrf.mxu0 }
 0x4eb   : > { %v2617_v40 = vpop.f32.mrf.mxu0 }
 0x4ed   : > { %v845_v41 = vpop.f32.mrf.mxu0 }
 0x4ee   : > { %v856_v42 = vpack.c.bf16 %v845_v41, %v842_v39 }
 0x4f0   : > { %2620 = vmatprep.mubr.msk.bf16.mxu0 %vm698_vm1, %v856_v42 }
 0x4f1   : > { %2621 = vmatmul.mubr.msk.bf16.vlgmr.msra.gmra.mxu0 %vm698_vm1, %v857_v43 }
 0x4f2   : > { %2633 = vmatpush3.bf16.msra.mxu0 %v2797_v37  ;;  %2636 = vmatprep.mubr.msk.bf16.mxu0 %vm394_vm0, %v2990_v52 }
 0x4f3   : > { %2634 = vmatprep.subr.bf16.mxu0 %v2798_v44 }
 0x4f6   : > { %2635 = vmatpush3.bf16.msra.mxu0 %v2798_v44 }
 0x4f9   : > { %2637 = vmatmul.mubr.msk.bf16.vlgmr.msra.gmra.mxu0 %vm394_vm0, %v2988_v51 }
 0x4fa   : > { %2652 = vmatprep.mubr.msk.bf16.mxu0 %vm698_vm1, %v1141_v61 }
 0x5b1   : > { %v3098_v45 = vpop.f32.mrf.mxu0 }
 0x5b3   : > { %v3100_v46 = vpop.f32.mrf.mxu0 }
 0x5b5   : > { %v2623_v48 = vpop.f32.mrf.mxu0 }
 0x5b7   : > { %v3102_v49 = vpop.f32.mrf.mxu0 }
 0x5b9   : > { %v2638_v53 = vpop.f32.mrf.mxu0 }
 0x5ba   : > { %v1060_v54 = vadd.f32 %v2638_v53, %v2378_v50 }
 0x5bb   : > { %v1051_v55 = vpop.f32.mrf.mxu0 }
 0x5bc   : > { %v1144_v56 = vpack.c.bf16 %v1060_v54, %v1060_v54  ;;  %v1052_v60 = vadd.f32 %v2378_v50, %v1051_v55 }
 0x5bd   : > { %v2639_v59 = vpop.f32.mrf.mxu0 }
 0x5be   : > { %v1157_v57 = vsel %vm698_vm1, %v1144_v56, 0  ;;  %2766 = vmatprep.subr.msk.bf16.mxu0 %vm698_vm1, %v1144_v56 }
 0x5bf   : > { %v1054_v58 = vpop.f32.mrf.mxu0  ;;  %2649 = vmatpush3.bf16.xpose.msra.mxu0 %v1157_v57 }
 0x5c0   : > { %v1055_v61 = vadd.f32 %v2378_v50, %v1054_v58 }
 0x5c2   : > { %v1143_v62 = vpack.c.bf16 %v1055_v61, %v1052_v60 }
 0x5c4   : > { %2767 = vmatprep.subr.msk.bf16.mxu0 %vm698_vm1, %v1143_v62  ;;  %v1154_v0 = vsel %vm698_vm1, %v1143_v62, 0 }
 0x5c7   : > { %2651 = vmatpush3.bf16.xpose.msra.mxu0 %v1154_v0 }
 0x5c8   : > { %2670 = vmatprep.subr.bf16.mxu0 %v2799_v63 }
 0x5ce   : > { %2653 = vmatmul.mubr.msk.bf16.vlgmr.msra.gmra.mxu0 %vm698_vm1, %v1142_v5 }
 0x5cf   : > { %2671 = vmatpush3.bf16.msra.mxu0 %v2799_v63  ;;  %2674 = vmatprep.mubr.msk.bf16.mxu0 %vm394_vm0, %v2990_v52 }
 0x5d0   : > { %2672 = vmatprep.subr.bf16.mxu0 %v2800_v6 }
 0x5d3   : > { %2673 = vmatpush3.bf16.msra.mxu0 %v2800_v6 }
 0x5d4   : > { %2686 = vmatprep.subr.bf16.mxu0 %v2801_v7 }
 0x5d6   : > { %2675 = vmatmul.mubr.msk.bf16.vlgmr.msra.gmra.mxu0 %vm394_vm0, %v2988_v51 }
 0x5d7   : > { %2687 = vmatpush3.bf16.msra.mxu0 %v2801_v7  ;;  %2690 = vmatprep.mubr.msk.bf16.mxu0 %vm394_vm0, %v2990_v52 }
 0x5d8   : > { %2688 = vmatprep.subr.bf16.mxu0 %v2802_v47 }
 0x5db   : > { %2689 = vmatpush3.bf16.msra.mxu0 %v2802_v47 }
 0x5de   : > { %2691 = vmatmul.mubr.msk.bf16.vlgmr.msra.gmra.mxu0 %vm394_vm0, %v2988_v51 }
 0x68e   : > { %v2654_v8 = vpop.f32.mrf.mxu0 }
 0x68f   : > { %v1209_v13 = vsel %vm459_vm3, %v2654_v8, -1e+30 }
 0x690   : > { %v1193_v9 = vpop.f32.mrf.mxu0  ;;  %v1216_v18 = vsel %vm762_vm4, %v1209_v13, -inf }
 0x691   : > { %v1207_v10 = vsel %vm459_vm3, %v1193_v9, -1e+30 }
 0x692   : > { %v2655_v11 = vpop.f32.mrf.mxu0  ;;  %v1210_v12 = vsel %vm762_vm4, %v1207_v10, -inf }
 0x693   : > { %1211 = vmax.xlane.f32.xlu0 %v1210_v12  ;;  %v2397_v11 = vld [vmem:[%s3338_s9 + $0x4] sm:$0xf] }
 0x694   : > { %v1196_v14 = vpop.f32.mrf.mxu0  ;;  %2769 = vmatprep.subr.msk.bf16.mxu1 %vm804_vm2, %v2397_v11  ;;  %v1313_v12 = vsel %vm804_vm2, %v2397_v11, 0 }
 0x695   : > { %v1208_v16 = vsel %vm459_vm3, %v1196_v14, -1e+30 }
 0x696   : > { %v2676_v17 = vpop.f32.mrf.mxu0  ;;  %v1213_v19 = vsel %vm762_vm4, %v1208_v16, -inf }
 0x697   : > { %v3145_v20 = vadd.f32 %v2676_v17, %v2405_v15  ;;  %1217 = vmax.xlane.f32.xlu0 %v1216_v18  ;;  %1214 = vmax.xlane.f32.xlu1 %v1213_v19 }
 0x698   : > { %v1425_v21 = vpop.f32.mrf.mxu0 }
 0x699   : > { %v1426_v23 = vadd.f32 %v2405_v15, %v1425_v21  ;;  %v2804_v21 = vld [vmem:[%s3333_s4 + $0x20] sm:$0xff]  }
 0x69a   : > { %v2677_v22 = vpop.f32.mrf.mxu0 }
 0x69b   : > { %v3150_v28 = vmul.f32 0.35355338, %v1426_v23  ;;  %v2341_v22 = vld [vmem:[%s3339_s10] ss:$0 sm:$0xff] }
 0x69c   : > { %v1428_v24 = vpop.f32.mrf.mxu0  ;;  %v469_v23 = vadd.f32 %v2341_v22, %v2951_v3 }
 0x69d   : > { %v1429_v26 = vadd.f32 %v2405_v15, %v1428_v24  ;;  %v467_v24 = vadd.f32 %v2949_v2, %v2341_v22  ;;  %v2415_v2 = vld [vmem:[%s3336_s7 + $0x2] ss:$0 sm:$0xff] }
 0x69e   : > { %v2692_v27 = vpop.f32.mrf.mxu0 }
 0x69f   : > { %v3152_v29 = vmul.f32 0.35355338, %v1429_v26  ;;  %v1580_v30 = vadd.f32 %v2692_v27, %v2425_v25  ;;  %v916_v27 = vadd.f32 %v3100_v46, %v467_v24 }
 0x6a0   : > { %v1571_v31 = vpop.f32.mrf.mxu0 }
 0x6a1   : > { %v1588_v32 = vpack.c.bf16 %v3152_v29, %v3150_v28  ;;  %v1593_v33 = vpack.c.bf16 %v1580_v30, %v1580_v30  ;;  %v1572_v38 = vadd.f32 %v2425_v25, %v1571_v31  ;;  %v468_v30 = vadd.f32 %v2953_v4, %v2341_v22 }
 0x6a2   : > { %v2693_v35 = vpop.f32.mrf.mxu0 }
 0x6a3   : > { %v1699_v36 = vsel %vm804_vm2, %v1593_v33, 0  ;;  %2772 = vmatprep.subr.msk.bf16.mxu0 %vm804_vm2, %v1593_v33  ;;  %v917_v33 = vadd.f32 %v3102_v49, %v468_v30 }
 0x6a4   : > { %v1574_v37 = vpop.f32.mrf.mxu0  ;;  %2703 = vmatpush3.bf16.msra.mxu0 %v1699_v36 }
 0x6a5   : > { %v1575_v39 = vadd.f32 %v2425_v25, %v1574_v37  ;;  %v918_v25 = vadd.f32 %v3098_v45, %v469_v23 }
 0x6a7   : > { %v1592_v40 = vpack.c.bf16 %v1575_v39, %v1572_v38 }
 0x6a9   : > { %2704 = vmatprep.subr.bf16.mxu0 %v1592_v40 }
 0x6aa   : > { %2705 = vmatpush3.bf16.msra.mxu0 %v1592_v40 }
 0x71c   : > { %v1212_v41 = vpop.xlane.xlu0 %1211 }
 0x71d   : > { %v1219_v42 = vsub.f32 %v1207_v10, %v1212_v41 }
 0x71f   : > { %v1222_v43 = vmul.f32 1.442695, %v1219_v42  ;;  %v2805_v42 = vld [vmem:[%s3332_s3 + $0x38] sm:$0xff]  }
 0x720   : > { %v1218_v44 = vpop.xlane.xlu0 %1217  ;;  %v1215_v48 = vpop.xlane.xlu1 %1214 }
 0x721   : > { %2829 = vpow2.f32 %v1222_v43  ;;  %v1221_v50 = vsub.f32 %v1209_v13, %v1218_v44  ;;  %v1220_v53 = vsub.f32 %v1208_v16, %v1215_v48  ;;  %v2803_v13 = vld [vmem:[%s3333_s4 + $0x28] sm:$0xff]   ;;  %v1587_v44 = vmul.f32 0.35355338, %v3145_v20  ;;  %v2808_v20 = vld [vmem:[%s3334_s5 + $0x30] sm:$0xff]  }
 0x723   : > { %v1226_v54 = vmul.f32 1.442695, %v1221_v50  ;;  %v1224_v55 = vmul.f32 1.442695, %v1220_v53  ;;  %v1589_v48 = vpack.c.bf16 %v1587_v44, %v1587_v44  ;;  %v2806_v50 = vld [vmem:[%s3332_s3 + $0x30] sm:$0xff]   ;;  %v2807_v53 = vld [vmem:[%s3334_s5 + $0x38] sm:$0xff]  }
 0x725   : > { %2831 = vpow2.f32 %v1226_v54 }
 0x726   : > { %2833 = vpow2.f32 %v1224_v55 }
 0x72e   : > { %v2830_v56 = vpop.eup %2829 }
 0x72f   : > { %v1228_v59 = vsel %vm762_vm4, %v2830_v56, 0.0 }
 0x730   : > { %1229 = vadd.xlane.f32.xlu1 %v1228_v59 }
 0x732   : > { %v2832_v57 = vpop.eup %2831 }
 0x733   : > { %v2834_v58 = vpop.eup %2833  ;;  %v1234_v60 = vsel %vm762_vm4, %v2832_v57, 0.0 }
 0x734   : > { %1235 = vadd.xlane.f32.xlu1 %v1234_v60  ;;  %v1231_v61 = vsel %vm762_vm4, %v2834_v58, 0.0 }
 0x735   : > { %1232 = vadd.xlane.f32.xlu0 %v1231_v61  ;;  %v2442_v61 = vld [vmem:[%s3335_s6 + $0x3] ss:$0 sm:$0xff] }
 0x7b9   : > { %v1230_v62 = vpop.xlane.xlu1 %1229 }
 0x7ba   : > { %2835 = vrcp.f32 %v1230_v62 }
 0x7bd   : > { %v1236_v63 = vpop.xlane.xlu1 %1235 }
 0x7be   : > { %v1233_v0 = vpop.xlane.xlu0 %1232  ;;  %2837 = vrcp.f32 %v1236_v63 }
 0x7bf   : > { %2839 = vrcp.f32 %v1233_v0 }
 0x7c7   : > { %v2836_v1 = vpop.eup %2835 }
 0x7c8   : > { %v1240_v47 = vmul.f32 %v2836_v1, %v2830_v56 }
 0x7cb   : > { %v2838_v5 = vpop.eup %2837 }
 0x7cc   : > { %v2840_v6 = vpop.eup %2839  ;;  %v1242_v7 = vmul.f32 %v2838_v5, %v2832_v57 }
 0x7cd   : > { %v1241_v8 = vmul.f32 %v2840_v6, %v2834_v58 }
 0x7ce   : > { %v1244_v9 = vpack.c.bf16 %v1242_v7, %v1242_v7 }
 0x7cf   : > { %v1243_v10 = vpack.c.bf16 %v1241_v8, %v1240_v47 }
 0x7d1   : > { %2660 = vmatprep.mubr.msk.bf16.mxu1 %vm762_vm4, %v1243_v10 }
 0x7d2   : > { %2661 = vmatmul.mubr.msk.bf16.vlgmr.msra.gmra.mxu1 %vm762_vm4, %v1244_v9  ;;  %v2462_v9 = vld [vmem:[%s3337_s8 + $0x3] ss:$0 sm:$0xff] }
 0x7d3   : > { %2665 = vmatpush3.bf16.msra.mxu1 %v1313_v12 }
 0x7d4   : > { %2678 = vmatprep.subr.bf16.mxu1 %v2803_v13 }
 0x892   : > { %v2662_v14 = vpop.f32.mrf.mxu1 }
 0x893   : > { %v1303_v19 = vpack.c.bf16 %v2662_v14, %v2662_v14 }
 0x894   : > { %v1288_v15 = vpop.f32.mrf.mxu1 }
 0x896   : > { %v2663_v16 = vpop.f32.mrf.mxu1 }
 0x898   : > { %v1291_v17 = vpop.f32.mrf.mxu1 }
 0x899   : > { %v1302_v18 = vpack.c.bf16 %v1291_v17, %v1288_v15 }
 0x89b   : > { %2666 = vmatprep.mubr.msk.bf16.mxu1 %vm698_vm1, %v1302_v18 }
 0x89c   : > { %2667 = vmatmul.mubr.msk.bf16.vlgmr.msra.gmra.mxu1 %vm698_vm1, %v1303_v19 }
 0x89d   : > { %2679 = vmatpush3.bf16.msra.mxu1 %v2803_v13  ;;  %2682 = vmatprep.mubr.msk.bf16.mxu1 %vm394_vm0, %v2990_v52 }
 0x89e   : > { %2680 = vmatprep.subr.bf16.mxu1 %v2804_v21 }
 0x8a1   : > { %2681 = vmatpush3.bf16.msra.mxu1 %v2804_v21 }
 0x8a4   : > { %2683 = vmatmul.mubr.msk.bf16.vlgmr.msra.gmra.mxu1 %vm394_vm0, %v2988_v51 }
 0x8a5   : > { %2698 = vmatprep.mubr.msk.bf16.mxu1 %vm698_vm1, %v1588_v32 }
 0x95c   : > { %v2668_v26 = vpop.f32.mrf.mxu1 }
 0x95d   : > { %v3192_v31 = vadd.f32 %v2668_v26, %v918_v25 }
 0x95e   : > { %v1349_v28 = vpop.f32.mrf.mxu1 }
 0x95f   : > { %v3194_v29 = vadd.f32 %v1349_v28, %v916_v27 }
 0x960   : > { %v2669_v32 = vpop.f32.mrf.mxu1 }
 0x962   : > { %v1352_v35 = vpop.f32.mrf.mxu1 }
 0x963   : > { %v3200_v3 = vadd.f32 %v1352_v35, %v917_v33 }
 0x964   : > { %v2684_v45 = vpop.f32.mrf.mxu1 }
 0x965   : > { %v1507_v36 = vadd.f32 %v2684_v45, %v2415_v2 }
 0x966   : > { %v1498_v46 = vpop.f32.mrf.mxu1 }
 0x967   : > { %v1591_v37 = vpack.c.bf16 %v1507_v36, %v1507_v36  ;;  %v1499_v40 = vadd.f32 %v2415_v2, %v1498_v46 }
 0x968   : > { %v2685_v4 = vpop.f32.mrf.mxu1 }
 0x969   : > { %v1604_v38 = vsel %vm698_vm1, %v1591_v37, 0  ;;  %2770 = vmatprep.subr.msk.bf16.mxu1 %vm698_vm1, %v1591_v37 }
 0x96a   : > { %v1501_v39 = vpop.f32.mrf.mxu1  ;;  %2695 = vmatpush3.bf16.xpose.msra.mxu1 %v1604_v38 }
 0x96b   : > { %v1502_v49 = vadd.f32 %v2415_v2, %v1501_v39 }
 0x96d   : > { %v1590_v41 = vpack.c.bf16 %v1502_v49, %v1499_v40 }
 0x96f   : > { %2771 = vmatprep.subr.msk.bf16.mxu1 %vm698_vm1, %v1590_v41  ;;  %v1601_v43 = vsel %vm698_vm1, %v1590_v41, 0 }
 0x972   : > { %2697 = vmatpush3.bf16.xpose.msra.mxu1 %v1601_v43 }
 0x973   : > { %2716 = vmatprep.subr.bf16.mxu1 %v2805_v42 }
 0x979   : > { %2699 = vmatmul.mubr.msk.bf16.vlgmr.msra.gmra.mxu1 %vm698_vm1, %v1589_v48 }
 0x97a   : > { %2717 = vmatpush3.bf16.msra.mxu1 %v2805_v42  ;;  %2720 = vmatprep.mubr.msk.bf16.mxu1 %vm394_vm0, %v2990_v52 }
 0x97b   : > { %2718 = vmatprep.subr.bf16.mxu1 %v2806_v50 }
 0x97e   : > { %2719 = vmatpush3.bf16.msra.mxu1 %v2806_v50 }
 0x97f   : > { %2732 = vmatprep.subr.bf16.mxu1 %v2807_v53 }
 0x981   : > { %2721 = vmatmul.mubr.msk.bf16.vlgmr.msra.gmra.mxu1 %vm394_vm0, %v2988_v51 }
 0x982   : > { %2733 = vmatpush3.bf16.msra.mxu1 %v2807_v53  ;;  %2736 = vmatprep.mubr.msk.bf16.mxu1 %vm394_vm0, %v2990_v52 }
 0x983   : > { %2734 = vmatprep.subr.bf16.mxu1 %v2808_v20 }
 0x986   : > { %2735 = vmatpush3.bf16.msra.mxu1 %v2808_v20 }
 0x989   : > { %2737 = vmatmul.mubr.msk.bf16.vlgmr.msra.gmra.mxu1 %vm394_vm0, %v2988_v51 }
 0xa39   : > { %v2700_v54 = vpop.f32.mrf.mxu1 }
 0xa3a   : > { %v1656_v58 = vsel %vm459_vm3, %v2700_v54, -1e+30  ;;  %v2434_v54 = vld [vmem:[%s3338_s9 + $0x8] sm:$0xf] }
 0xa3b   : > { %v1640_v55 = vpop.f32.mrf.mxu1  ;;  %v1663_v0 = vsel %vm762_vm4, %v1656_v58, -inf  ;;  %2773 = vmatprep.subr.msk.bf16.mxu0 %vm804_vm2, %v2434_v54 }
 0xa3c   : > { %v1654_v56 = vsel %vm459_vm3, %v1640_v55, -1e+30  ;;  %v1760_v55 = vsel %vm804_vm2, %v2434_v54, 0 }
 0xa3d   : > { %v2701_v59 = vpop.f32.mrf.mxu1  ;;  %v1657_v57 = vsel %vm762_vm4, %v1654_v56, -inf }
 0xa3e   : > { %1658 = vmax.xlane.f32.xlu0 %v1657_v57 }
 0xa3f   : > { %v1643_v60 = vpop.f32.mrf.mxu1 }
 0xa40   : > { %v1655_v62 = vsel %vm459_vm3, %v1643_v60, -1e+30 }
 0xa41   : > { %v2722_v63 = vpop.f32.mrf.mxu1  ;;  %v1660_v1 = vsel %vm762_vm4, %v1655_v62, -inf }
 0xa42   : > { %v3240_v5 = vadd.f32 %v2722_v63, %v2442_v61  ;;  %1664 = vmax.xlane.f32.xlu0 %v1663_v0  ;;  %1661 = vmax.xlane.f32.xlu1 %v1660_v1  ;;  %v2810_v63 = vld [vmem:[%s3333_s4 + $0x30] sm:$0xff]  }
 0xa43   : > { %v1872_v6 = vpop.f32.mrf.mxu1 }
 0xa44   : > { %v1873_v47 = vadd.f32 %v2442_v61, %v1872_v6 }
 0xa45   : > { %v2723_v7 = vpop.f32.mrf.mxu1 }
 0xa46   : > { %v3245_v12 = vmul.f32 0.35355338, %v1873_v47 }
 0xa47   : > { %v1875_v8 = vpop.f32.mrf.mxu1 }
 0xa48   : > { %v1876_v10 = vadd.f32 %v2442_v61, %v1875_v8  ;;  %v2452_v8 = vld [vmem:[%s3336_s7 + $0x3] ss:$0 sm:$0xff] }
 0xa49   : > { %v2738_v11 = vpop.f32.mrf.mxu1 }
 0xa4a   : > { %v3247_v13 = vmul.f32 0.35355338, %v1876_v10  ;;  %v2027_v14 = vadd.f32 %v2738_v11, %v2462_v9 }
 0xa4b   : > { %v2018_v15 = vpop.f32.mrf.mxu1 }
 0xa4c   : > { %v2035_v16 = vpack.c.bf16 %v3247_v13, %v3245_v12  ;;  %v2040_v17 = vpack.c.bf16 %v2027_v14, %v2027_v14  ;;  %v2019_v22 = vadd.f32 %v2462_v9, %v2018_v15 }
 0xa4d   : > { %v2739_v18 = vpop.f32.mrf.mxu1 }
 0xa4e   : > { %v2146_v19 = vsel %vm804_vm2, %v2040_v17, 0  ;;  %2776 = vmatprep.subr.msk.bf16.mxu1 %vm804_vm2, %v2040_v17 }
 0xa4f   : > { %v2021_v21 = vpop.f32.mrf.mxu1  ;;  %2749 = vmatpush3.bf16.msra.mxu1 %v2146_v19 }
 0xa50   : > { %v2022_v23 = vadd.f32 %v2462_v9, %v2021_v21 }
 0xa52   : > { %v2039_v24 = vpack.c.bf16 %v2022_v23, %v2019_v22 }
 0xa54   : > { %2750 = vmatprep.subr.bf16.mxu1 %v2039_v24 }
 0xa55   : > { %2751 = vmatpush3.bf16.msra.mxu1 %v2039_v24 }
 0xac7   : > { %v1659_v25 = vpop.xlane.xlu0 %1658 }
 0xac8   : > { %v1666_v26 = vsub.f32 %v1654_v56, %v1659_v25  ;;  %v2809_v56 = vld [vmem:[%s3333_s4 + $0x38] sm:$0xff]  }
 0xaca   : > { %v1669_v27 = vmul.f32 1.442695, %v1666_v26 }
 0xacb   : > { %v1665_v30 = vpop.xlane.xlu0 %1664  ;;  %v1662_v28 = vpop.xlane.xlu1 %1661 }
 0xacc   : > { %2841 = vpow2.f32 %v1669_v27  ;;  %v1668_v32 = vsub.f32 %v1656_v58, %v1665_v30  ;;  %v1667_v33 = vsub.f32 %v1655_v62, %v1662_v28 }
 0xace   : > { %v1673_v35 = vmul.f32 1.442695, %v1668_v32  ;;  %v1671_v2 = vmul.f32 1.442695, %v1667_v33 }
 0xad0   : > { %2843 = vpow2.f32 %v1673_v35 }
 0xad1   : > { %2845 = vpow2.f32 %v1671_v2 }
 0xad9   : > { %v2842_v45 = vpop.eup %2841 }
 0xada   : > { %v1675_v36 = vsel %vm762_vm4, %v2842_v45, 0.0 }
 0xadb   : > { %1676 = vadd.xlane.f32.xlu1 %v1675_v36 }
 0xadd   : > { %v2844_v46 = vpop.eup %2843 }
 0xade   : > { %v2846_v37 = vpop.eup %2845  ;;  %v1681_v4 = vsel %vm762_vm4, %v2844_v46, 0.0 }
 0xadf   : > { %1682 = vadd.xlane.f32.xlu1 %v1681_v4  ;;  %v1678_v38 = vsel %vm762_vm4, %v2846_v37, 0.0 }
 0xae0   : > { %1679 = vadd.xlane.f32.xlu0 %v1678_v38 }
 0xb64   : > { %v1677_v39 = vpop.xlane.xlu1 %1676 }
 0xb65   : > { %2847 = vrcp.f32 %v1677_v39 }
 0xb68   : > { %v1683_v40 = vpop.xlane.xlu1 %1682 }
 0xb69   : > { %v1680_v49 = vpop.xlane.xlu0 %1679  ;;  %2849 = vrcp.f32 %v1683_v40 }
 0xb6a   : > { %2851 = vrcp.f32 %v1680_v49 }
 0xb72   : > { %v2848_v41 = vpop.eup %2847 }
 0xb73   : > { %v1687_v48 = vmul.f32 %v2848_v41, %v2842_v45 }
 0xb76   : > { %v2850_v42 = vpop.eup %2849 }
 0xb77   : > { %v2852_v43 = vpop.eup %2851  ;;  %v1689_v44 = vmul.f32 %v2850_v42, %v2844_v46 }
 0xb78   : > { %v1688_v50 = vmul.f32 %v2852_v43, %v2846_v37 }
 0xb79   : > { %v1691_v53 = vpack.c.bf16 %v1689_v44, %v1689_v44 }
 0xb7a   : > { %v1690_v20 = vpack.c.bf16 %v1688_v50, %v1687_v48 }
 0xb7c   : > { %2706 = vmatprep.mubr.msk.bf16.mxu0 %vm762_vm4, %v1690_v20 }
 0xb7d   : > { %2707 = vmatmul.mubr.msk.bf16.vlgmr.msra.gmra.mxu0 %vm762_vm4, %v1691_v53 }
 0xb7e   : > { %2711 = vmatpush3.bf16.msra.mxu0 %v1760_v55 }
 0xb7f   : > { %2724 = vmatprep.subr.bf16.mxu0 %v2809_v56 }
 0xc3d   : > { %v2708_v59 = vpop.f32.mrf.mxu0 }
 0xc3e   : > { %v1750_v62 = vpack.c.bf16 %v2708_v59, %v2708_v59  ;;  %v2471_v59 = vld [vmem:[%s3338_s9 + $0xc] sm:$0xf] }
 0xc3f   : > { %v1735_v57 = vpop.f32.mrf.mxu0  ;;  %2777 = vmatprep.subr.msk.bf16.mxu1 %vm804_vm2, %v2471_v59 }
 0xc41   : > { %v2709_v58 = vpop.f32.mrf.mxu0 }
 0xc43   : > { %v1738_v60 = vpop.f32.mrf.mxu0 }
 0xc44   : > { %v1749_v61 = vpack.c.bf16 %v1738_v60, %v1735_v57  ;;  %v2207_v57 = vsel %vm804_vm2, %v2471_v59, 0 }
 0xc46   : > { %2712 = vmatprep.mubr.msk.bf16.mxu0 %vm698_vm1, %v1749_v61 }
 0xc47   : > { %2713 = vmatmul.mubr.msk.bf16.vlgmr.msra.gmra.mxu0 %vm698_vm1, %v1750_v62 }
 0xc48   : > { %2725 = vmatpush3.bf16.msra.mxu0 %v2809_v56  ;;  %2728 = vmatprep.mubr.msk.bf16.mxu0 %vm394_vm0, %v2990_v52 }
 0xc49   : > { %2726 = vmatprep.subr.bf16.mxu0 %v2810_v63 }
 0xc4c   : > { %2727 = vmatpush3.bf16.msra.mxu0 %v2810_v63 }
 0xc4f   : > { %2729 = vmatmul.mubr.msk.bf16.vlgmr.msra.gmra.mxu0 %vm394_vm0, %v2988_v51 }
 0xc50   : > { %2744 = vmatprep.mubr.msk.bf16.mxu0 %vm698_vm1, %v2035_v16 }
 0xd07   : > { %v2714_v0 = vpop.f32.mrf.mxu0 }
 0xd08   : > { %v3280_v1 = vadd.f32 %v2714_v0, %v3192_v31 }
 0xd09   : > { %v1796_v6 = vpop.f32.mrf.mxu0 }
 0xd0a   : > { %v3283_v7 = vadd.f32 %v1796_v6, %v3194_v29 }
 0xd0b   : > { %v2715_v47 = vpop.f32.mrf.mxu0 }
 0xd0d   : > { %v1799_v52 = vpop.f32.mrf.mxu0 }
 0xd0e   : > { %v3289_v51 = vadd.f32 %v1799_v52, %v3200_v3  ;;  %v2034_v3 = vmul.f32 0.35355338, %v3240_v5 }
 0xd0f   : > { %v2730_v9 = vpop.f32.mrf.mxu0 }
 0xd10   : > { %v1954_v10 = vadd.f32 %v2730_v9, %v2452_v8  ;;  %v2036_v18 = vpack.c.bf16 %v2034_v3, %v2034_v3 }
 0xd11   : > { %v1945_v11 = vpop.f32.mrf.mxu0 }
 0xd12   : > { %v2038_v12 = vpack.c.bf16 %v1954_v10, %v1954_v10  ;;  %v1946_v14 = vadd.f32 %v2452_v8, %v1945_v11 }
 0xd13   : > { %v2731_v13 = vpop.f32.mrf.mxu0 }
 0xd14   : > { %v2051_v31 = vsel %vm698_vm1, %v2038_v12, 0  ;;  %2774 = vmatprep.subr.msk.bf16.mxu0 %vm698_vm1, %v2038_v12 }
 0xd15   : > { %v1948_v29 = vpop.f32.mrf.mxu0  ;;  %2741 = vmatpush3.bf16.xpose.msra.mxu0 %v2051_v31 }
 0xd16   : > { %v1949_v15 = vadd.f32 %v2452_v8, %v1948_v29 }
 0xd18   : > { %v2037_v16 = vpack.c.bf16 %v1949_v15, %v1946_v14 }
 0xd1a   : > { %2775 = vmatprep.subr.msk.bf16.mxu0 %vm698_vm1, %v2037_v16  ;;  %v2048_v17 = vsel %vm698_vm1, %v2037_v16, 0 }
 0xd1d   : > { %2743 = vmatpush3.bf16.xpose.msra.mxu0 %v2048_v17 }
 0xd24   : > { %2745 = vmatmul.mubr.msk.bf16.vlgmr.msra.gmra.mxu0 %vm698_vm1, %v2036_v18 }
 0xde4   : > { %v2746_v19 = vpop.f32.mrf.mxu0 }
 0xde5   : > { %v2103_v25 = vsel %vm459_vm3, %v2746_v19, -1e+30 }
 0xde6   : > { %v2087_v21 = vpop.f32.mrf.mxu0  ;;  %v2110_v5 = vsel %vm762_vm4, %v2103_v25, -inf }
 0xde7   : > { %v2101_v22 = vsel %vm459_vm3, %v2087_v21, -1e+30 }
 0xde8   : > { %v2747_v23 = vpop.f32.mrf.mxu0  ;;  %v2104_v24 = vsel %vm762_vm4, %v2101_v22, -inf }
 0xde9   : > { %2105 = vmax.xlane.f32.xlu0 %v2104_v24 }
 0xdea   : > { %v2090_v26 = vpop.f32.mrf.mxu0 }
 0xdeb   : > { %v2102_v27 = vsel %vm459_vm3, %v2090_v26, -1e+30 }
 0xdec   : > { %v2107_v30 = vsel %vm762_vm4, %v2102_v27, -inf }
 0xded   : > { %2111 = vmax.xlane.f32.xlu0 %v2110_v5  ;;  %2108 = vmax.xlane.f32.xlu1 %v2107_v30 }
 0xe72   : > { %v2106_v28 = vpop.xlane.xlu0 %2105 }
 0xe73   : > { %v2113_v32 = vsub.f32 %v2101_v22, %v2106_v28 }
 0xe75   : > { %v2116_v33 = vmul.f32 1.442695, %v2113_v32 }
 0xe76   : > { %v2112_v35 = vpop.xlane.xlu0 %2111  ;;  %v2109_v2 = vpop.xlane.xlu1 %2108 }
 0xe77   : > { %2853 = vpow2.f32 %v2116_v33  ;;  %v2115_v45 = vsub.f32 %v2103_v25, %v2112_v35  ;;  %v2114_v36 = vsub.f32 %v2102_v27, %v2109_v2 }
 0xe79   : > { %v2120_v46 = vmul.f32 1.442695, %v2115_v45  ;;  %v2118_v37 = vmul.f32 1.442695, %v2114_v36 }
 0xe7b   : > { %2855 = vpow2.f32 %v2120_v46 }
 0xe7c   : > { %2857 = vpow2.f32 %v2118_v37 }
 0xe84   : > { %v2854_v34 = vpop.eup %2853 }
 0xe85   : > { %v2122_v4 = vsel %vm762_vm4, %v2854_v34, 0.0 }
 0xe86   : > { %2123 = vadd.xlane.f32.xlu1 %v2122_v4 }
 0xe88   : > { %v2856_v38 = vpop.eup %2855 }
 0xe89   : > { %v2858_v39 = vpop.eup %2857  ;;  %v2128_v40 = vsel %vm762_vm4, %v2856_v38, 0.0 }
 0xe8a   : > { %2129 = vadd.xlane.f32.xlu1 %v2128_v40  ;;  %v2125_v49 = vsel %vm762_vm4, %v2858_v39, 0.0 }
 0xe8b   : > { %2126 = vadd.xlane.f32.xlu0 %v2125_v49 }
 0xf0f   : > { %v2124_v41 = vpop.xlane.xlu1 %2123 }
 0xf10   : > { %2859 = vrcp.f32 %v2124_v41 }
 0xf13   : > { %v2130_v42 = vpop.xlane.xlu1 %2129 }
 0xf14   : > { %v2127_v43 = vpop.xlane.xlu0 %2126  ;;  %2861 = vrcp.f32 %v2130_v42 }
 0xf15   : > { %2863 = vrcp.f32 %v2127_v43 }
 0xf1d   : > { %v2860_v44 = vpop.eup %2859 }
 0xf1e   : > { %v2134_v20 = vmul.f32 %v2860_v44, %v2854_v34 }
 0xf21   : > { %v2862_v48 = vpop.eup %2861 }
 0xf22   : > { %v2864_v50 = vpop.eup %2863  ;;  %v2136_v53 = vmul.f32 %v2862_v48, %v2856_v38 }
 0xf23   : > { %v2135_v54 = vmul.f32 %v2864_v50, %v2858_v39 }
 0xf24   : > { %v2138_v55 = vpack.c.bf16 %v2136_v53, %v2136_v53 }
 0xf25   : > { %v2137_v56 = vpack.c.bf16 %v2135_v54, %v2134_v20 }
 0xf27   : > { %2752 = vmatprep.mubr.msk.bf16.mxu1 %vm762_vm4, %v2137_v56 }
 0xf28   : > { %2753 = vmatmul.mubr.msk.bf16.vlgmr.msra.gmra.mxu1 %vm762_vm4, %v2138_v55 }
 0xf29   : > { %2757 = vmatpush3.bf16.msra.mxu1 %v2207_v57 }
 0xfe8   : > { %v2754_v58 = vpop.f32.mrf.mxu1 }
 0xfe9   : > { %v2197_v0 = vpack.c.bf16 %v2754_v58, %v2754_v58 }
 0xfea   : > { %v2182_v60 = vpop.f32.mrf.mxu1 }
 0xfec   : > { %v2755_v61 = vpop.f32.mrf.mxu1 }
 0xfee   : > { %v2185_v62 = vpop.f32.mrf.mxu1 }
 0xfef   : > { %v2196_v63 = vpack.c.bf16 %v2185_v62, %v2182_v60 }
 0xff1   : > { %2758 = vmatprep.mubr.msk.bf16.mxu1 %vm698_vm1, %v2196_v63 }
 0xff2   : > { %2759 = vmatmul.mubr.msk.bf16.vlgmr.msra.gmra.mxu1 %vm698_vm1, %v2197_v0 }
0x10b2   : > { %v2760_v6 = vpop.f32.mrf.mxu1 }
0x10b3   : > { %v2259_v47 = vadd.f32 %v2760_v6, %v3280_v1 }
0x10b4   : > { %v2243_v52 = vpop.f32.mrf.mxu1 }
0x10b5   : > { %v2481_v8 = vpack.c.bf16 %v2259_v47, %v2259_v47  ;;  %v2257_v9 = vadd.f32 %v2243_v52, %v3283_v7 }
0x10b6   : > { %v2761_v10 = vpop.f32.mrf.mxu1 }
0x10b7   : > { %2276 = vst.msk [vmem:[%s386_s12 + $0x8] sm:$0xf] %vm2273_vm5, %v2481_v8  ;;  %v2479_v11 = vpack.c.bf16 %v2257_v9, %v2257_v9 }
0x10b8   : > { %v2246_v12 = vpop.f32.mrf.mxu1 }
0x10b9   : > { %2274 = vst.msk [vmem:[%s386_s12] sm:$0xf] %vm2273_vm5, %v2479_v11  ;;  %v2258_v13 = vadd.f32 %v2246_v12, %v3289_v51 }
0x10bb   : > { %v2480_v31 = vpack.c.bf16 %v2258_v13, %v2258_v13 }
0x10bd   : > { %2275 = vst.msk [vmem:[%s386_s12 + $0x4] sm:$0xf] %vm2273_vm5, %v2480_v31 }
0x10be PF: > { %s21_s17 = sadd.s32 1, %s2871_s17  }
0x10bf   : > { %p18_p4 = scmp.ge.s32.totalorder %s21_s17, 4  }
0x10c1   :  { %20 = sbr.rel (!%p18_p4) target bundleno = 1 (0x1), region = 115 }

</bundles_post_ra>
